<compile_context>
chip_gen: v6e
topology: v6e:2x2x1
jax: 0.10.0
libtpu: 0.0.40
codegen_flags: <defaults>
</compile_context>

<pallas_src>
import math

import jax
import jax.numpy as jnp
from jax import lax
from jax.experimental import pallas as pl
from jax.experimental.pallas import tpu as pltpu

_EPS = 1e-5


def _pad8(n):
    return ((n + 7) // 8) * 8


# --------------------------------------------------------------------------- in-kernel helpers

def _gn_relu(x, p, g, b_aff, n_batch, eps):
    """GroupNorm + ReLU on a (C_pad, B*HW) f32 tile (batch folded into lanes).

    Per-batch stats: lane-reduce each (lane-aligned) HW slice to (C,1), group-average
    the tiny (C,1) sums with `p` (entries 1/(Cg*HW) for same-group *real* channels,
    zero rows/cols for padded channels), then apply the folded affine
    y = x*scale + shift.  Padded channels stay exactly zero (g_pad = b_pad = 0).
    """
    c, n_lanes = x.shape
    hw = n_lanes // n_batch
    outs = []
    for bi in range(n_batch):
        xs = x[:, bi * hw:(bi + 1) * hw]                          # lane-aligned slice
        s1 = jnp.sum(xs, axis=1, keepdims=True)                   # (C, 1)
        s2 = jnp.sum(xs * xs, axis=1, keepdims=True)              # (C, 1)
        mean = jnp.dot(p, s1, preferred_element_type=jnp.float32)  # group mean
        e2 = jnp.dot(p, s2, preferred_element_type=jnp.float32)    # group E[x^2]
        var = e2 - mean * mean                                     # biased var (torch GN)
        inv = lax.rsqrt(var + eps)
        scale = inv * g
        shift = b_aff - mean * scale
        outs.append(jnp.maximum(xs * scale + shift, 0.0))
    return outs[0] if n_batch == 1 else jnp.concatenate(outs, axis=1)


def _taps_3x3(x, masks, w_img):
    """Merged (9*C_pad, B*HW) im2col matrix for a 3x3 / stride-1 / pad-1 conv.

    x: (C_pad, B*HW) f32, row-major flattened HxW images, batch folded into lanes.
    masks: (9, B*HW) boundary masks (1 inside image, 0 where a tap lands in the zero
    padding), tiled per batch segment.  Tap k = kh*3 + kw reads flat offset
    d = (kh-1)*W + (kw-1); out-of-image (and cross-batch wrapped) taps are masked.
    """
    n_lanes = x.shape[1]
    taps = []
    for kh in range(3):
        for kw in range(3):
            k = kh * 3 + kw
            d = (kh - 1) * w_img + (kw - 1)
            if d % n_lanes == 0:
                t = x
            else:
                t = pltpu.roll(x, shift=(-d) % n_lanes, axis=1)   # out[:, p] = x[:, p + d]
            taps.append(t * masks[k:k + 1, :])
    # C_pad % 8 == 0 -> each tap piece is sublane-tile aligned; concat is plain stores.
    return jnp.concatenate(taps, axis=0)


def _make_kernel(stages, n_arrays, n_batch, eps):
    """Build the fused EncoderBlock kernel (one invocation, all stages in VMEM)."""

    def kernel(*refs):
        o_ref = refs[n_arrays]
        cur = refs[0][...].astype(jnp.float32)                    # (C0_pad, B*HW)
        for st in stages:
            masks = refs[st['masks']][...]
            w_img = st['w_img']
            if st['kind'] == 'res':
                x0 = cur
                y = _gn_relu(x0, refs[st['p1']][...], refs[st['g1']][...],
                             refs[st['b1']][...], n_batch, eps)
                h = jnp.dot(refs[st['w1']][...], _taps_3x3(y, masks, w_img),
                            preferred_element_type=jnp.float32) + refs[st['c1b']][...]
                y = _gn_relu(h, refs[st['p2']][...], refs[st['g2']][...],
                             refs[st['b2']][...], n_batch, eps)
                # dropout(p=0.1) -> identity (eval mode)
                h = jnp.dot(refs[st['w2']][...], _taps_3x3(y, masks, w_img),
                            preferred_element_type=jnp.float32) + refs[st['c2b']][...]
                if st['has_sc']:
                    sc = (jnp.dot(refs[st['wsc']][...], x0,
                                  preferred_element_type=jnp.float32)
                          + refs[st['bsc']][...])
                else:
                    sc = x0
                cur = h + sc
            elif st['kind'] == 'down':
                # 3x3 stride-2 pad-1: stride-1 conv then one-hot column select (MXU).
                full = jnp.dot(refs[st['w']][...], _taps_3x3(cur, masks, w_img),
                               preferred_element_type=jnp.float32)
                cur = (jnp.dot(full, refs[st['sel']][...],
                               preferred_element_type=jnp.float32)
                       + refs[st['b']][...])
            else:  # 'last' : 3x3 stride-1 pad-1 conv
                cur = (jnp.dot(refs[st['w']][...], _taps_3x3(cur, masks, w_img),
                               preferred_element_type=jnp.float32)
                       + refs[st['b']][...])
        o_ref[...] = cur.astype(o_ref.dtype)

    return kernel


# --------------------------------------------------------------------------- wrapper helpers

def _conv3x3_masks(h, w):
    pos = jnp.arange(h * w)
    r, c = pos // w, pos % w
    masks = []
    for kh in range(3):
        for kw in range(3):
            dh, dw = kh - 1, kw - 1
            masks.append((r + dh >= 0) & (r + dh < h) & (c + dw >= 0) & (c + dw < w))
    return jnp.stack(masks, axis=0).astype(jnp.float32)           # (9, HW)


def _merge_conv_w(w, cin_pad, cout_pad):
    """(Cout, Cin, 3, 3) PyTorch layout -> (Cout_pad, 9*Cin_pad); col = k*Cin_pad + ci."""
    cout, cin, kh, kw = w.shape
    wp = jnp.zeros((cout_pad, cin_pad, kh, kw), jnp.float32)
    wp = wp.at[:cout, :cin].set(w.astype(jnp.float32))
    return jnp.transpose(wp, (0, 2, 3, 1)).reshape(cout_pad, kh * kw * cin_pad)


def _pad_col(v, c_pad):
    v = v.astype(jnp.float32).reshape(-1, 1)
    return jnp.zeros((c_pad, 1), jnp.float32).at[:v.shape[0]].set(v)


def _group_matrix(c_real, c_pad, num_groups, hw):
    cg = c_real // num_groups
    gidx = jnp.arange(c_pad) // cg
    valid = jnp.arange(c_pad) < c_real
    same = (gidx[:, None] == gidx[None, :]) & valid[:, None] & valid[None, :]
    return same.astype(jnp.float32) / float(cg * hw)


def _stride2_select(b, h, w):
    """One-hot (B*HW, B*HWout) matrix selecting input positions (2*oh, 2*ow)."""
    ho, wo = (h - 1) // 2 + 1, (w - 1) // 2 + 1
    hw, hwo = h * w, ho * wo
    col = jnp.arange(b * hwo)
    bi, j = col // hwo, col % hwo
    src = bi * hw + (j // wo) * 2 * w + (j % wo) * 2
    sel = (jnp.arange(b * hw)[:, None] == src[None, :]).astype(jnp.float32)
    return sel, ho, wo


# --------------------------------------------------------------------------- module forward

def encoder_block_pallas(x, params, num_groups):
    """x: (B, Cin, H, W) NCHW -> NCHW output, matching PyTorch EncoderBlock.forward.

    Single fused pallas_call; internal layout is (C_pad, B*HW) with channels padded to
    a multiple of 8 and batch folded into lanes.
    """
    B, Cin, H, W = x.shape
    arrays = []

    def add(a):
        arrays.append(a)
        return len(arrays) - 1

    cin_pad = _pad8(Cin)
    xp = x if cin_pad == Cin else jnp.pad(x, ((0, 0), (0, cin_pad - Cin), (0, 0), (0, 0)))
    add(jnp.transpose(xp.reshape(B, cin_pad, H * W), (1, 0, 2)).reshape(cin_pad, B * H * W))

    masks_cache = {}

    def masks_idx(h, w):
        if (h, w) not in masks_cache:
            masks_cache[(h, w)] = add(jnp.tile(_conv3x3_masks(h, w), (1, B)))
        return masks_cache[(h, w)]

    stages = []
    flops, trans = 0, 0
    cur_c, cur_real, cur_h, cur_w = cin_pad, Cin, H, W

    for p in params['res_blocks']:
        cout = p['conv1_w'].shape[0]
        cout_pad = _pad8(cout)
        hw = cur_h * cur_w
        st = dict(kind='res', w_img=cur_w, masks=masks_idx(cur_h, cur_w),
                  has_sc='sc_w' in p)
        st['p1'] = add(_group_matrix(cur_real, cur_c, num_groups, hw))
        st['g1'] = add(_pad_col(p['gn1_g'], cur_c))
        st['b1'] = add(_pad_col(p['gn1_b'], cur_c))
        st['w1'] = add(_merge_conv_w(p['conv1_w'], cur_c, cout_pad))
        st['c1b'] = add(_pad_col(p['conv1_b'], cout_pad))
        st['p2'] = add(_group_matrix(cout, cout_pad, num_groups, hw))
        st['g2'] = add(_pad_col(p['gn2_g'], cout_pad))
        st['b2'] = add(_pad_col(p['gn2_b'], cout_pad))
        st['w2'] = add(_merge_conv_w(p['conv2_w'], cout_pad, cout_pad))
        st['c2b'] = add(_pad_col(p['conv2_b'], cout_pad))
        if st['has_sc']:
            wsc = jnp.zeros((cout_pad, cur_c), jnp.float32).at[:cout, :cur_real].set(
                p['sc_w'].reshape(cout, cur_real).astype(jnp.float32))
            st['wsc'] = add(wsc)
            st['bsc'] = add(_pad_col(p['sc_b'], cout_pad))
        stages.append(st)
        flops += 2 * B * hw * (9 * cur_c * cout_pad + 9 * cout_pad * cout_pad
                               + (cur_c * cout_pad if st['has_sc'] else 0))
        trans += 2 * B * (cur_c + cout_pad)
        cur_c, cur_real = cout_pad, cout

    if 'down_w' in params:
        cout = params['down_w'].shape[0]
        cout_pad = _pad8(cout)
        hw = cur_h * cur_w
        sel, ho, wo = _stride2_select(B, cur_h, cur_w)
        st = dict(kind='down', w_img=cur_w, masks=masks_idx(cur_h, cur_w))
        st['w'] = add(_merge_conv_w(params['down_w'], cur_c, cout_pad))
        st['sel'] = add(sel)
        st['b'] = add(_pad_col(params['down_b'], cout_pad))
        stages.append(st)
        flops += 2 * B * hw * 9 * cur_c * cout_pad + 2 * cout_pad * (B * hw) * (B * ho * wo)
        cur_c, cur_real, cur_h, cur_w = cout_pad, cout, ho, wo

    if 'last_w' in params:
        lat = params['last_w'].shape[0]
        lat_pad = _pad8(lat)
        st = dict(kind='last', w_img=cur_w, masks=masks_idx(cur_h, cur_w))
        st['w'] = add(_merge_conv_w(params['last_w'], cur_c, lat_pad))
        st['b'] = add(_pad_col(params['last_b'], lat_pad))
        stages.append(st)
        flops += 2 * B * cur_h * cur_w * 9 * cur_c * lat_pad
        cur_c, cur_real = lat_pad, lat

    n_arrays = len(arrays)
    out_lanes = B * cur_h * cur_w
    kernel = _make_kernel(stages, n_arrays, B, _EPS)
    bytes_acc = int(sum(int(a.size) * a.dtype.itemsize for a in arrays)
                    + cur_c * out_lanes * x.dtype.itemsize)

    out = pl.pallas_call(
        kernel,
        out_shape=jax.ShapeDtypeStruct((cur_c, out_lanes), x.dtype),
        grid=(1,),
        in_specs=[pl.BlockSpec(a.shape, lambda i, _n=a.ndim: (0,) * _n) for a in arrays],
        out_specs=pl.BlockSpec((cur_c, out_lanes), lambda i: (0, 0)),
        # v7x note: at production sizes add an HW-tile "parallel" grid axis so both
        # TensorCores are used and set vmem_limit_bytes explicitly.
        compiler_params=pltpu.CompilerParams(dimension_semantics=("arbitrary",)),
        cost_estimate=pl.CostEstimate(flops=int(flops), transcendentals=int(trans),
                                      bytes_accessed=bytes_acc),
    )(*arrays)

    out = jnp.transpose(out.reshape(cur_c, B, cur_h, cur_w), (1, 0, 2, 3))
    return out[:, :cur_real]


# --------------------------------------------------------------------------- pure-JAX reference

def _ref_conv(x, w, b, stride, pad):
    out = lax.conv_general_dilated(
        x, w, (stride, stride), [(pad, pad), (pad, pad)],
        dimension_numbers=('NCHW', 'OIHW', 'NCHW'),
        precision=lax.Precision.HIGHEST)
    return out + b[None, :, None, None]


def _ref_gn(x, g, bt, num_groups, eps=_EPS):
    B, C, H, W = x.shape
    xr = x.reshape(B, num_groups, C // num_groups, H, W)
    m = xr.mean(axis=(2, 3, 4), keepdims=True)
    v = ((xr - m) ** 2).mean(axis=(2, 3, 4), keepdims=True)
    xn = ((xr - m) / jnp.sqrt(v + eps)).reshape(B, C, H, W)
    return xn * g[None, :, None, None] + bt[None, :, None, None]


def encoder_block_ref(x, params, num_groups):
    for p in params['res_blocks']:
        h = jnp.maximum(_ref_gn(x, p['gn1_g'], p['gn1_b'], num_groups), 0.0)
        h = _ref_conv(h, p['conv1_w'], p['conv1_b'], 1, 1)
        h = jnp.maximum(_ref_gn(h, p['gn2_g'], p['gn2_b'], num_groups), 0.0)
        h = _ref_conv(h, p['conv2_w'], p['conv2_b'], 1, 1)
        sc = _ref_conv(x, p['sc_w'], p['sc_b'], 1, 0) if 'sc_w' in p else x
        x = h + sc
    if 'down_w' in params:
        x = _ref_conv(x, params['down_w'], params['down_b'], 2, 1)
    if 'last_w' in params:
        x = _ref_conv(x, params['last_w'], params['last_b'], 1, 1)
    return x


# --------------------------------------------------------------------------- params

def init_params(key, in_ch, out_ch, latent_ch, num_res_blocks, down_block):
    params = {'res_blocks': []}
    now = in_ch
    for _ in range(num_res_blocks):
        key, k0, k1, k2, k3, k4, k5 = jax.random.split(key, 7)
        p = {
            'gn1_g': jnp.ones((now,), jnp.float32),
            'gn1_b': jnp.zeros((now,), jnp.float32),
            'conv1_w': jax.random.normal(k0, (out_ch, now, 3, 3), jnp.float32) / math.sqrt(now * 9),
            'conv1_b': 0.01 * jax.random.normal(k1, (out_ch,), jnp.float32),
            'gn2_g': jnp.ones((out_ch,), jnp.float32),
            'gn2_b': jnp.zeros((out_ch,), jnp.float32),
            'conv2_w': jax.random.normal(k2, (out_ch, out_ch, 3, 3), jnp.float32) / math.sqrt(out_ch * 9),
            'conv2_b': 0.01 * jax.random.normal(k3, (out_ch,), jnp.float32),
        }
        if now != out_ch:
            p['sc_w'] = jax.random.normal(k4, (out_ch, now, 1, 1), jnp.float32) / math.sqrt(now)
            p['sc_b'] = 0.01 * jax.random.normal(k5, (out_ch,), jnp.float32)
        params['res_blocks'].append(p)
        now = out_ch
    if down_block:
        key, k0, k1 = jax.random.split(key, 3)
        params['down_w'] = jax.random.normal(k0, (out_ch, out_ch, 3, 3), jnp.float32) / math.sqrt(out_ch * 9)
        params['down_b'] = 0.01 * jax.random.normal(k1, (out_ch,), jnp.float32)
    if latent_ch:
        key, k0, k1 = jax.random.split(key, 3)
        params['last_w'] = jax.random.normal(k0, (latent_ch, out_ch, 3, 3), jnp.float32) / math.sqrt(out_ch * 9)
        params['last_b'] = 0.01 * jax.random.normal(k1, (latent_ch,), jnp.float32)
    return params


# --------------------------------------------------------------------------- main

if __name__ == "__main__":
    # EncoderBlock(in_channels=4, out_channels=8, latent_channels=4,
    #              down_block=True, num_res_blocks=2, num_groups=2)
    in_ch, out_ch, latent_ch, num_groups = 4, 8, 4, 2
    key = jax.random.PRNGKey(0)
    kx, kp = jax.random.split(key)
    x = jax.random.normal(kx, (2, in_ch, 16, 16), jnp.float32)
    params = init_params(kp, in_ch, out_ch, latent_ch, num_res_blocks=2, down_block=True)

    out = encoder_block_pallas(x, params, num_groups)
    out = jax.block_until_ready(out)

    ref = encoder_block_ref(x, params, num_groups)
    assert out.shape == (2, latent_ch, 8, 8), out.shape
    # Reference conv uses precision=HIGHEST; tolerance covers possible bf16-pass MXU
    # precision of the in-kernel f32 dots.
    if not bool(jnp.allclose(out, ref, atol=1e-2, rtol=1e-2)):
        raise RuntimeError(
            f"Pallas output mismatch vs reference; max abs diff = {float(jnp.max(jnp.abs(out - ref)))}")
    print("KERNEL_OK")
</pallas_src>

<mosaic_0001>
module attributes {stable_mosaic.version = 11 : i64} {
  func.func @kernel(%arg0: i32, %arg1: memref<8x512xf32, #tpu.memory_space<vmem>>, %arg2: memref<9x512xf32, #tpu.memory_space<vmem>>, %arg3: memref<8x8xf32, #tpu.memory_space<vmem>>, %arg4: memref<8x1xf32, #tpu.memory_space<vmem>>, %arg5: memref<8x1xf32, #tpu.memory_space<vmem>>, %arg6: memref<8x72xf32, #tpu.memory_space<vmem>>, %arg7: memref<8x1xf32, #tpu.memory_space<vmem>>, %arg8: memref<8x8xf32, #tpu.memory_space<vmem>>, %arg9: memref<8x1xf32, #tpu.memory_space<vmem>>, %arg10: memref<8x1xf32, #tpu.memory_space<vmem>>, %arg11: memref<8x72xf32, #tpu.memory_space<vmem>>, %arg12: memref<8x1xf32, #tpu.memory_space<vmem>>, %arg13: memref<8x8xf32, #tpu.memory_space<vmem>>, %arg14: memref<8x1xf32, #tpu.memory_space<vmem>>, %arg15: memref<8x8xf32, #tpu.memory_space<vmem>>, %arg16: memref<8x1xf32, #tpu.memory_space<vmem>>, %arg17: memref<8x1xf32, #tpu.memory_space<vmem>>, %arg18: memref<8x72xf32, #tpu.memory_space<vmem>>, %arg19: memref<8x1xf32, #tpu.memory_space<vmem>>, %arg20: memref<8x8xf32, #tpu.memory_space<vmem>>, %arg21: memref<8x1xf32, #tpu.memory_space<vmem>>, %arg22: memref<8x1xf32, #tpu.memory_space<vmem>>, %arg23: memref<8x72xf32, #tpu.memory_space<vmem>>, %arg24: memref<8x1xf32, #tpu.memory_space<vmem>>, %arg25: memref<8x72xf32, #tpu.memory_space<vmem>>, %arg26: memref<512x128xf32, #tpu.memory_space<vmem>>, %arg27: memref<8x1xf32, #tpu.memory_space<vmem>>, %arg28: memref<9x128xf32, #tpu.memory_space<vmem>>, %arg29: memref<8x72xf32, #tpu.memory_space<vmem>>, %arg30: memref<8x1xf32, #tpu.memory_space<vmem>>, %arg31: memref<8x128xf32, #tpu.memory_space<vmem>>) attributes {dimension_semantics = [#tpu.dimension_semantics<arbitrary>], iteration_bounds = array<i64: 1>, scalar_prefetch = 0 : i64, scratch_operands = 0 : i64, tpu.core_type = #tpu.core_type<tc>, window_params = [{pipeline_mode = #tpu.pipeline_mode<synchronous>, transform_indices = @transform_0, window_bounds = array<i64: 8, 512>}, {pipeline_mode = #tpu.pipeline_mode<synchronous>, transform_indices = @transform_1, window_bounds = array<i64: 9, 512>}, {pipeline_mode = #tpu.pipeline_mode<synchronous>, transform_indices = @transform_2, window_bounds = array<i64: 8, 8>}, {pipeline_mode = #tpu.pipeline_mode<synchronous>, transform_indices = @transform_3, window_bounds = array<i64: 8, 1>}, {pipeline_mode = #tpu.pipeline_mode<synchronous>, transform_indices = @transform_4, window_bounds = array<i64: 8, 1>}, {pipeline_mode = #tpu.pipeline_mode<synchronous>, transform_indices = @transform_5, window_bounds = array<i64: 8, 72>}, {pipeline_mode = #tpu.pipeline_mode<synchronous>, transform_indices = @transform_6, window_bounds = array<i64: 8, 1>}, {pipeline_mode = #tpu.pipeline_mode<synchronous>, transform_indices = @transform_7, window_bounds = array<i64: 8, 8>}, {pipeline_mode = #tpu.pipeline_mode<synchronous>, transform_indices = @transform_8, window_bounds = array<i64: 8, 1>}, {pipeline_mode = #tpu.pipeline_mode<synchronous>, transform_indices = @transform_9, window_bounds = array<i64: 8, 1>}, {pipeline_mode = #tpu.pipeline_mode<synchronous>, transform_indices = @transform_10, window_bounds = array<i64: 8, 72>}, {pipeline_mode = #tpu.pipeline_mode<synchronous>, transform_indices = @transform_11, window_bounds = array<i64: 8, 1>}, {pipeline_mode = #tpu.pipeline_mode<synchronous>, transform_indices = @transform_12, window_bounds = array<i64: 8, 8>}, {pipeline_mode = #tpu.pipeline_mode<synchronous>, transform_indices = @transform_13, window_bounds = array<i64: 8, 1>}, {pipeline_mode = #tpu.pipeline_mode<synchronous>, transform_indices = @transform_14, window_bounds = array<i64: 8, 8>}, {pipeline_mode = #tpu.pipeline_mode<synchronous>, transform_indices = @transform_15, window_bounds = array<i64: 8, 1>}, {pipeline_mode = #tpu.pipeline_mode<synchronous>, transform_indices = @transform_16, window_bounds = array<i64: 8, 1>}, {pipeline_mode = #tpu.pipeline_mode<synchronous>, transform_indices = @transform_17, window_bounds = array<i64: 8, 72>}, {pipeline_mode = #tpu.pipeline_mode<synchronous>, transform_indices = @transform_18, window_bounds = array<i64: 8, 1>}, {pipeline_mode = #tpu.pipeline_mode<synchronous>, transform_indices = @transform_19, window_bounds = array<i64: 8, 8>}, {pipeline_mode = #tpu.pipeline_mode<synchronous>, transform_indices = @transform_20, window_bounds = array<i64: 8, 1>}, {pipeline_mode = #tpu.pipeline_mode<synchronous>, transform_indices = @transform_21, window_bounds = array<i64: 8, 1>}, {pipeline_mode = #tpu.pipeline_mode<synchronous>, transform_indices = @transform_22, window_bounds = array<i64: 8, 72>}, {pipeline_mode = #tpu.pipeline_mode<synchronous>, transform_indices = @transform_23, window_bounds = array<i64: 8, 1>}, {pipeline_mode = #tpu.pipeline_mode<synchronous>, transform_indices = @transform_24, window_bounds = array<i64: 8, 72>}, {pipeline_mode = #tpu.pipeline_mode<synchronous>, transform_indices = @transform_25, window_bounds = array<i64: 512, 128>}, {pipeline_mode = #tpu.pipeline_mode<synchronous>, transform_indices = @transform_26, window_bounds = array<i64: 8, 1>}, {pipeline_mode = #tpu.pipeline_mode<synchronous>, transform_indices = @transform_27, window_bounds = array<i64: 9, 128>}, {pipeline_mode = #tpu.pipeline_mode<synchronous>, transform_indices = @transform_28, window_bounds = array<i64: 8, 72>}, {pipeline_mode = #tpu.pipeline_mode<synchronous>, transform_indices = @transform_29, window_bounds = array<i64: 8, 1>}, {pipeline_mode = #tpu.pipeline_mode<synchronous>, transform_indices = @transform_30, window_bounds = array<i64: 8, 128>}]} {
    %c0 = arith.constant 0 : index
    %c0_0 = arith.constant 0 : index
    %0 = vector.load %arg1[%c0, %c0_0] : memref<8x512xf32, #tpu.memory_space<vmem>>, vector<8x512xf32>
    %c0_1 = arith.constant 0 : index
    %c0_2 = arith.constant 0 : index
    %1 = vector.load %arg2[%c0_1, %c0_2] : memref<9x512xf32, #tpu.memory_space<vmem>>, vector<9x512xf32>
    %c0_3 = arith.constant 0 : index
    %c0_4 = arith.constant 0 : index
    %2 = vector.load %arg3[%c0_3, %c0_4] : memref<8x8xf32, #tpu.memory_space<vmem>>, vector<8x8xf32>
    %c0_5 = arith.constant 0 : index
    %c0_6 = arith.constant 0 : index
    %3 = vector.load %arg4[%c0_5, %c0_6] : memref<8x1xf32, #tpu.memory_space<vmem>>, vector<8x1xf32>
    %c0_7 = arith.constant 0 : index
    %c0_8 = arith.constant 0 : index
    %4 = vector.load %arg5[%c0_7, %c0_8] : memref<8x1xf32, #tpu.memory_space<vmem>>, vector<8x1xf32>
    %5 = vector.extract_strided_slice %0 {offsets = [0, 0], sizes = [8, 256], strides = [1, 1]} : vector<8x512xf32> to vector<8x256xf32>
    %cst = arith.constant dense<0.000000e+00> : vector<8xf32>
    %6 = vector.multi_reduction <add>, %5, %cst [1] : vector<8x256xf32> to vector<8xf32>
    %7 = vector.shape_cast %6 : vector<8xf32> to vector<8x1xf32>
    %8 = arith.mulf %5, %5 : vector<8x256xf32>
    %cst_9 = arith.constant dense<0.000000e+00> : vector<8xf32>
    %9 = vector.multi_reduction <add>, %8, %cst_9 [1] : vector<8x256xf32> to vector<8xf32>
    %10 = vector.shape_cast %9 : vector<8xf32> to vector<8x1xf32>
    %cst_10 = arith.constant dense<0.000000e+00> : vector<8x1xf32>
    %11 = tpu.matmul %2, %7, %cst_10 {dimension_numbers = #tpu.dot_dimension_numbers<[1], [0], [0], [1], [0, 0, 1, 1], [], []>} : vector<8x8xf32>, vector<8x1xf32>, vector<8x1xf32> -> vector<8x1xf32>
    %cst_11 = arith.constant dense<0.000000e+00> : vector<8x1xf32>
    %12 = tpu.matmul %2, %10, %cst_11 {dimension_numbers = #tpu.dot_dimension_numbers<[1], [0], [0], [1], [0, 0, 1, 1], [], []>} : vector<8x8xf32>, vector<8x1xf32>, vector<8x1xf32> -> vector<8x1xf32>
    %13 = arith.mulf %11, %11 : vector<8x1xf32>
    %14 = arith.subf %12, %13 : vector<8x1xf32>
    %cst_12 = arith.constant 9.99999974E-6 : f32
    %15 = vector.broadcast %cst_12 : f32 to vector<8x1xf32>
    %16 = arith.addf %14, %15 : vector<8x1xf32>
    %17 = math.rsqrt %16 : vector<8x1xf32>
    %18 = arith.mulf %17, %3 : vector<8x1xf32>
    %19 = arith.mulf %11, %18 : vector<8x1xf32>
    %20 = arith.subf %4, %19 : vector<8x1xf32>
    %21 = vector.broadcast %18 : vector<8x1xf32> to vector<8x256xf32>
    %22 = arith.mulf %5, %21 : vector<8x256xf32>
    %23 = vector.broadcast %20 : vector<8x1xf32> to vector<8x256xf32>
    %24 = arith.addf %22, %23 : vector<8x256xf32>
    %cst_13 = arith.constant 0.000000e+00 : f32
    %25 = vector.broadcast %cst_13 : f32 to vector<8x256xf32>
    %26 = arith.maximumf %24, %25 : vector<8x256xf32>
    %27 = vector.extract_strided_slice %0 {offsets = [0, 256], sizes = [8, 256], strides = [1, 1]} : vector<8x512xf32> to vector<8x256xf32>
    %cst_14 = arith.constant dense<0.000000e+00> : vector<8xf32>
    %28 = vector.multi_reduction <add>, %27, %cst_14 [1] : vector<8x256xf32> to vector<8xf32>
    %29 = vector.shape_cast %28 : vector<8xf32> to vector<8x1xf32>
    %30 = arith.mulf %27, %27 : vector<8x256xf32>
    %cst_15 = arith.constant dense<0.000000e+00> : vector<8xf32>
    %31 = vector.multi_reduction <add>, %30, %cst_15 [1] : vector<8x256xf32> to vector<8xf32>
    %32 = vector.shape_cast %31 : vector<8xf32> to vector<8x1xf32>
    %cst_16 = arith.constant dense<0.000000e+00> : vector<8x1xf32>
    %33 = tpu.matmul %2, %29, %cst_16 {dimension_numbers = #tpu.dot_dimension_numbers<[1], [0], [0], [1], [0, 0, 1, 1], [], []>} : vector<8x8xf32>, vector<8x1xf32>, vector<8x1xf32> -> vector<8x1xf32>
    %cst_17 = arith.constant dense<0.000000e+00> : vector<8x1xf32>
    %34 = tpu.matmul %2, %32, %cst_17 {dimension_numbers = #tpu.dot_dimension_numbers<[1], [0], [0], [1], [0, 0, 1, 1], [], []>} : vector<8x8xf32>, vector<8x1xf32>, vector<8x1xf32> -> vector<8x1xf32>
    %35 = arith.mulf %33, %33 : vector<8x1xf32>
    %36 = arith.subf %34, %35 : vector<8x1xf32>
    %cst_18 = arith.constant 9.99999974E-6 : f32
    %37 = vector.broadcast %cst_18 : f32 to vector<8x1xf32>
    %38 = arith.addf %36, %37 : vector<8x1xf32>
    %39 = math.rsqrt %38 : vector<8x1xf32>
    %40 = arith.mulf %39, %3 : vector<8x1xf32>
    %41 = arith.mulf %33, %40 : vector<8x1xf32>
    %42 = arith.subf %4, %41 : vector<8x1xf32>
    %43 = vector.broadcast %40 : vector<8x1xf32> to vector<8x256xf32>
    %44 = arith.mulf %27, %43 : vector<8x256xf32>
    %45 = vector.broadcast %42 : vector<8x1xf32> to vector<8x256xf32>
    %46 = arith.addf %44, %45 : vector<8x256xf32>
    %cst_19 = arith.constant 0.000000e+00 : f32
    %47 = vector.broadcast %cst_19 : f32 to vector<8x256xf32>
    %48 = arith.maximumf %46, %47 : vector<8x256xf32>
    %49 = tpu.concatenate %26, %48 in 1 : vector<8x256xf32>, vector<8x256xf32> -> vector<8x512xf32>
    %c0_20 = arith.constant 0 : index
    %c0_21 = arith.constant 0 : index
    %50 = vector.load %arg6[%c0_20, %c0_21] : memref<8x72xf32, #tpu.memory_space<vmem>>, vector<8x72xf32>
    %c17_i32 = arith.constant 17 : i32
    %51 = tpu.dynamic_rotate %49 by %c17_i32 dim 1 : vector<8x512xf32>, i32 -> vector<8x512xf32>
    %52 = vector.extract_strided_slice %1 {offsets = [0, 0], sizes = [1, 512], strides = [1, 1]} : vector<9x512xf32> to vector<1x512xf32>
    %53 = vector.broadcast %52 : vector<1x512xf32> to vector<8x512xf32>
    %54 = arith.mulf %51, %53 : vector<8x512xf32>
    %c16_i32 = arith.constant 16 : i32
    %55 = tpu.dynamic_rotate %49 by %c16_i32 dim 1 : vector<8x512xf32>, i32 -> vector<8x512xf32>
    %56 = vector.extract_strided_slice %1 {offsets = [1, 0], sizes = [1, 512], strides = [1, 1]} : vector<9x512xf32> to vector<1x512xf32>
    %57 = vector.broadcast %56 : vector<1x512xf32> to vector<8x512xf32>
    %58 = arith.mulf %55, %57 : vector<8x512xf32>
    %c15_i32 = arith.constant 15 : i32
    %59 = tpu.dynamic_rotate %49 by %c15_i32 dim 1 : vector<8x512xf32>, i32 -> vector<8x512xf32>
    %60 = vector.extract_strided_slice %1 {offsets = [2, 0], sizes = [1, 512], strides = [1, 1]} : vector<9x512xf32> to vector<1x512xf32>
    %61 = vector.broadcast %60 : vector<1x512xf32> to vector<8x512xf32>
    %62 = arith.mulf %59, %61 : vector<8x512xf32>
    %c1_i32 = arith.constant 1 : i32
    %63 = tpu.dynamic_rotate %49 by %c1_i32 dim 1 : vector<8x512xf32>, i32 -> vector<8x512xf32>
    %64 = vector.extract_strided_slice %1 {offsets = [3, 0], sizes = [1, 512], strides = [1, 1]} : vector<9x512xf32> to vector<1x512xf32>
    %65 = vector.broadcast %64 : vector<1x512xf32> to vector<8x512xf32>
    %66 = arith.mulf %63, %65 : vector<8x512xf32>
    %67 = vector.extract_strided_slice %1 {offsets = [4, 0], sizes = [1, 512], strides = [1, 1]} : vector<9x512xf32> to vector<1x512xf32>
    %68 = vector.broadcast %67 : vector<1x512xf32> to vector<8x512xf32>
    %69 = arith.mulf %49, %68 : vector<8x512xf32>
    %c511_i32 = arith.constant 511 : i32
    %70 = tpu.dynamic_rotate %49 by %c511_i32 dim 1 : vector<8x512xf32>, i32 -> vector<8x512xf32>
    %71 = vector.extract_strided_slice %1 {offsets = [5, 0], sizes = [1, 512], strides = [1, 1]} : vector<9x512xf32> to vector<1x512xf32>
    %72 = vector.broadcast %71 : vector<1x512xf32> to vector<8x512xf32>
    %73 = arith.mulf %70, %72 : vector<8x512xf32>
    %c497_i32 = arith.constant 497 : i32
    %74 = tpu.dynamic_rotate %49 by %c497_i32 dim 1 : vector<8x512xf32>, i32 -> vector<8x512xf32>
    %75 = vector.extract_strided_slice %1 {offsets = [6, 0], sizes = [1, 512], strides = [1, 1]} : vector<9x512xf32> to vector<1x512xf32>
    %76 = vector.broadcast %75 : vector<1x512xf32> to vector<8x512xf32>
    %77 = arith.mulf %74, %76 : vector<8x512xf32>
    %c496_i32 = arith.constant 496 : i32
    %78 = tpu.dynamic_rotate %49 by %c496_i32 dim 1 : vector<8x512xf32>, i32 -> vector<8x512xf32>
    %79 = vector.extract_strided_slice %1 {offsets = [7, 0], sizes = [1, 512], strides = [1, 1]} : vector<9x512xf32> to vector<1x512xf32>
    %80 = vector.broadcast %79 : vector<1x512xf32> to vector<8x512xf32>
    %81 = arith.mulf %78, %80 : vector<8x512xf32>
    %c495_i32 = arith.constant 495 : i32
    %82 = tpu.dynamic_rotate %49 by %c495_i32 dim 1 : vector<8x512xf32>, i32 -> vector<8x512xf32>
    %83 = vector.extract_strided_slice %1 {offsets = [8, 0], sizes = [1, 512], strides = [1, 1]} : vector<9x512xf32> to vector<1x512xf32>
    %84 = vector.broadcast %83 : vector<1x512xf32> to vector<8x512xf32>
    %85 = arith.mulf %82, %84 : vector<8x512xf32>
    %86 = tpu.concatenate %54, %58, %62, %66, %69, %73, %77, %81, %85 in 0 : vector<8x512xf32>, vector<8x512xf32>, vector<8x512xf32>, vector<8x512xf32>, vector<8x512xf32>, vector<8x512xf32>, vector<8x512xf32>, vector<8x512xf32>, vector<8x512xf32> -> vector<72x512xf32>
    %cst_22 = arith.constant dense<0.000000e+00> : vector<8x512xf32>
    %87 = tpu.matmul %50, %86, %cst_22 {dimension_numbers = #tpu.dot_dimension_numbers<[1], [0], [0], [1], [0, 0, 1, 1], [], []>} : vector<8x72xf32>, vector<72x512xf32>, vector<8x512xf32> -> vector<8x512xf32>
    %c0_23 = arith.constant 0 : index
    %c0_24 = arith.constant 0 : index
    %88 = vector.load %arg7[%c0_23, %c0_24] : memref<8x1xf32, #tpu.memory_space<vmem>>, vector<8x1xf32>
    %89 = vector.broadcast %88 : vector<8x1xf32> to vector<8x512xf32>
    %90 = arith.addf %87, %89 : vector<8x512xf32>
    %c0_25 = arith.constant 0 : index
    %c0_26 = arith.constant 0 : index
    %91 = vector.load %arg8[%c0_25, %c0_26] : memref<8x8xf32, #tpu.memory_space<vmem>>, vector<8x8xf32>
    %c0_27 = arith.constant 0 : index
    %c0_28 = arith.constant 0 : index
    %92 = vector.load %arg9[%c0_27, %c0_28] : memref<8x1xf32, #tpu.memory_space<vmem>>, vector<8x1xf32>
    %c0_29 = arith.constant 0 : index
    %c0_30 = arith.constant 0 : index
    %93 = vector.load %arg10[%c0_29, %c0_30] : memref<8x1xf32, #tpu.memory_space<vmem>>, vector<8x1xf32>
    %94 = vector.extract_strided_slice %90 {offsets = [0, 0], sizes = [8, 256], strides = [1, 1]} : vector<8x512xf32> to vector<8x256xf32>
    %cst_31 = arith.constant dense<0.000000e+00> : vector<8xf32>
    %95 = vector.multi_reduction <add>, %94, %cst_31 [1] : vector<8x256xf32> to vector<8xf32>
    %96 = vector.shape_cast %95 : vector<8xf32> to vector<8x1xf32>
    %97 = arith.mulf %94, %94 : vector<8x256xf32>
    %cst_32 = arith.constant dense<0.000000e+00> : vector<8xf32>
    %98 = vector.multi_reduction <add>, %97, %cst_32 [1] : vector<8x256xf32> to vector<8xf32>
    %99 = vector.shape_cast %98 : vector<8xf32> to vector<8x1xf32>
    %cst_33 = arith.constant dense<0.000000e+00> : vector<8x1xf32>
    %100 = tpu.matmul %91, %96, %cst_33 {dimension_numbers = #tpu.dot_dimension_numbers<[1], [0], [0], [1], [0, 0, 1, 1], [], []>} : vector<8x8xf32>, vector<8x1xf32>, vector<8x1xf32> -> vector<8x1xf32>
    %cst_34 = arith.constant dense<0.000000e+00> : vector<8x1xf32>
    %101 = tpu.matmul %91, %99, %cst_34 {dimension_numbers = #tpu.dot_dimension_numbers<[1], [0], [0], [1], [0, 0, 1, 1], [], []>} : vector<8x8xf32>, vector<8x1xf32>, vector<8x1xf32> -> vector<8x1xf32>
    %102 = arith.mulf %100, %100 : vector<8x1xf32>
    %103 = arith.subf %101, %102 : vector<8x1xf32>
    %cst_35 = arith.constant 9.99999974E-6 : f32
    %104 = vector.broadcast %cst_35 : f32 to vector<8x1xf32>
    %105 = arith.addf %103, %104 : vector<8x1xf32>
    %106 = math.rsqrt %105 : vector<8x1xf32>
    %107 = arith.mulf %106, %92 : vector<8x1xf32>
    %108 = arith.mulf %100, %107 : vector<8x1xf32>
    %109 = arith.subf %93, %108 : vector<8x1xf32>
    %110 = vector.broadcast %107 : vector<8x1xf32> to vector<8x256xf32>
    %111 = arith.mulf %94, %110 : vector<8x256xf32>
    %112 = vector.broadcast %109 : vector<8x1xf32> to vector<8x256xf32>
    %113 = arith.addf %111, %112 : vector<8x256xf32>
    %cst_36 = arith.constant 0.000000e+00 : f32
    %114 = vector.broadcast %cst_36 : f32 to vector<8x256xf32>
    %115 = arith.maximumf %113, %114 : vector<8x256xf32>
    %116 = vector.extract_strided_slice %90 {offsets = [0, 256], sizes = [8, 256], strides = [1, 1]} : vector<8x512xf32> to vector<8x256xf32>
    %cst_37 = arith.constant dense<0.000000e+00> : vector<8xf32>
    %117 = vector.multi_reduction <add>, %116, %cst_37 [1] : vector<8x256xf32> to vector<8xf32>
    %118 = vector.shape_cast %117 : vector<8xf32> to vector<8x1xf32>
    %119 = arith.mulf %116, %116 : vector<8x256xf32>
    %cst_38 = arith.constant dense<0.000000e+00> : vector<8xf32>
    %120 = vector.multi_reduction <add>, %119, %cst_38 [1] : vector<8x256xf32> to vector<8xf32>
    %121 = vector.shape_cast %120 : vector<8xf32> to vector<8x1xf32>
    %cst_39 = arith.constant dense<0.000000e+00> : vector<8x1xf32>
    %122 = tpu.matmul %91, %118, %cst_39 {dimension_numbers = #tpu.dot_dimension_numbers<[1], [0], [0], [1], [0, 0, 1, 1], [], []>} : vector<8x8xf32>, vector<8x1xf32>, vector<8x1xf32> -> vector<8x1xf32>
    %cst_40 = arith.constant dense<0.000000e+00> : vector<8x1xf32>
    %123 = tpu.matmul %91, %121, %cst_40 {dimension_numbers = #tpu.dot_dimension_numbers<[1], [0], [0], [1], [0, 0, 1, 1], [], []>} : vector<8x8xf32>, vector<8x1xf32>, vector<8x1xf32> -> vector<8x1xf32>
    %124 = arith.mulf %122, %122 : vector<8x1xf32>
    %125 = arith.subf %123, %124 : vector<8x1xf32>
    %cst_41 = arith.constant 9.99999974E-6 : f32
    %126 = vector.broadcast %cst_41 : f32 to vector<8x1xf32>
    %127 = arith.addf %125, %126 : vector<8x1xf32>
    %128 = math.rsqrt %127 : vector<8x1xf32>
    %129 = arith.mulf %128, %92 : vector<8x1xf32>
    %130 = arith.mulf %122, %129 : vector<8x1xf32>
    %131 = arith.subf %93, %130 : vector<8x1xf32>
    %132 = vector.broadcast %129 : vector<8x1xf32> to vector<8x256xf32>
    %133 = arith.mulf %116, %132 : vector<8x256xf32>
    %134 = vector.broadcast %131 : vector<8x1xf32> to vector<8x256xf32>
    %135 = arith.addf %133, %134 : vector<8x256xf32>
    %cst_42 = arith.constant 0.000000e+00 : f32
    %136 = vector.broadcast %cst_42 : f32 to vector<8x256xf32>
    %137 = arith.maximumf %135, %136 : vector<8x256xf32>
    %138 = tpu.concatenate %115, %137 in 1 : vector<8x256xf32>, vector<8x256xf32> -> vector<8x512xf32>
    %c0_43 = arith.constant 0 : index
    %c0_44 = arith.constant 0 : index
    %139 = vector.load %arg11[%c0_43, %c0_44] : memref<8x72xf32, #tpu.memory_space<vmem>>, vector<8x72xf32>
    %c17_i32_45 = arith.constant 17 : i32
    %140 = tpu.dynamic_rotate %138 by %c17_i32_45 dim 1 : vector<8x512xf32>, i32 -> vector<8x512xf32>
    %141 = vector.extract_strided_slice %1 {offsets = [0, 0], sizes = [1, 512], strides = [1, 1]} : vector<9x512xf32> to vector<1x512xf32>
    %142 = vector.broadcast %141 : vector<1x512xf32> to vector<8x512xf32>
    %143 = arith.mulf %140, %142 : vector<8x512xf32>
    %c16_i32_46 = arith.constant 16 : i32
    %144 = tpu.dynamic_rotate %138 by %c16_i32_46 dim 1 : vector<8x512xf32>, i32 -> vector<8x512xf32>
    %145 = vector.extract_strided_slice %1 {offsets = [1, 0], sizes = [1, 512], strides = [1, 1]} : vector<9x512xf32> to vector<1x512xf32>
    %146 = vector.broadcast %145 : vector<1x512xf32> to vector<8x512xf32>
    %147 = arith.mulf %144, %146 : vector<8x512xf32>
    %c15_i32_47 = arith.constant 15 : i32
    %148 = tpu.dynamic_rotate %138 by %c15_i32_47 dim 1 : vector<8x512xf32>, i32 -> vector<8x512xf32>
    %149 = vector.extract_strided_slice %1 {offsets = [2, 0], sizes = [1, 512], strides = [1, 1]} : vector<9x512xf32> to vector<1x512xf32>
    %150 = vector.broadcast %149 : vector<1x512xf32> to vector<8x512xf32>
    %151 = arith.mulf %148, %150 : vector<8x512xf32>
    %c1_i32_48 = arith.constant 1 : i32
    %152 = tpu.dynamic_rotate %138 by %c1_i32_48 dim 1 : vector<8x512xf32>, i32 -> vector<8x512xf32>
    %153 = vector.extract_strided_slice %1 {offsets = [3, 0], sizes = [1, 512], strides = [1, 1]} : vector<9x512xf32> to vector<1x512xf32>
    %154 = vector.broadcast %153 : vector<1x512xf32> to vector<8x512xf32>
    %155 = arith.mulf %152, %154 : vector<8x512xf32>
    %156 = vector.extract_strided_slice %1 {offsets = [4, 0], sizes = [1, 512], strides = [1, 1]} : vector<9x512xf32> to vector<1x512xf32>
    %157 = vector.broadcast %156 : vector<1x512xf32> to vector<8x512xf32>
    %158 = arith.mulf %138, %157 : vector<8x512xf32>
    %c511_i32_49 = arith.constant 511 : i32
    %159 = tpu.dynamic_rotate %138 by %c511_i32_49 dim 1 : vector<8x512xf32>, i32 -> vector<8x512xf32>
    %160 = vector.extract_strided_slice %1 {offsets = [5, 0], sizes = [1, 512], strides = [1, 1]} : vector<9x512xf32> to vector<1x512xf32>
    %161 = vector.broadcast %160 : vector<1x512xf32> to vector<8x512xf32>
    %162 = arith.mulf %159, %161 : vector<8x512xf32>
    %c497_i32_50 = arith.constant 497 : i32
    %163 = tpu.dynamic_rotate %138 by %c497_i32_50 dim 1 : vector<8x512xf32>, i32 -> vector<8x512xf32>
    %164 = vector.extract_strided_slice %1 {offsets = [6, 0], sizes = [1, 512], strides = [1, 1]} : vector<9x512xf32> to vector<1x512xf32>
    %165 = vector.broadcast %164 : vector<1x512xf32> to vector<8x512xf32>
    %166 = arith.mulf %163, %165 : vector<8x512xf32>
    %c496_i32_51 = arith.constant 496 : i32
    %167 = tpu.dynamic_rotate %138 by %c496_i32_51 dim 1 : vector<8x512xf32>, i32 -> vector<8x512xf32>
    %168 = vector.extract_strided_slice %1 {offsets = [7, 0], sizes = [1, 512], strides = [1, 1]} : vector<9x512xf32> to vector<1x512xf32>
    %169 = vector.broadcast %168 : vector<1x512xf32> to vector<8x512xf32>
    %170 = arith.mulf %167, %169 : vector<8x512xf32>
    %c495_i32_52 = arith.constant 495 : i32
    %171 = tpu.dynamic_rotate %138 by %c495_i32_52 dim 1 : vector<8x512xf32>, i32 -> vector<8x512xf32>
    %172 = vector.extract_strided_slice %1 {offsets = [8, 0], sizes = [1, 512], strides = [1, 1]} : vector<9x512xf32> to vector<1x512xf32>
    %173 = vector.broadcast %172 : vector<1x512xf32> to vector<8x512xf32>
    %174 = arith.mulf %171, %173 : vector<8x512xf32>
    %175 = tpu.concatenate %143, %147, %151, %155, %158, %162, %166, %170, %174 in 0 : vector<8x512xf32>, vector<8x512xf32>, vector<8x512xf32>, vector<8x512xf32>, vector<8x512xf32>, vector<8x512xf32>, vector<8x512xf32>, vector<8x512xf32>, vector<8x512xf32> -> vector<72x512xf32>
    %cst_53 = arith.constant dense<0.000000e+00> : vector<8x512xf32>
    %176 = tpu.matmul %139, %175, %cst_53 {dimension_numbers = #tpu.dot_dimension_numbers<[1], [0], [0], [1], [0, 0, 1, 1], [], []>} : vector<8x72xf32>, vector<72x512xf32>, vector<8x512xf32> -> vector<8x512xf32>
    %c0_54 = arith.constant 0 : index
    %c0_55 = arith.constant 0 : index
    %177 = vector.load %arg12[%c0_54, %c0_55] : memref<8x1xf32, #tpu.memory_space<vmem>>, vector<8x1xf32>
    %178 = vector.broadcast %177 : vector<8x1xf32> to vector<8x512xf32>
    %179 = arith.addf %176, %178 : vector<8x512xf32>
    %c0_56 = arith.constant 0 : index
    %c0_57 = arith.constant 0 : index
    %180 = vector.load %arg13[%c0_56, %c0_57] : memref<8x8xf32, #tpu.memory_space<vmem>>, vector<8x8xf32>
    %cst_58 = arith.constant dense<0.000000e+00> : vector<8x512xf32>
    %181 = tpu.matmul %180, %0, %cst_58 {dimension_numbers = #tpu.dot_dimension_numbers<[1], [0], [0], [1], [0, 0, 1, 1], [], []>} : vector<8x8xf32>, vector<8x512xf32>, vector<8x512xf32> -> vector<8x512xf32>
    %c0_59 = arith.constant 0 : index
    %c0_60 = arith.constant 0 : index
    %182 = vector.load %arg14[%c0_59, %c0_60] : memref<8x1xf32, #tpu.memory_space<vmem>>, vector<8x1xf32>
    %183 = vector.broadcast %182 : vector<8x1xf32> to vector<8x512xf32>
    %184 = arith.addf %181, %183 : vector<8x512xf32>
    %185 = arith.addf %179, %184 : vector<8x512xf32>
    %c0_61 = arith.constant 0 : index
    %c0_62 = arith.constant 0 : index
    %186 = vector.load %arg2[%c0_61, %c0_62] : memref<9x512xf32, #tpu.memory_space<vmem>>, vector<9x512xf32>
    %c0_63 = arith.constant 0 : index
    %c0_64 = arith.constant 0 : index
    %187 = vector.load %arg15[%c0_63, %c0_64] : memref<8x8xf32, #tpu.memory_space<vmem>>, vector<8x8xf32>
    %c0_65 = arith.constant 0 : index
    %c0_66 = arith.constant 0 : index
    %188 = vector.load %arg16[%c0_65, %c0_66] : memref<8x1xf32, #tpu.memory_space<vmem>>, vector<8x1xf32>
    %c0_67 = arith.constant 0 : index
    %c0_68 = arith.constant 0 : index
    %189 = vector.load %arg17[%c0_67, %c0_68] : memref<8x1xf32, #tpu.memory_space<vmem>>, vector<8x1xf32>
    %190 = vector.extract_strided_slice %185 {offsets = [0, 0], sizes = [8, 256], strides = [1, 1]} : vector<8x512xf32> to vector<8x256xf32>
    %cst_69 = arith.constant dense<0.000000e+00> : vector<8xf32>
    %191 = vector.multi_reduction <add>, %190, %cst_69 [1] : vector<8x256xf32> to vector<8xf32>
    %192 = vector.shape_cast %191 : vector<8xf32> to vector<8x1xf32>
    %193 = arith.mulf %190, %190 : vector<8x256xf32>
    %cst_70 = arith.constant dense<0.000000e+00> : vector<8xf32>
    %194 = vector.multi_reduction <add>, %193, %cst_70 [1] : vector<8x256xf32> to vector<8xf32>
    %195 = vector.shape_cast %194 : vector<8xf32> to vector<8x1xf32>
    %cst_71 = arith.constant dense<0.000000e+00> : vector<8x1xf32>
    %196 = tpu.matmul %187, %192, %cst_71 {dimension_numbers = #tpu.dot_dimension_numbers<[1], [0], [0], [1], [0, 0, 1, 1], [], []>} : vector<8x8xf32>, vector<8x1xf32>, vector<8x1xf32> -> vector<8x1xf32>
    %cst_72 = arith.constant dense<0.000000e+00> : vector<8x1xf32>
    %197 = tpu.matmul %187, %195, %cst_72 {dimension_numbers = #tpu.dot_dimension_numbers<[1], [0], [0], [1], [0, 0, 1, 1], [], []>} : vector<8x8xf32>, vector<8x1xf32>, vector<8x1xf32> -> vector<8x1xf32>
    %198 = arith.mulf %196, %196 : vector<8x1xf32>
    %199 = arith.subf %197, %198 : vector<8x1xf32>
    %cst_73 = arith.constant 9.99999974E-6 : f32
    %200 = vector.broadcast %cst_73 : f32 to vector<8x1xf32>
    %201 = arith.addf %199, %200 : vector<8x1xf32>
    %202 = math.rsqrt %201 : vector<8x1xf32>
    %203 = arith.mulf %202, %188 : vector<8x1xf32>
    %204 = arith.mulf %196, %203 : vector<8x1xf32>
    %205 = arith.subf %189, %204 : vector<8x1xf32>
    %206 = vector.broadcast %203 : vector<8x1xf32> to vector<8x256xf32>
    %207 = arith.mulf %190, %206 : vector<8x256xf32>
    %208 = vector.broadcast %205 : vector<8x1xf32> to vector<8x256xf32>
    %209 = arith.addf %207, %208 : vector<8x256xf32>
    %cst_74 = arith.constant 0.000000e+00 : f32
    %210 = vector.broadcast %cst_74 : f32 to vector<8x256xf32>
    %211 = arith.maximumf %209, %210 : vector<8x256xf32>
    %212 = vector.extract_strided_slice %185 {offsets = [0, 256], sizes = [8, 256], strides = [1, 1]} : vector<8x512xf32> to vector<8x256xf32>
    %cst_75 = arith.constant dense<0.000000e+00> : vector<8xf32>
    %213 = vector.multi_reduction <add>, %212, %cst_75 [1] : vector<8x256xf32> to vector<8xf32>
    %214 = vector.shape_cast %213 : vector<8xf32> to vector<8x1xf32>
    %215 = arith.mulf %212, %212 : vector<8x256xf32>
    %cst_76 = arith.constant dense<0.000000e+00> : vector<8xf32>
    %216 = vector.multi_reduction <add>, %215, %cst_76 [1] : vector<8x256xf32> to vector<8xf32>
    %217 = vector.shape_cast %216 : vector<8xf32> to vector<8x1xf32>
    %cst_77 = arith.constant dense<0.000000e+00> : vector<8x1xf32>
    %218 = tpu.matmul %187, %214, %cst_77 {dimension_numbers = #tpu.dot_dimension_numbers<[1], [0], [0], [1], [0, 0, 1, 1], [], []>} : vector<8x8xf32>, vector<8x1xf32>, vector<8x1xf32> -> vector<8x1xf32>
    %cst_78 = arith.constant dense<0.000000e+00> : vector<8x1xf32>
    %219 = tpu.matmul %187, %217, %cst_78 {dimension_numbers = #tpu.dot_dimension_numbers<[1], [0], [0], [1], [0, 0, 1, 1], [], []>} : vector<8x8xf32>, vector<8x1xf32>, vector<8x1xf32> -> vector<8x1xf32>
    %220 = arith.mulf %218, %218 : vector<8x1xf32>
    %221 = arith.subf %219, %220 : vector<8x1xf32>
    %cst_79 = arith.constant 9.99999974E-6 : f32
    %222 = vector.broadcast %cst_79 : f32 to vector<8x1xf32>
    %223 = arith.addf %221, %222 : vector<8x1xf32>
    %224 = math.rsqrt %223 : vector<8x1xf32>
    %225 = arith.mulf %224, %188 : vector<8x1xf32>
    %226 = arith.mulf %218, %225 : vector<8x1xf32>
    %227 = arith.subf %189, %226 : vector<8x1xf32>
    %228 = vector.broadcast %225 : vector<8x1xf32> to vector<8x256xf32>
    %229 = arith.mulf %212, %228 : vector<8x256xf32>
    %230 = vector.broadcast %227 : vector<8x1xf32> to vector<8x256xf32>
    %231 = arith.addf %229, %230 : vector<8x256xf32>
    %cst_80 = arith.constant 0.000000e+00 : f32
    %232 = vector.broadcast %cst_80 : f32 to vector<8x256xf32>
    %233 = arith.maximumf %231, %232 : vector<8x256xf32>
    %234 = tpu.concatenate %211, %233 in 1 : vector<8x256xf32>, vector<8x256xf32> -> vector<8x512xf32>
    %c0_81 = arith.constant 0 : index
    %c0_82 = arith.constant 0 : index
    %235 = vector.load %arg18[%c0_81, %c0_82] : memref<8x72xf32, #tpu.memory_space<vmem>>, vector<8x72xf32>
    %c17_i32_83 = arith.constant 17 : i32
    %236 = tpu.dynamic_rotate %234 by %c17_i32_83 dim 1 : vector<8x512xf32>, i32 -> vector<8x512xf32>
    %237 = vector.extract_strided_slice %186 {offsets = [0, 0], sizes = [1, 512], strides = [1, 1]} : vector<9x512xf32> to vector<1x512xf32>
    %238 = vector.broadcast %237 : vector<1x512xf32> to vector<8x512xf32>
    %239 = arith.mulf %236, %238 : vector<8x512xf32>
    %c16_i32_84 = arith.constant 16 : i32
    %240 = tpu.dynamic_rotate %234 by %c16_i32_84 dim 1 : vector<8x512xf32>, i32 -> vector<8x512xf32>
    %241 = vector.extract_strided_slice %186 {offsets = [1, 0], sizes = [1, 512], strides = [1, 1]} : vector<9x512xf32> to vector<1x512xf32>
    %242 = vector.broadcast %241 : vector<1x512xf32> to vector<8x512xf32>
    %243 = arith.mulf %240, %242 : vector<8x512xf32>
    %c15_i32_85 = arith.constant 15 : i32
    %244 = tpu.dynamic_rotate %234 by %c15_i32_85 dim 1 : vector<8x512xf32>, i32 -> vector<8x512xf32>
    %245 = vector.extract_strided_slice %186 {offsets = [2, 0], sizes = [1, 512], strides = [1, 1]} : vector<9x512xf32> to vector<1x512xf32>
    %246 = vector.broadcast %245 : vector<1x512xf32> to vector<8x512xf32>
    %247 = arith.mulf %244, %246 : vector<8x512xf32>
    %c1_i32_86 = arith.constant 1 : i32
    %248 = tpu.dynamic_rotate %234 by %c1_i32_86 dim 1 : vector<8x512xf32>, i32 -> vector<8x512xf32>
    %249 = vector.extract_strided_slice %186 {offsets = [3, 0], sizes = [1, 512], strides = [1, 1]} : vector<9x512xf32> to vector<1x512xf32>
    %250 = vector.broadcast %249 : vector<1x512xf32> to vector<8x512xf32>
    %251 = arith.mulf %248, %250 : vector<8x512xf32>
    %252 = vector.extract_strided_slice %186 {offsets = [4, 0], sizes = [1, 512], strides = [1, 1]} : vector<9x512xf32> to vector<1x512xf32>
    %253 = vector.broadcast %252 : vector<1x512xf32> to vector<8x512xf32>
    %254 = arith.mulf %234, %253 : vector<8x512xf32>
    %c511_i32_87 = arith.constant 511 : i32
    %255 = tpu.dynamic_rotate %234 by %c511_i32_87 dim 1 : vector<8x512xf32>, i32 -> vector<8x512xf32>
    %256 = vector.extract_strided_slice %186 {offsets = [5, 0], sizes = [1, 512], strides = [1, 1]} : vector<9x512xf32> to vector<1x512xf32>
    %257 = vector.broadcast %256 : vector<1x512xf32> to vector<8x512xf32>
    %258 = arith.mulf %255, %257 : vector<8x512xf32>
    %c497_i32_88 = arith.constant 497 : i32
    %259 = tpu.dynamic_rotate %234 by %c497_i32_88 dim 1 : vector<8x512xf32>, i32 -> vector<8x512xf32>
    %260 = vector.extract_strided_slice %186 {offsets = [6, 0], sizes = [1, 512], strides = [1, 1]} : vector<9x512xf32> to vector<1x512xf32>
    %261 = vector.broadcast %260 : vector<1x512xf32> to vector<8x512xf32>
    %262 = arith.mulf %259, %261 : vector<8x512xf32>
    %c496_i32_89 = arith.constant 496 : i32
    %263 = tpu.dynamic_rotate %234 by %c496_i32_89 dim 1 : vector<8x512xf32>, i32 -> vector<8x512xf32>
    %264 = vector.extract_strided_slice %186 {offsets = [7, 0], sizes = [1, 512], strides = [1, 1]} : vector<9x512xf32> to vector<1x512xf32>
    %265 = vector.broadcast %264 : vector<1x512xf32> to vector<8x512xf32>
    %266 = arith.mulf %263, %265 : vector<8x512xf32>
    %c495_i32_90 = arith.constant 495 : i32
    %267 = tpu.dynamic_rotate %234 by %c495_i32_90 dim 1 : vector<8x512xf32>, i32 -> vector<8x512xf32>
    %268 = vector.extract_strided_slice %186 {offsets = [8, 0], sizes = [1, 512], strides = [1, 1]} : vector<9x512xf32> to vector<1x512xf32>
    %269 = vector.broadcast %268 : vector<1x512xf32> to vector<8x512xf32>
    %270 = arith.mulf %267, %269 : vector<8x512xf32>
    %271 = tpu.concatenate %239, %243, %247, %251, %254, %258, %262, %266, %270 in 0 : vector<8x512xf32>, vector<8x512xf32>, vector<8x512xf32>, vector<8x512xf32>, vector<8x512xf32>, vector<8x512xf32>, vector<8x512xf32>, vector<8x512xf32>, vector<8x512xf32> -> vector<72x512xf32>
    %cst_91 = arith.constant dense<0.000000e+00> : vector<8x512xf32>
    %272 = tpu.matmul %235, %271, %cst_91 {dimension_numbers = #tpu.dot_dimension_numbers<[1], [0], [0], [1], [0, 0, 1, 1], [], []>} : vector<8x72xf32>, vector<72x512xf32>, vector<8x512xf32> -> vector<8x512xf32>
    %c0_92 = arith.constant 0 : index
    %c0_93 = arith.constant 0 : index
    %273 = vector.load %arg19[%c0_92, %c0_93] : memref<8x1xf32, #tpu.memory_space<vmem>>, vector<8x1xf32>
    %274 = vector.broadcast %273 : vector<8x1xf32> to vector<8x512xf32>
    %275 = arith.addf %272, %274 : vector<8x512xf32>
    %c0_94 = arith.constant 0 : index
    %c0_95 = arith.constant 0 : index
    %276 = vector.load %arg20[%c0_94, %c0_95] : memref<8x8xf32, #tpu.memory_space<vmem>>, vector<8x8xf32>
    %c0_96 = arith.constant 0 : index
    %c0_97 = arith.constant 0 : index
    %277 = vector.load %arg21[%c0_96, %c0_97] : memref<8x1xf32, #tpu.memory_space<vmem>>, vector<8x1xf32>
    %c0_98 = arith.constant 0 : index
    %c0_99 = arith.constant 0 : index
    %278 = vector.load %arg22[%c0_98, %c0_99] : memref<8x1xf32, #tpu.memory_space<vmem>>, vector<8x1xf32>
    %279 = vector.extract_strided_slice %275 {offsets = [0, 0], sizes = [8, 256], strides = [1, 1]} : vector<8x512xf32> to vector<8x256xf32>
    %cst_100 = arith.constant dense<0.000000e+00> : vector<8xf32>
    %280 = vector.multi_reduction <add>, %279, %cst_100 [1] : vector<8x256xf32> to vector<8xf32>
    %281 = vector.shape_cast %280 : vector<8xf32> to vector<8x1xf32>
    %282 = arith.mulf %279, %279 : vector<8x256xf32>
    %cst_101 = arith.constant dense<0.000000e+00> : vector<8xf32>
    %283 = vector.multi_reduction <add>, %282, %cst_101 [1] : vector<8x256xf32> to vector<8xf32>
    %284 = vector.shape_cast %283 : vector<8xf32> to vector<8x1xf32>
    %cst_102 = arith.constant dense<0.000000e+00> : vector<8x1xf32>
    %285 = tpu.matmul %276, %281, %cst_102 {dimension_numbers = #tpu.dot_dimension_numbers<[1], [0], [0], [1], [0, 0, 1, 1], [], []>} : vector<8x8xf32>, vector<8x1xf32>, vector<8x1xf32> -> vector<8x1xf32>
    %cst_103 = arith.constant dense<0.000000e+00> : vector<8x1xf32>
    %286 = tpu.matmul %276, %284, %cst_103 {dimension_numbers = #tpu.dot_dimension_numbers<[1], [0], [0], [1], [0, 0, 1, 1], [], []>} : vector<8x8xf32>, vector<8x1xf32>, vector<8x1xf32> -> vector<8x1xf32>
    %287 = arith.mulf %285, %285 : vector<8x1xf32>
    %288 = arith.subf %286, %287 : vector<8x1xf32>
    %cst_104 = arith.constant 9.99999974E-6 : f32
    %289 = vector.broadcast %cst_104 : f32 to vector<8x1xf32>
    %290 = arith.addf %288, %289 : vector<8x1xf32>
    %291 = math.rsqrt %290 : vector<8x1xf32>
    %292 = arith.mulf %291, %277 : vector<8x1xf32>
    %293 = arith.mulf %285, %292 : vector<8x1xf32>
    %294 = arith.subf %278, %293 : vector<8x1xf32>
    %295 = vector.broadcast %292 : vector<8x1xf32> to vector<8x256xf32>
    %296 = arith.mulf %279, %295 : vector<8x256xf32>
    %297 = vector.broadcast %294 : vector<8x1xf32> to vector<8x256xf32>
    %298 = arith.addf %296, %297 : vector<8x256xf32>
    %cst_105 = arith.constant 0.000000e+00 : f32
    %299 = vector.broadcast %cst_105 : f32 to vector<8x256xf32>
    %300 = arith.maximumf %298, %299 : vector<8x256xf32>
    %301 = vector.extract_strided_slice %275 {offsets = [0, 256], sizes = [8, 256], strides = [1, 1]} : vector<8x512xf32> to vector<8x256xf32>
    %cst_106 = arith.constant dense<0.000000e+00> : vector<8xf32>
    %302 = vector.multi_reduction <add>, %301, %cst_106 [1] : vector<8x256xf32> to vector<8xf32>
    %303 = vector.shape_cast %302 : vector<8xf32> to vector<8x1xf32>
    %304 = arith.mulf %301, %301 : vector<8x256xf32>
    %cst_107 = arith.constant dense<0.000000e+00> : vector<8xf32>
    %305 = vector.multi_reduction <add>, %304, %cst_107 [1] : vector<8x256xf32> to vector<8xf32>
    %306 = vector.shape_cast %305 : vector<8xf32> to vector<8x1xf32>
    %cst_108 = arith.constant dense<0.000000e+00> : vector<8x1xf32>
    %307 = tpu.matmul %276, %303, %cst_108 {dimension_numbers = #tpu.dot_dimension_numbers<[1], [0], [0], [1], [0, 0, 1, 1], [], []>} : vector<8x8xf32>, vector<8x1xf32>, vector<8x1xf32> -> vector<8x1xf32>
    %cst_109 = arith.constant dense<0.000000e+00> : vector<8x1xf32>
    %308 = tpu.matmul %276, %306, %cst_109 {dimension_numbers = #tpu.dot_dimension_numbers<[1], [0], [0], [1], [0, 0, 1, 1], [], []>} : vector<8x8xf32>, vector<8x1xf32>, vector<8x1xf32> -> vector<8x1xf32>
    %309 = arith.mulf %307, %307 : vector<8x1xf32>
    %310 = arith.subf %308, %309 : vector<8x1xf32>
    %cst_110 = arith.constant 9.99999974E-6 : f32
    %311 = vector.broadcast %cst_110 : f32 to vector<8x1xf32>
    %312 = arith.addf %310, %311 : vector<8x1xf32>
    %313 = math.rsqrt %312 : vector<8x1xf32>
    %314 = arith.mulf %313, %277 : vector<8x1xf32>
    %315 = arith.mulf %307, %314 : vector<8x1xf32>
    %316 = arith.subf %278, %315 : vector<8x1xf32>
    %317 = vector.broadcast %314 : vector<8x1xf32> to vector<8x256xf32>
    %318 = arith.mulf %301, %317 : vector<8x256xf32>
    %319 = vector.broadcast %316 : vector<8x1xf32> to vector<8x256xf32>
    %320 = arith.addf %318, %319 : vector<8x256xf32>
    %cst_111 = arith.constant 0.000000e+00 : f32
    %321 = vector.broadcast %cst_111 : f32 to vector<8x256xf32>
    %322 = arith.maximumf %320, %321 : vector<8x256xf32>
    %323 = tpu.concatenate %300, %322 in 1 : vector<8x256xf32>, vector<8x256xf32> -> vector<8x512xf32>
    %c0_112 = arith.constant 0 : index
    %c0_113 = arith.constant 0 : index
    %324 = vector.load %arg23[%c0_112, %c0_113] : memref<8x72xf32, #tpu.memory_space<vmem>>, vector<8x72xf32>
    %c17_i32_114 = arith.constant 17 : i32
    %325 = tpu.dynamic_rotate %323 by %c17_i32_114 dim 1 : vector<8x512xf32>, i32 -> vector<8x512xf32>
    %326 = vector.extract_strided_slice %186 {offsets = [0, 0], sizes = [1, 512], strides = [1, 1]} : vector<9x512xf32> to vector<1x512xf32>
    %327 = vector.broadcast %326 : vector<1x512xf32> to vector<8x512xf32>
    %328 = arith.mulf %325, %327 : vector<8x512xf32>
    %c16_i32_115 = arith.constant 16 : i32
    %329 = tpu.dynamic_rotate %323 by %c16_i32_115 dim 1 : vector<8x512xf32>, i32 -> vector<8x512xf32>
    %330 = vector.extract_strided_slice %186 {offsets = [1, 0], sizes = [1, 512], strides = [1, 1]} : vector<9x512xf32> to vector<1x512xf32>
    %331 = vector.broadcast %330 : vector<1x512xf32> to vector<8x512xf32>
    %332 = arith.mulf %329, %331 : vector<8x512xf32>
    %c15_i32_116 = arith.constant 15 : i32
    %333 = tpu.dynamic_rotate %323 by %c15_i32_116 dim 1 : vector<8x512xf32>, i32 -> vector<8x512xf32>
    %334 = vector.extract_strided_slice %186 {offsets = [2, 0], sizes = [1, 512], strides = [1, 1]} : vector<9x512xf32> to vector<1x512xf32>
    %335 = vector.broadcast %334 : vector<1x512xf32> to vector<8x512xf32>
    %336 = arith.mulf %333, %335 : vector<8x512xf32>
    %c1_i32_117 = arith.constant 1 : i32
    %337 = tpu.dynamic_rotate %323 by %c1_i32_117 dim 1 : vector<8x512xf32>, i32 -> vector<8x512xf32>
    %338 = vector.extract_strided_slice %186 {offsets = [3, 0], sizes = [1, 512], strides = [1, 1]} : vector<9x512xf32> to vector<1x512xf32>
    %339 = vector.broadcast %338 : vector<1x512xf32> to vector<8x512xf32>
    %340 = arith.mulf %337, %339 : vector<8x512xf32>
    %341 = vector.extract_strided_slice %186 {offsets = [4, 0], sizes = [1, 512], strides = [1, 1]} : vector<9x512xf32> to vector<1x512xf32>
    %342 = vector.broadcast %341 : vector<1x512xf32> to vector<8x512xf32>
    %343 = arith.mulf %323, %342 : vector<8x512xf32>
    %c511_i32_118 = arith.constant 511 : i32
    %344 = tpu.dynamic_rotate %323 by %c511_i32_118 dim 1 : vector<8x512xf32>, i32 -> vector<8x512xf32>
    %345 = vector.extract_strided_slice %186 {offsets = [5, 0], sizes = [1, 512], strides = [1, 1]} : vector<9x512xf32> to vector<1x512xf32>
    %346 = vector.broadcast %345 : vector<1x512xf32> to vector<8x512xf32>
    %347 = arith.mulf %344, %346 : vector<8x512xf32>
    %c497_i32_119 = arith.constant 497 : i32
    %348 = tpu.dynamic_rotate %323 by %c497_i32_119 dim 1 : vector<8x512xf32>, i32 -> vector<8x512xf32>
    %349 = vector.extract_strided_slice %186 {offsets = [6, 0], sizes = [1, 512], strides = [1, 1]} : vector<9x512xf32> to vector<1x512xf32>
    %350 = vector.broadcast %349 : vector<1x512xf32> to vector<8x512xf32>
    %351 = arith.mulf %348, %350 : vector<8x512xf32>
    %c496_i32_120 = arith.constant 496 : i32
    %352 = tpu.dynamic_rotate %323 by %c496_i32_120 dim 1 : vector<8x512xf32>, i32 -> vector<8x512xf32>
    %353 = vector.extract_strided_slice %186 {offsets = [7, 0], sizes = [1, 512], strides = [1, 1]} : vector<9x512xf32> to vector<1x512xf32>
    %354 = vector.broadcast %353 : vector<1x512xf32> to vector<8x512xf32>
    %355 = arith.mulf %352, %354 : vector<8x512xf32>
    %c495_i32_121 = arith.constant 495 : i32
    %356 = tpu.dynamic_rotate %323 by %c495_i32_121 dim 1 : vector<8x512xf32>, i32 -> vector<8x512xf32>
    %357 = vector.extract_strided_slice %186 {offsets = [8, 0], sizes = [1, 512], strides = [1, 1]} : vector<9x512xf32> to vector<1x512xf32>
    %358 = vector.broadcast %357 : vector<1x512xf32> to vector<8x512xf32>
    %359 = arith.mulf %356, %358 : vector<8x512xf32>
    %360 = tpu.concatenate %328, %332, %336, %340, %343, %347, %351, %355, %359 in 0 : vector<8x512xf32>, vector<8x512xf32>, vector<8x512xf32>, vector<8x512xf32>, vector<8x512xf32>, vector<8x512xf32>, vector<8x512xf32>, vector<8x512xf32>, vector<8x512xf32> -> vector<72x512xf32>
    %cst_122 = arith.constant dense<0.000000e+00> : vector<8x512xf32>
    %361 = tpu.matmul %324, %360, %cst_122 {dimension_numbers = #tpu.dot_dimension_numbers<[1], [0], [0], [1], [0, 0, 1, 1], [], []>} : vector<8x72xf32>, vector<72x512xf32>, vector<8x512xf32> -> vector<8x512xf32>
    %c0_123 = arith.constant 0 : index
    %c0_124 = arith.constant 0 : index
    %362 = vector.load %arg24[%c0_123, %c0_124] : memref<8x1xf32, #tpu.memory_space<vmem>>, vector<8x1xf32>
    %363 = vector.broadcast %362 : vector<8x1xf32> to vector<8x512xf32>
    %364 = arith.addf %361, %363 : vector<8x512xf32>
    %365 = arith.addf %364, %185 : vector<8x512xf32>
    %c0_125 = arith.constant 0 : index
    %c0_126 = arith.constant 0 : index
    %366 = vector.load %arg2[%c0_125, %c0_126] : memref<9x512xf32, #tpu.memory_space<vmem>>, vector<9x512xf32>
    %c0_127 = arith.constant 0 : index
    %c0_128 = arith.constant 0 : index
    %367 = vector.load %arg25[%c0_127, %c0_128] : memref<8x72xf32, #tpu.memory_space<vmem>>, vector<8x72xf32>
    %c17_i32_129 = arith.constant 17 : i32
    %368 = tpu.dynamic_rotate %365 by %c17_i32_129 dim 1 : vector<8x512xf32>, i32 -> vector<8x512xf32>
    %369 = vector.extract_strided_slice %366 {offsets = [0, 0], sizes = [1, 512], strides = [1, 1]} : vector<9x512xf32> to vector<1x512xf32>
    %370 = vector.broadcast %369 : vector<1x512xf32> to vector<8x512xf32>
    %371 = arith.mulf %368, %370 : vector<8x512xf32>
    %c16_i32_130 = arith.constant 16 : i32
    %372 = tpu.dynamic_rotate %365 by %c16_i32_130 dim 1 : vector<8x512xf32>, i32 -> vector<8x512xf32>
    %373 = vector.extract_strided_slice %366 {offsets = [1, 0], sizes = [1, 512], strides = [1, 1]} : vector<9x512xf32> to vector<1x512xf32>
    %374 = vector.broadcast %373 : vector<1x512xf32> to vector<8x512xf32>
    %375 = arith.mulf %372, %374 : vector<8x512xf32>
    %c15_i32_131 = arith.constant 15 : i32
    %376 = tpu.dynamic_rotate %365 by %c15_i32_131 dim 1 : vector<8x512xf32>, i32 -> vector<8x512xf32>
    %377 = vector.extract_strided_slice %366 {offsets = [2, 0], sizes = [1, 512], strides = [1, 1]} : vector<9x512xf32> to vector<1x512xf32>
    %378 = vector.broadcast %377 : vector<1x512xf32> to vector<8x512xf32>
    %379 = arith.mulf %376, %378 : vector<8x512xf32>
    %c1_i32_132 = arith.constant 1 : i32
    %380 = tpu.dynamic_rotate %365 by %c1_i32_132 dim 1 : vector<8x512xf32>, i32 -> vector<8x512xf32>
    %381 = vector.extract_strided_slice %366 {offsets = [3, 0], sizes = [1, 512], strides = [1, 1]} : vector<9x512xf32> to vector<1x512xf32>
    %382 = vector.broadcast %381 : vector<1x512xf32> to vector<8x512xf32>
    %383 = arith.mulf %380, %382 : vector<8x512xf32>
    %384 = vector.extract_strided_slice %366 {offsets = [4, 0], sizes = [1, 512], strides = [1, 1]} : vector<9x512xf32> to vector<1x512xf32>
    %385 = vector.broadcast %384 : vector<1x512xf32> to vector<8x512xf32>
    %386 = arith.mulf %365, %385 : vector<8x512xf32>
    %c511_i32_133 = arith.constant 511 : i32
    %387 = tpu.dynamic_rotate %365 by %c511_i32_133 dim 1 : vector<8x512xf32>, i32 -> vector<8x512xf32>
    %388 = vector.extract_strided_slice %366 {offsets = [5, 0], sizes = [1, 512], strides = [1, 1]} : vector<9x512xf32> to vector<1x512xf32>
    %389 = vector.broadcast %388 : vector<1x512xf32> to vector<8x512xf32>
    %390 = arith.mulf %387, %389 : vector<8x512xf32>
    %c497_i32_134 = arith.constant 497 : i32
    %391 = tpu.dynamic_rotate %365 by %c497_i32_134 dim 1 : vector<8x512xf32>, i32 -> vector<8x512xf32>
    %392 = vector.extract_strided_slice %366 {offsets = [6, 0], sizes = [1, 512], strides = [1, 1]} : vector<9x512xf32> to vector<1x512xf32>
    %393 = vector.broadcast %392 : vector<1x512xf32> to vector<8x512xf32>
    %394 = arith.mulf %391, %393 : vector<8x512xf32>
    %c496_i32_135 = arith.constant 496 : i32
    %395 = tpu.dynamic_rotate %365 by %c496_i32_135 dim 1 : vector<8x512xf32>, i32 -> vector<8x512xf32>
    %396 = vector.extract_strided_slice %366 {offsets = [7, 0], sizes = [1, 512], strides = [1, 1]} : vector<9x512xf32> to vector<1x512xf32>
    %397 = vector.broadcast %396 : vector<1x512xf32> to vector<8x512xf32>
    %398 = arith.mulf %395, %397 : vector<8x512xf32>
    %c495_i32_136 = arith.constant 495 : i32
    %399 = tpu.dynamic_rotate %365 by %c495_i32_136 dim 1 : vector<8x512xf32>, i32 -> vector<8x512xf32>
    %400 = vector.extract_strided_slice %366 {offsets = [8, 0], sizes = [1, 512], strides = [1, 1]} : vector<9x512xf32> to vector<1x512xf32>
    %401 = vector.broadcast %400 : vector<1x512xf32> to vector<8x512xf32>
    %402 = arith.mulf %399, %401 : vector<8x512xf32>
    %403 = tpu.concatenate %371, %375, %379, %383, %386, %390, %394, %398, %402 in 0 : vector<8x512xf32>, vector<8x512xf32>, vector<8x512xf32>, vector<8x512xf32>, vector<8x512xf32>, vector<8x512xf32>, vector<8x512xf32>, vector<8x512xf32>, vector<8x512xf32> -> vector<72x512xf32>
    %cst_137 = arith.constant dense<0.000000e+00> : vector<8x512xf32>
    %404 = tpu.matmul %367, %403, %cst_137 {dimension_numbers = #tpu.dot_dimension_numbers<[1], [0], [0], [1], [0, 0, 1, 1], [], []>} : vector<8x72xf32>, vector<72x512xf32>, vector<8x512xf32> -> vector<8x512xf32>
    %c0_138 = arith.constant 0 : index
    %c0_139 = arith.constant 0 : index
    %405 = vector.load %arg26[%c0_138, %c0_139] : memref<512x128xf32, #tpu.memory_space<vmem>>, vector<512x128xf32>
    %cst_140 = arith.constant dense<0.000000e+00> : vector<8x128xf32>
    %406 = tpu.matmul %404, %405, %cst_140 {dimension_numbers = #tpu.dot_dimension_numbers<[1], [0], [0], [1], [0, 0, 1, 1], [], []>} : vector<8x512xf32>, vector<512x128xf32>, vector<8x128xf32> -> vector<8x128xf32>
    %c0_141 = arith.constant 0 : index
    %c0_142 = arith.constant 0 : index
    %407 = vector.load %arg27[%c0_141, %c0_142] : memref<8x1xf32, #tpu.memory_space<vmem>>, vector<8x1xf32>
    %408 = vector.broadcast %407 : vector<8x1xf32> to vector<8x128xf32>
    %409 = arith.addf %406, %408 : vector<8x128xf32>
    %c0_143 = arith.constant 0 : index
    %c0_144 = arith.constant 0 : index
    %410 = vector.load %arg28[%c0_143, %c0_144] : memref<9x128xf32, #tpu.memory_space<vmem>>, vector<9x128xf32>
    %c0_145 = arith.constant 0 : index
    %c0_146 = arith.constant 0 : index
    %411 = vector.load %arg29[%c0_145, %c0_146] : memref<8x72xf32, #tpu.memory_space<vmem>>, vector<8x72xf32>
    %c9_i32 = arith.constant 9 : i32
    %412 = tpu.dynamic_rotate %409 by %c9_i32 dim 1 : vector<8x128xf32>, i32 -> vector<8x128xf32>
    %413 = vector.extract_strided_slice %410 {offsets = [0, 0], sizes = [1, 128], strides = [1, 1]} : vector<9x128xf32> to vector<1x128xf32>
    %414 = vector.broadcast %413 : vector<1x128xf32> to vector<8x128xf32>
    %415 = arith.mulf %412, %414 : vector<8x128xf32>
    %c8_i32 = arith.constant 8 : i32
    %416 = tpu.dynamic_rotate %409 by %c8_i32 dim 1 : vector<8x128xf32>, i32 -> vector<8x128xf32>
    %417 = vector.extract_strided_slice %410 {offsets = [1, 0], sizes = [1, 128], strides = [1, 1]} : vector<9x128xf32> to vector<1x128xf32>
    %418 = vector.broadcast %417 : vector<1x128xf32> to vector<8x128xf32>
    %419 = arith.mulf %416, %418 : vector<8x128xf32>
    %c7_i32 = arith.constant 7 : i32
    %420 = tpu.dynamic_rotate %409 by %c7_i32 dim 1 : vector<8x128xf32>, i32 -> vector<8x128xf32>
    %421 = vector.extract_strided_slice %410 {offsets = [2, 0], sizes = [1, 128], strides = [1, 1]} : vector<9x128xf32> to vector<1x128xf32>
    %422 = vector.broadcast %421 : vector<1x128xf32> to vector<8x128xf32>
    %423 = arith.mulf %420, %422 : vector<8x128xf32>
    %c1_i32_147 = arith.constant 1 : i32
    %424 = tpu.dynamic_rotate %409 by %c1_i32_147 dim 1 : vector<8x128xf32>, i32 -> vector<8x128xf32>
    %425 = vector.extract_strided_slice %410 {offsets = [3, 0], sizes = [1, 128], strides = [1, 1]} : vector<9x128xf32> to vector<1x128xf32>
    %426 = vector.broadcast %425 : vector<1x128xf32> to vector<8x128xf32>
    %427 = arith.mulf %424, %426 : vector<8x128xf32>
    %428 = vector.extract_strided_slice %410 {offsets = [4, 0], sizes = [1, 128], strides = [1, 1]} : vector<9x128xf32> to vector<1x128xf32>
    %429 = vector.broadcast %428 : vector<1x128xf32> to vector<8x128xf32>
    %430 = arith.mulf %409, %429 : vector<8x128xf32>
    %c127_i32 = arith.constant 127 : i32
    %431 = tpu.dynamic_rotate %409 by %c127_i32 dim 1 : vector<8x128xf32>, i32 -> vector<8x128xf32>
    %432 = vector.extract_strided_slice %410 {offsets = [5, 0], sizes = [1, 128], strides = [1, 1]} : vector<9x128xf32> to vector<1x128xf32>
    %433 = vector.broadcast %432 : vector<1x128xf32> to vector<8x128xf32>
    %434 = arith.mulf %431, %433 : vector<8x128xf32>
    %c121_i32 = arith.constant 121 : i32
    %435 = tpu.dynamic_rotate %409 by %c121_i32 dim 1 : vector<8x128xf32>, i32 -> vector<8x128xf32>
    %436 = vector.extract_strided_slice %410 {offsets = [6, 0], sizes = [1, 128], strides = [1, 1]} : vector<9x128xf32> to vector<1x128xf32>
    %437 = vector.broadcast %436 : vector<1x128xf32> to vector<8x128xf32>
    %438 = arith.mulf %435, %437 : vector<8x128xf32>
    %c120_i32 = arith.constant 120 : i32
    %439 = tpu.dynamic_rotate %409 by %c120_i32 dim 1 : vector<8x128xf32>, i32 -> vector<8x128xf32>
    %440 = vector.extract_strided_slice %410 {offsets = [7, 0], sizes = [1, 128], strides = [1, 1]} : vector<9x128xf32> to vector<1x128xf32>
    %441 = vector.broadcast %440 : vector<1x128xf32> to vector<8x128xf32>
    %442 = arith.mulf %439, %441 : vector<8x128xf32>
    %c119_i32 = arith.constant 119 : i32
    %443 = tpu.dynamic_rotate %409 by %c119_i32 dim 1 : vector<8x128xf32>, i32 -> vector<8x128xf32>
    %444 = vector.extract_strided_slice %410 {offsets = [8, 0], sizes = [1, 128], strides = [1, 1]} : vector<9x128xf32> to vector<1x128xf32>
    %445 = vector.broadcast %444 : vector<1x128xf32> to vector<8x128xf32>
    %446 = arith.mulf %443, %445 : vector<8x128xf32>
    %447 = tpu.concatenate %415, %419, %423, %427, %430, %434, %438, %442, %446 in 0 : vector<8x128xf32>, vector<8x128xf32>, vector<8x128xf32>, vector<8x128xf32>, vector<8x128xf32>, vector<8x128xf32>, vector<8x128xf32>, vector<8x128xf32>, vector<8x128xf32> -> vector<72x128xf32>
    %cst_148 = arith.constant dense<0.000000e+00> : vector<8x128xf32>
    %448 = tpu.matmul %411, %447, %cst_148 {dimension_numbers = #tpu.dot_dimension_numbers<[1], [0], [0], [1], [0, 0, 1, 1], [], []>} : vector<8x72xf32>, vector<72x128xf32>, vector<8x128xf32> -> vector<8x128xf32>
    %c0_149 = arith.constant 0 : index
    %c0_150 = arith.constant 0 : index
    %449 = vector.load %arg30[%c0_149, %c0_150] : memref<8x1xf32, #tpu.memory_space<vmem>>, vector<8x1xf32>
    %450 = vector.broadcast %449 : vector<8x1xf32> to vector<8x128xf32>
    %451 = arith.addf %448, %450 : vector<8x128xf32>
    %c0_151 = arith.constant 0 : index
    %c0_152 = arith.constant 0 : index
    %452 = vector.load %arg31[%c0_151, %c0_152] : memref<8x128xf32, #tpu.memory_space<vmem>>, vector<8x128xf32>
    tpu.vector_store %arg31[%c0_151, %c0_152], %451 {strides = array<i32>} : memref<8x128xf32, #tpu.memory_space<vmem>>, vector<8x128xf32>,
    return
  }
  func.func @transform_0(%arg0: i32) -> (i32, i32) {
    %c0_i32 = arith.constant 0 : i32
    %c0_i32_0 = arith.constant 0 : i32
    %c0_i32_1 = arith.constant 0 : i32
    return %c0_i32, %c0_i32_0 : i32, i32
  }
  func.func @transform_1(%arg0: i32) -> (i32, i32) {
    %c0_i32 = arith.constant 0 : i32
    %c0_i32_0 = arith.constant 0 : i32
    %c0_i32_1 = arith.constant 0 : i32
    return %c0_i32, %c0_i32_0 : i32, i32
  }
  func.func @transform_2(%arg0: i32) -> (i32, i32) {
    %c0_i32 = arith.constant 0 : i32
    %c0_i32_0 = arith.constant 0 : i32
    %c0_i32_1 = arith.constant 0 : i32
    return %c0_i32, %c0_i32_0 : i32, i32
  }
  func.func @transform_3(%arg0: i32) -> (i32, i32) {
    %c0_i32 = arith.constant 0 : i32
    %c0_i32_0 = arith.constant 0 : i32
    %c0_i32_1 = arith.constant 0 : i32
    return %c0_i32, %c0_i32_0 : i32, i32
  }
  func.func @transform_4(%arg0: i32) -> (i32, i32) {
    %c0_i32 = arith.constant 0 : i32
    %c0_i32_0 = arith.constant 0 : i32
    %c0_i32_1 = arith.constant 0 : i32
    return %c0_i32, %c0_i32_0 : i32, i32
  }
  func.func @transform_5(%arg0: i32) -> (i32, i32) {
    %c0_i32 = arith.constant 0 : i32
    %c0_i32_0 = arith.constant 0 : i32
    %c0_i32_1 = arith.constant 0 : i32
    return %c0_i32, %c0_i32_0 : i32, i32
  }
  func.func @transform_6(%arg0: i32) -> (i32, i32) {
    %c0_i32 = arith.constant 0 : i32
    %c0_i32_0 = arith.constant 0 : i32
    %c0_i32_1 = arith.constant 0 : i32
    return %c0_i32, %c0_i32_0 : i32, i32
  }
  func.func @transform_7(%arg0: i32) -> (i32, i32) {
    %c0_i32 = arith.constant 0 : i32
    %c0_i32_0 = arith.constant 0 : i32
    %c0_i32_1 = arith.constant 0 : i32
    return %c0_i32, %c0_i32_0 : i32, i32
  }
  func.func @transform_8(%arg0: i32) -> (i32, i32) {
    %c0_i32 = arith.constant 0 : i32
    %c0_i32_0 = arith.constant 0 : i32
    %c0_i32_1 = arith.constant 0 : i32
    return %c0_i32, %c0_i32_0 : i32, i32
  }
  func.func @transform_9(%arg0: i32) -> (i32, i32) {
    %c0_i32 = arith.constant 0 : i32
    %c0_i32_0 = arith.constant 0 : i32
    %c0_i32_1 = arith.constant 0 : i32
    return %c0_i32, %c0_i32_0 : i32, i32
  }
  func.func @transform_10(%arg0: i32) -> (i32, i32) {
    %c0_i32 = arith.constant 0 : i32
    %c0_i32_0 = arith.constant 0 : i32
    %c0_i32_1 = arith.constant 0 : i32
    return %c0_i32, %c0_i32_0 : i32, i32
  }
  func.func @transform_11(%arg0: i32) -> (i32, i32) {
    %c0_i32 = arith.constant 0 : i32
    %c0_i32_0 = arith.constant 0 : i32
    %c0_i32_1 = arith.constant 0 : i32
    return %c0_i32, %c0_i32_0 : i32, i32
  }
  func.func @transform_12(%arg0: i32) -> (i32, i32) {
    %c0_i32 = arith.constant 0 : i32
    %c0_i32_0 = arith.constant 0 : i32
    %c0_i32_1 = arith.constant 0 : i32
    return %c0_i32, %c0_i32_0 : i32, i32
  }
  func.func @transform_13(%arg0: i32) -> (i32, i32) {
    %c0_i32 = arith.constant 0 : i32
    %c0_i32_0 = arith.constant 0 : i32
    %c0_i32_1 = arith.constant 0 : i32
    return %c0_i32, %c0_i32_0 : i32, i32
  }
  func.func @transform_14(%arg0: i32) -> (i32, i32) {
    %c0_i32 = arith.constant 0 : i32
    %c0_i32_0 = arith.constant 0 : i32
    %c0_i32_1 = arith.constant 0 : i32
    return %c0_i32, %c0_i32_0 : i32, i32
  }
  func.func @transform_15(%arg0: i32) -> (i32, i32) {
    %c0_i32 = arith.constant 0 : i32
    %c0_i32_0 = arith.constant 0 : i32
    %c0_i32_1 = arith.constant 0 : i32
    return %c0_i32, %c0_i32_0 : i32, i32
  }
  func.func @transform_16(%arg0: i32) -> (i32, i32) {
    %c0_i32 = arith.constant 0 : i32
    %c0_i32_0 = arith.constant 0 : i32
    %c0_i32_1 = arith.constant 0 : i32
    return %c0_i32, %c0_i32_0 : i32, i32
  }
  func.func @transform_17(%arg0: i32) -> (i32, i32) {
    %c0_i32 = arith.constant 0 : i32
    %c0_i32_0 = arith.constant 0 : i32
    %c0_i32_1 = arith.constant 0 : i32
    return %c0_i32, %c0_i32_0 : i32, i32
  }
  func.func @transform_18(%arg0: i32) -> (i32, i32) {
    %c0_i32 = arith.constant 0 : i32
    %c0_i32_0 = arith.constant 0 : i32
    %c0_i32_1 = arith.constant 0 : i32
    return %c0_i32, %c0_i32_0 : i32, i32
  }
  func.func @transform_19(%arg0: i32) -> (i32, i32) {
    %c0_i32 = arith.constant 0 : i32
    %c0_i32_0 = arith.constant 0 : i32
    %c0_i32_1 = arith.constant 0 : i32
    return %c0_i32, %c0_i32_0 : i32, i32
  }
  func.func @transform_20(%arg0: i32) -> (i32, i32) {
    %c0_i32 = arith.constant 0 : i32
    %c0_i32_0 = arith.constant 0 : i32
    %c0_i32_1 = arith.constant 0 : i32
    return %c0_i32, %c0_i32_0 : i32, i32
  }
  func.func @transform_21(%arg0: i32) -> (i32, i32) {
    %c0_i32 = arith.constant 0 : i32
    %c0_i32_0 = arith.constant 0 : i32
    %c0_i32_1 = arith.constant 0 : i32
    return %c0_i32, %c0_i32_0 : i32, i32
  }
  func.func @transform_22(%arg0: i32) -> (i32, i32) {
    %c0_i32 = arith.constant 0 : i32
    %c0_i32_0 = arith.constant 0 : i32
    %c0_i32_1 = arith.constant 0 : i32
    return %c0_i32, %c0_i32_0 : i32, i32
  }
  func.func @transform_23(%arg0: i32) -> (i32, i32) {
    %c0_i32 = arith.constant 0 : i32
    %c0_i32_0 = arith.constant 0 : i32
    %c0_i32_1 = arith.constant 0 : i32
    return %c0_i32, %c0_i32_0 : i32, i32
  }
  func.func @transform_24(%arg0: i32) -> (i32, i32) {
    %c0_i32 = arith.constant 0 : i32
    %c0_i32_0 = arith.constant 0 : i32
    %c0_i32_1 = arith.constant 0 : i32
    return %c0_i32, %c0_i32_0 : i32, i32
  }
  func.func @transform_25(%arg0: i32) -> (i32, i32) {
    %c0_i32 = arith.constant 0 : i32
    %c0_i32_0 = arith.constant 0 : i32
    %c0_i32_1 = arith.constant 0 : i32
    return %c0_i32, %c0_i32_0 : i32, i32
  }
  func.func @transform_26(%arg0: i32) -> (i32, i32) {
    %c0_i32 = arith.constant 0 : i32
    %c0_i32_0 = arith.constant 0 : i32
    %c0_i32_1 = arith.constant 0 : i32
    return %c0_i32, %c0_i32_0 : i32, i32
  }
  func.func @transform_27(%arg0: i32) -> (i32, i32) {
    %c0_i32 = arith.constant 0 : i32
    %c0_i32_0 = arith.constant 0 : i32
    %c0_i32_1 = arith.constant 0 : i32
    return %c0_i32, %c0_i32_0 : i32, i32
  }
  func.func @transform_28(%arg0: i32) -> (i32, i32) {
    %c0_i32 = arith.constant 0 : i32
    %c0_i32_0 = arith.constant 0 : i32
    %c0_i32_1 = arith.constant 0 : i32
    return %c0_i32, %c0_i32_0 : i32, i32
  }
  func.func @transform_29(%arg0: i32) -> (i32, i32) {
    %c0_i32 = arith.constant 0 : i32
    %c0_i32_0 = arith.constant 0 : i32
    %c0_i32_1 = arith.constant 0 : i32
    return %c0_i32, %c0_i32_0 : i32, i32
  }
  func.func @transform_30(%arg0: i32) -> (i32, i32) {
    %c0_i32 = arith.constant 0 : i32
    %c0_i32_0 = arith.constant 0 : i32
    %c0_i32_1 = arith.constant 0 : i32
    return %c0_i32, %c0_i32_0 : i32, i32
  }
}

</mosaic_0001>

<bundles_post_ra>
// kernel: tpu_custom_call.1
= control target key start
LH: loop header
LB: loop body
LE: loop exit
PB: predicated region body
PF: predicated region fallthrough
CT: control target
= control target key end

     0   :  { %s4109_s6 = smov 1   ;;  %s4110_s10 = smov 2   ;;  %s5835_s0 = inlined_call_operand.smem [shape: u32[31], index: -1, kind: input, shape index: {}] }
   0x1   :  { %s4169_s5 = sld [smem:[%s5835_s0]]   ;;  %s4111_s14 = smov 3  }
   0x2   :  { %s4174_s9 = sld [smem:[%s5835_s0 + %s4109_s6]]   ;;  %s4112_s18 = smov 4  }
   0x3   :  { %s4179_s13 = sld [smem:[%s5835_s0 + %s4110_s10]]   ;;  %s4113_s22 = smov 5  }
   0x4   :  { %s4184_s17 = sld [smem:[%s5835_s0 + %s4111_s14]]   ;;  %s4114_s26 = smov 6  }
   0x5   :  { %s4189_s21 = sld [smem:[%s5835_s0 + %s4112_s18]]   ;;  %s4115_s30 = smov 7  }
   0x6   :  { %s4194_s25 = sld [smem:[%s5835_s0 + %s4113_s22]]   ;;  %s4116_s4 = smov 8  }
   0x7   :  { %s4199_s29 = sld [smem:[%s5835_s0 + %s4114_s26]]   ;;  %s4117_s10 = smov 9  }
   0x8   :  { %s4204_s3 = sld [smem:[%s5835_s0 + %s4115_s30]]   ;;  %s4118_s15 = smov 10  }
   0x9   :  { %s4209_s8 = sld [smem:[%s5835_s0 + %s4116_s4]]   ;;  %s4119_s20 = smov 11  }
   0xa   :  { %s4214_s14 = sld [smem:[%s5835_s0 + %s4117_s10]]   ;;  %s4120_s26 = smov 12  }
   0xb   :  { %s4219_s19 = sld [smem:[%s5835_s0 + %s4118_s15]]   ;;  %s4121_s1 = smov 13  }
   0xc   :  { %s4224_s24 = sld [smem:[%s5835_s0 + %s4119_s20]]   ;;  %s4122_s7 = smov 14  }
   0xd   :  { %s4229_s30 = sld [smem:[%s5835_s0 + %s4120_s26]]   ;;  %s4123_s15 = smov 15  }
   0xe   :  { %s4234_s6 = sld [smem:[%s5835_s0 + %s4121_s1]]   ;;  %s4124_s22 = smov 16  }
   0xf   :  { %s4239_s12 = sld [smem:[%s5835_s0 + %s4122_s7]]   ;;  %s4125_s28 = smov 17  }
  0x10   :  { %s4244_s20 = sld [smem:[%s5835_s0 + %s4123_s15]]   ;;  %s4126_s7 = smov 18  }
  0x11   :  { %5871 = sst [smem:[#allocation12_spill]] %s4219_s19  ;;  %s4127_s15 = smov 19  }
  0x12   :  { %s4249_s27 = sld [smem:[%s5835_s0 + %s4124_s22]]   ;;  %s4128_s22 = smov 20  }
  0x13   :  { %5872 = sst [smem:[#allocation13_spill]] %s4229_s30 }
  0x14   :  { %5873 = sst [smem:[#allocation14_spill]] %s4234_s6 }
  0x15   :  { %5874 = sst [smem:[#allocation15_spill]] %s4239_s12 }
  0x16   :  { %5875 = sst [smem:[#allocation16_spill]] %s4244_s20 }
  0x17   :  { %s4254_s4 = sld [smem:[%s5835_s0 + %s4125_s28]]   ;;  %s4129_s28 = smov 21  }
  0x18   :  { %5876 = sst [smem:[#allocation17_spill]] %s4249_s27 }
  0x19   :  { %s4259_s12 = sld [smem:[%s5835_s0 + %s4126_s7]]   ;;  %s4130_s7 = smov 22  }
  0x1a   :  { %s4264_s20 = sld [smem:[%s5835_s0 + %s4127_s15]]   ;;  %s4131_s15 = smov 23  }
  0x1b   :  { %s4269_s27 = sld [smem:[%s5835_s0 + %s4128_s22]]   ;;  %s4132_s22 = smov 24  }
  0x1c   :  { %s4274_s30 = sld [smem:[%s5835_s0 + %s4129_s28]]   ;;  %s4133_s28 = smov 25  }
  0x1f   :  { %5877 = sst [smem:[#allocation18_spill]] %s4259_s12 }
  0x20   :  { %5878 = sst [smem:[#allocation19_spill]] %s4264_s20 }
  0x21   :  { %5879 = sst [smem:[#allocation20_spill]] %s4269_s27 }
  0x22   :  { %5880 = sst [smem:[#allocation21_spill]] %s4274_s30 }
  0x23   :  { %s4279_s12 = sld [smem:[%s5835_s0 + %s4130_s7]]   ;;  %s4134_s7 = smov 26  }
  0x24   :  { %s4284_s20 = sld [smem:[%s5835_s0 + %s4131_s15]]   ;;  %s4135_s15 = smov 27  }
  0x25   :  { %s4289_s27 = sld [smem:[%s5835_s0 + %s4132_s22]]   ;;  %s4136_s22 = smov 28  }
  0x26   :  { %s4294_s30 = sld [smem:[%s5835_s0 + %s4133_s28]]   ;;  %s4137_s28 = smov 29  }
  0x27   :  { %s4299_s19 = sld [smem:[%s5835_s0 + %s4134_s7]]   ;;  %s4138_s7 = smov 30  }
  0x28   :  { %s4314_s6 = sld [smem:[%s5835_s0 + %s4137_s28]]  }
  0x2a   :  { %5881 = sst [smem:[#allocation22_spill]] %s4284_s20 }
  0x2b   :  { %5882 = sst [smem:[#allocation23_spill]] %s4289_s27 }
  0x2c   :  { %s4304_s20 = sld [smem:[%s5835_s0 + %s4135_s15]]  }
  0x2d   :  { %5883 = sst [smem:[#allocation24_spill]] %s4299_s19 }
  0x2e   :  { %s4309_s27 = sld [smem:[%s5835_s0 + %s4136_s22]]  }
  0x2f   :  { %s4319_s19 = sld [smem:[%s5835_s0 + %s4138_s7]]  }
  0x30   :  { %66 = vsyncpa [#allocation3], 0 }
  0x31   :  { %67 = vsyncpa [#allocation6], 0 }
  0x32   :  { %68 = vsyncpa [#allocation4], 0  ;;  %s4139_s15 = smov [#allocation5]   ;;  %s4140_s18 = smov [#allocation2]  }
  0x33   :  { %s127_s16 = sshll.u32 %s4139_s15, 4  ;;  %s109_s22 = sshll.u32 %s4140_s18, 4  ;;  %s128_s16 = int_to_ptr.vmem [resolvable:$true] %s127_s16  ;;  %s110_s22 = int_to_ptr.vmem [resolvable:$true] %s109_s22 }
  0x34   :  { %s4031_s23 = scalar_lea.vmem %s128_s16, 128  ;;  %p4036_p1 = scmp.lt.s32.totalorder %s128_s16, %s128_s16 }
  0x35   :  { %p4032_p0 = scmp.ne.s32.totalorder %s128_s16, %s4031_s23  ;;  %p4037_p2 = scmp.lt.s32.totalorder %s4031_s23, %s4031_s23 }
  0x37   :  { %p4038_p3 = por %p4037_p2, %p4036_p1 }
  0x39   :  { %p4039_p4 = pnand %p4038_p3, %p4032_p0 }
  0x3b   :  { %4042 = shalt.err (!%p4039_p4)
}
  0x3c   :  { %130 = dma.hbm_to_vmem [thread:$0]  %s4279_s12, 128, %s128_s16, [#allocation6]  }
  0x3d   :  { %s4051_s0 = scalar_lea.vmem %s110_s22, 128  ;;  %p4056_p6 = scmp.lt.s32.totalorder %s110_s22, %s110_s22 }
  0x3e   :  { %p4052_p5 = scmp.ne.s32.totalorder %s110_s22, %s4051_s0  ;;  %p4057_p7 = scmp.lt.s32.totalorder %s4051_s0, %s4051_s0 }
  0x40   :  { %p4058_p8 = por %p4057_p7, %p4056_p6 }
  0x42   :  { %p4059_p9 = pnand %p4058_p8, %p4052_p5 }
  0x44   :  { %4062 = shalt.err (!%p4059_p9)
}
  0x45   :  { %112 = dma.hbm_to_vmem [thread:$0]  %s4254_s4, 128, %s110_s22, [#allocation3]  }
  0x46   :  { %s4141_s26 = smov [#allocation7]  }
  0x47   :  { %s140_s28 = sshll.u32 %s4141_s26, 4  ;;  %s141_s28 = int_to_ptr.vmem [resolvable:$true] %s140_s28 }
  0x48   :  { %s4071_s1 = scalar_lea.vmem %s141_s28, 8192  ;;  %p4076_p11 = scmp.lt.s32.totalorder %s141_s28, %s141_s28 }
  0x49   :  { %p4072_p10 = scmp.ne.s32.totalorder %s141_s28, %s4071_s1  ;;  %p4077_p12 = scmp.lt.s32.totalorder %s4071_s1, %s4071_s1 }
  0x4b   :  { %p4078_p13 = por %p4077_p12, %p4076_p11 }
  0x4d   :  { %p4079_p0 = pnand %p4078_p13, %p4072_p10 }
  0x4f   :  { %4082 = shalt.err (!%p4079_p0)
}
  0x50   :  { %s4142_s12 = smov 128   ;;  %s4143_s2 = smov 8  }
  0x51   :  { %146 = dma.hbm_to_vmem [thread:$0]  %s4294_s30, 8192, %s141_s28, [#allocation6], %s4142_s12, %s4142_s12, %s4143_s2  }
  0x52   :  { %4103 = dma.done.wait [#allocation3], 128  }
  0x53   :  { %4104 = vsyncadd [#allocation3], 4294967168 }
  0x54   :  { %4105 = dma.done.wait [#allocation6], 8320  }
  0x55   :  { %4106 = vsyncadd [#allocation6], 4294958976  ;;  %v5836_v0 = vmov 0.0   ;;  %v4328_v1 = vld [vmem:[%s4169_s5] sm:$0xff]  ;;  %v4331_v2 = vld [vmem:[%s4169_s5 + $0x8] sm:$0xff]  ;;  %vm4145_vm0 = vmmov 0  }
  0x56   :  { %3844 = vmatprep.subr.mxu1 %v5836_v0  ;;  %3854 = vmatprep.subr.mxu0 %v5836_v0  ;;  %v4334_v3 = vld [vmem:[%s4169_s5 + $0x10] sm:$0xff]  ;;  %v179_v4 = vadd.f32 %v4331_v2, %v4328_v1  ;;  %v4339_v5 = vld [vmem:[%s4169_s5 + $0x18] sm:$0xff]  ;;  %v182_v6 = vmul.f32 %v4328_v1, %v4328_v1  ;;  %v183_v7 = vmul.f32 %v4331_v2, %v4331_v2  ;;  %v176_v13 = vld [vmem:[%s4179_s13] sm:$0xff]  ;;  %vm187_vm1 = vcmask 64512   ;;  %s4147_s13 = smov 112   ;;  %s4150_s30 = smov 1  }
  0x57   :  { %v357_v8 = vmul.f32 %v4334_v3, %v4334_v3  ;;  %v354_v9 = vadd.f32 %v4339_v5, %v4334_v3  ;;  %v358_v10 = vmul.f32 %v4339_v5, %v4339_v5  ;;  %3846 = vmatprep.mubr.msk.f32.mxu1 %vm4145_vm0, %v5836_v0  ;;  %3856 = vmatprep.mubr.msk.f32.mxu0 %vm4145_vm0, %v5836_v0  ;;  %v4146_v18 = vmov 0   ;;  %v177_v33 = vld [vmem:[%s4184_s17] sm:$0xff]  ;;  %s4148_s17 = smov 111   ;;  %s4151_s4 = smov 15  }
  0x58   :  { %180 = vadd.xlane.f32.xlu0 %v179_v4  ;;  %v184_v11 = vadd.f32 %v183_v7, %v182_v6  ;;  %3998 = vset.pattern.permute.xlu1 %v4146_v18  ;;  %v178_v39 = vld [vmem:[%s4189_s21] sm:$0xff]  ;;  %s4149_s21 = smov 127   ;;  %s4152_s7 = smov 113   ;;  %vm818_vm10 = vcmask 588800  }
  0x59   :  { %355 = vadd.xlane.f32.xlu1 %v354_v9  ;;  %v359_v12 = vadd.f32 %v358_v10, %v357_v8  ;;  %3997 = vset.pattern.permute.xlu0 %v4146_v18  ;;  %s4153_s10 = smov 16   ;;  %s4154_s11 = smov 17   ;;  %v812_v59 = vld [vmem:[%s4199_s29] sm:$0xff]  ;;  %v534_v9 = vlaneseq }
  0x5a   :  { %s5900_s29 = sld [smem:[#allocation12_spill]]  ;;  %s4155_s0 = smov 120  }
  0x5b   :  { %v4465_v10 = vand.u32 127, %v534_v9  ;;  %v4480_v18 = vshrl.u32 %v534_v9, 7  ;;  %s5924_s15 = sld [smem:[#allocation20_spill]]  ;;  %s4156_s26 = smov 119  }
  0x5c   :  { %185 = vadd.xlane.f32.xlu0 %v184_v11  ;;  %s5925_s16 = sld [smem:[#allocation21_spill]]  ;;  %s4157_s28 = smov 121  }
  0x5d   :  { %360 = vadd.xlane.f32.xlu1 %v359_v12  ;;  %vm787_vm2 = vcmp.lt.s32.totalorder %v4465_v10, 111  ;;  %vm754_vm3 = vcmp.lt.s32.totalorder %v4465_v10, 112  ;;  %vm721_vm4 = vcmp.lt.s32.totalorder %v4465_v10, 113  ;;  %vm569_vm5 = vcmp.lt.s32.totalorder %v4465_v10, 16  ;;  %s5926_s18 = sld [smem:[#allocation22_spill]]  ;;  %s4158_s1 = smov 7  }
  0x5e   :  { %vm688_vm6 = vcmp.lt.s32.totalorder %v4465_v10, 127  ;;  %vm602_vm7 = vcmp.lt.s32.totalorder %v4465_v10, 15  ;;  %vm635_vm8 = vcmp.lt.s32.totalorder %v4465_v10, 1  ;;  %vm536_vm9 = vcmp.lt.s32.totalorder %v4465_v10, 17  ;;  %s5937_s22 = sld [smem:[#allocation24_spill]]  ;;  %v3312_v10 = vld [vmem:[#allocation7 + $0x70] sm:$0xff] }
  0x5f   :  { %s5939_s23 = sld [smem:[#allocation23_spill]]  ;;  %s4159_s12 = smov 9  }
  0xe1   :  { %v181_v14 = vpop.xlane.xlu0 %180 }
  0xe2   :  { %3845 = vmatpush3.msra.mxu1 %v181_v14  ;;  %v356_v15 = vpop.xlane.xlu1 %355 }
  0xe3   :  { %3847 = vmatmul.mubr.msk.f32.vlgmr.msra.gmra.mxu1 %vm187_vm1, %v176_v13  ;;  %3849 = vmatprep.subr.mxu1 %v5836_v0 }
  0xe4   :  { %3851 = vmatprep.mubr.msk.f32.mxu1 %vm4145_vm0, %v5836_v0  ;;  %3855 = vmatpush3.msra.mxu0 %v356_v15 }
  0xe5   :  { %v186_v16 = vpop.xlane.xlu0 %185  ;;  %3857 = vmatmul.mubr.msk.f32.vlgmr.msra.gmra.mxu0 %vm187_vm1, %v176_v13 }
  0xe6   :  { %3850 = vmatpush3.msra.mxu1 %v186_v16  ;;  %v361_v17 = vpop.xlane.xlu1 %360  ;;  %886 = vmatprep.mubr.f32.mxu0 %v5836_v0 }
  0xe7   :  { %3852 = vmatmul.mubr.msk.f32.vlgmr.msra.gmra.mxu1 %vm187_vm1, %v176_v13  ;;  %3859 = vmatprep.subr.mxu1 %v5836_v0 }
  0xe8   :  { %3860 = vmatpush3.msra.mxu1 %v361_v17  ;;  %3861 = vmatprep.mubr.msk.f32.mxu1 %vm4145_vm0, %v5836_v0 }
  0xeb   :  { %3862 = vmatmul.mubr.msk.f32.vlgmr.msra.gmra.mxu1 %vm187_vm1, %v176_v13  ;;  %v4472_v13 = vld [vmem:[%s4174_s9 + $0x38] ss:$0 sm:$0xff] }
  0xec   :  { %957 = vmatprep.mubr.f32.mxu1 %v5836_v0 }
 0x1a3   :  { %v257_v19 = vpop.f32.mrf.mxu1 }
 0x1a4   :  { %v331_v22 = vmul.f32 %v257_v19, %v257_v19 }
 0x1a5   :  { %v3848_v20 = vpop.f32.mrf.mxu1  ;;  %v428_v21 = vpop.f32.mrf.mxu0 }
 0x1a6   :  { %v502_v26 = vmul.f32 %v428_v21, %v428_v21 }
 0x1a7   :  { %v327_v23 = vpop.f32.mrf.mxu1  ;;  %v3858_v24 = vpop.f32.mrf.mxu0 }
 0x1a8   :  { %v332_v25 = vsub.f32 %v327_v23, %v331_v22  ;;  %v4490_v23 = vld [vmem:[%s4174_s9 + $0x8] sm:$0xff]  ;;  %v4493_v24 = vld [vmem:[%s4174_s9] sm:$0xff] }
 0x1a9   :  { %v3853_v27 = vpop.f32.mrf.mxu1 }
 0x1aa   :  { %v333_v28 = vadd.f32 1e-05, %v332_v25  ;;  %v4496_v25 = vsub.s32 7, %v4480_v18  ;;  %v4502_v27 = vld [vmem:[%s4174_s9 + $0x30] ss:$0 sm:$0xff] }
 0x1ab   :  { %v498_v29 = vpop.f32.mrf.mxu1 }
 0x1ac   :  { %3999 = vrsqrt.f32 %v333_v28  ;;  %v503_v30 = vsub.f32 %v498_v29, %v502_v26  ;;  %5885 = vst [vmem:[#allocation26_spill] sm:$0xff] %v4496_v25  ;;  %v4499_v26 = vsub.s32 6, %v4480_v18  ;;  %v4505_v28 = vld [vmem:[%s4174_s9 + $0x28] ss:$0 sm:$0xff]  ;;  %v4508_v29 = vld [vmem:[%s4174_s9 + $0x18] sm:$0xff] }
 0x1ad   :  { %v3863_v31 = vpop.f32.mrf.mxu1 }
 0x1ae   :  { %v504_v32 = vadd.f32 1e-05, %v503_v30  ;;  %5886 = vst [vmem:[#allocation27_spill] sm:$0xff] %v4499_v26  ;;  %v4515_v31 = vld [vmem:[%s4174_s9 + $0x20] ss:$0 sm:$0xff] }
 0x1b0   :  { %4001 = vrsqrt.f32 %v504_v32 }
 0x1b9   :  { %v4000_v34 = vpop.eup %3999 }
 0x1ba   :  { %v335_v35 = vmul.f32 %v4000_v34, %v177_v33 }
 0x1bc   :  { %340 = vperm.xlu0 %3997, %v335_v35   ;;  %v336_v38 = vmul.f32 %v335_v35, %v257_v19  ;;  %v4524_v35 = vrot.slane %v4508_v29, %v4496_v25 }
 0x1bd   :  { %v4002_v36 = vpop.eup %4001 }
 0x1be   :  { %v506_v37 = vmul.f32 %v4002_v36, %v177_v33  ;;  %v337_v40 = vsub.f32 %v178_v39, %v336_v38 }
 0x1c0   :  { %511 = vperm.xlu1 %3998, %v506_v37   ;;  %v507_v41 = vmul.f32 %v506_v37, %v428_v21  ;;  %v4485_v21 = vsub.s32 4, %v4480_v18 }
 0x1c2   :  { %v508_v42 = vsub.f32 %v178_v39, %v507_v41  ;;  %5884 = vst [vmem:[#allocation25_spill] sm:$0xff] %v4485_v21  ;;  %v4512_v30 = vrot.slane %v4490_v23, %v4485_v21  ;;  %v4528_v36 = vrot.slane %v4493_v24, %v4485_v21 }
 0x1c4   :  { %347 = vperm.xlu1 %3998, %v337_v40   ;;  %v4538_v40 = vld [vmem:[%s4174_s9 + $0x10] sm:$0xff] }
 0x1c8   :  { %518 = vperm.xlu1 %3998, %v508_v42  }
 0x237   :  { %v341_v43 = vpop.permute.xlu0 %340 }
 0x238   :  { %v343_v45 = vmul.f32 %v341_v43, %v4328_v1  ;;  %v344_v46 = vmul.f32 %v341_v43, %v4331_v2  ;;  %v4544_v43 = vrot.slane %v4538_v40, %v4496_v25 }
 0x23b   :  { %v512_v44 = vpop.permute.xlu1 %511 }
 0x23c   :  { %v514_v53 = vmul.f32 %v512_v44, %v4334_v3  ;;  %v515_v55 = vmul.f32 %v512_v44, %v4339_v5  ;;  %v4548_v44 = vrot.slane %v4490_v23, %v4496_v25 }
 0x23f   :  { %v348_v47 = vpop.permute.xlu1 %347 }
 0x240   :  { %v350_v48 = vadd.f32 %v348_v47, %v343_v45  ;;  %v351_v49 = vadd.f32 %v348_v47, %v344_v46  ;;  %v4553_v46 = vrot.slane %v4493_v24, %v4496_v25  ;;  %v4557_v47 = vrot.slane %v4493_v24, %v4499_v26 }
 0x242   :  { %v4372_v50 = vmax.f32 %v350_v48, 0.0  ;;  %v4374_v51 = vmax.f32 %v351_v49, 0.0  ;;  %v4560_v48 = vsub.s32 5, %v4480_v18 }
 0x243   :  { %v519_v52 = vpop.permute.xlu1 %518 }
 0x244   :  { %746 = vrot.lane.b32.xlu0 %v4372_v50, %s4147_s13  ;;  %781 = vrot.lane.b32.xlu1 %v4374_v51, %s4148_s17  ;;  %v521_v54 = vadd.f32 %v519_v52, %v514_v53  ;;  %v522_v56 = vadd.f32 %v519_v52, %v515_v55  ;;  %5887 = vst [vmem:[#allocation28_spill] sm:$0xff] %v4560_v48 }
 0x246   :  { %v4402_v57 = vmax.f32 %v521_v54, 0.0  ;;  %v4408_v58 = vmax.f32 %v522_v56, 0.0  ;;  %v4570_v54 = vrot.slane %v4490_v23, %v4499_v26  ;;  %v4577_v56 = vsub.s32 3, %v4480_v18 }
 0x248   :  { %682 = vrot.lane.b32.xlu0 %v4374_v51, %s4149_s21  ;;  %779 = vrot.lane.b32.xlu1 %v4372_v50, %s4148_s17  ;;  %5888 = vst [vmem:[#allocation29_spill] sm:$0xff] %v4577_v56 }
 0x24c   :  { %629 = vrot.lane.b32.xlu0 %v4374_v51, %s4150_s30  ;;  %748 = vrot.lane.b32.xlu1 %v4374_v51, %s4147_s13 }
 0x250   :  { %596 = vrot.lane.b32.xlu0 %v4374_v51, %s4151_s4  ;;  %715 = vrot.lane.b32.xlu1 %v4374_v51, %s4152_s7 }
 0x254   :  { %563 = vrot.lane.b32.xlu0 %v4374_v51, %s4153_s10  ;;  %713 = vrot.lane.b32.xlu1 %v4372_v50, %s4152_s7 }
 0x258   :  { %526 = vrot.lane.b32.xlu0 %v4372_v50, %s4154_s11  ;;  %680 = vrot.lane.b32.xlu1 %v4372_v50, %s4149_s21 }
 0x25c   :  { %627 = vrot.lane.b32.xlu1 %v4372_v50, %s4150_s30  ;;  %717 = vrot.lane.b32.xlu0 %v4402_v57, %s4152_s7 }
 0x260   :  { %594 = vrot.lane.b32.xlu1 %v4372_v50, %s4151_s4  ;;  %785 = vrot.lane.b32.xlu0 %v4408_v58, %s4148_s17 }
 0x264   :  { %561 = vrot.lane.b32.xlu1 %v4372_v50, %s4153_s10  ;;  %752 = vrot.lane.b32.xlu0 %v4408_v58, %s4147_s13 }
 0x268   :  { %528 = vrot.lane.b32.xlu1 %v4374_v51, %s4154_s11  ;;  %633 = vrot.lane.b32.xlu0 %v4408_v58, %s4150_s30 }
 0x26c   :  { %600 = vrot.lane.b32.xlu0 %v4408_v58, %s4151_s4  ;;  %783 = vrot.lane.b32.xlu1 %v4402_v57, %s4148_s17 }
 0x270   :  { %631 = vrot.lane.b32.xlu0 %v4402_v57, %s4150_s30  ;;  %750 = vrot.lane.b32.xlu1 %v4402_v57, %s4147_s13 }
 0x274   :  { %598 = vrot.lane.b32.xlu0 %v4402_v57, %s4151_s4  ;;  %684 = vrot.lane.b32.xlu1 %v4402_v57, %s4149_s21 }
 0x278   :  { %530 = vrot.lane.b32.xlu0 %v4402_v57, %s4154_s11  ;;  %719 = vrot.lane.b32.xlu1 %v4408_v58, %s4152_s7 }
 0x27c   :  { %686 = vrot.lane.b32.xlu1 %v4408_v58, %s4149_s21 }
 0x280   :  { %567 = vrot.lane.b32.xlu1 %v4408_v58, %s4153_s10 }
 0x284   :  { %532 = vrot.lane.b32.xlu1 %v4408_v58, %s4154_s11 }
 0x288   :  { %565 = vrot.lane.b32.xlu1 %v4402_v57, %s4153_s10 }
 0x28c   :  { %815 = vperm.xlu1 %3998, %v812_v59  }
 0x2b6   :  { %v747_v60 = vpop.permute.xlu0 %746  ;;  %v782_v61 = vpop.permute.xlu1 %781 }
 0x2ba   :  { %v4447_v62 = vpop.permute.xlu0 %682  ;;  %v780_v63 = vpop.permute.xlu1 %779 }
 0x2bb   :  { %v790_v32 = vsel %vm787_vm2, %v780_v63, %v782_v61 }
 0x2bc   :  { %v808_v45 = vmul.f32 %v4515_v31, %v790_v32 }
 0x2be   :  { %v4449_v1 = vpop.permute.xlu0 %629  ;;  %v4451_v2 = vpop.permute.xlu1 %748 }
 0x2bf   :  { %v757_v49 = vsel %vm754_vm3, %v747_v60, %v4451_v2 }
 0x2c2   :  { %v4453_v3 = vpop.permute.xlu0 %596  ;;  %v4455_v4 = vpop.permute.xlu1 %715 }
 0x2c6   :  { %v4457_v5 = vpop.permute.xlu0 %563  ;;  %v4459_v6 = vpop.permute.xlu1 %713 }
 0x2ca   :  { %v4461_v7 = vpop.permute.xlu0 %526  ;;  %v4463_v8 = vpop.permute.xlu1 %680 }
 0x2ce   :  { %v4467_v11 = vpop.permute.xlu0 %717  ;;  %v4469_v12 = vpop.permute.xlu1 %627 }
 0x2cf   :  { %v723_v55 = vsel %vm721_vm4, %v4455_v4, %v4467_v11 }
 0x2d2   :  { %v786_v14 = vpop.permute.xlu0 %785  ;;  %v4475_v15 = vpop.permute.xlu1 %594 }
 0x2d3   :  { %v791_v16 = vsel %vm787_vm2, %v786_v14, %v780_v63 }
 0x2d4   :  { %v811_v17 = vmul.f32 %v4472_v13, %v791_v16  ;;  %v4594_v16 = vrot.slane %v4490_v23, %v4560_v48 }
 0x2d6   :  { %907 = vmatprep.subr.mxu1 %v811_v17  ;;  %v4482_v19 = vpop.permute.xlu1 %561  ;;  %v753_v20 = vpop.permute.xlu0 %752  ;;  %v4600_v17 = vrot.slane %v4493_v24, %v4560_v48 }
 0x2d7   :  { %v758_v37 = vsel %vm754_vm3, %v753_v20, %v747_v60 }
 0x2d8   :  { %v778_v53 = vmul.f32 %v4524_v35, %v758_v37  ;;  %v4612_v37 = vsub.s32 1, %v4480_v18 }
 0x2da   :  { %v4487_v22 = vpop.permute.xlu1 %528  ;;  %v4520_v33 = vpop.permute.xlu0 %633  ;;  %5890 = vst [vmem:[#allocation31_spill] sm:$0xff] %v4612_v37 }
 0x2de   :  { %v784_v34 = vpop.permute.xlu1 %783  ;;  %v4588_v63 = vpop.permute.xlu0 %600 }
 0x2df   :  { %v788_v38 = vsel %vm787_vm2, %v784_v34, %v786_v14  ;;  %v789_v39 = vsel %vm787_vm2, %v782_v61, %v784_v34  ;;  %v724_v61 = vsel %vm721_vm4, %v4459_v6, %v4455_v4  ;;  %v4603_v4 = vsub.s32 2, %v4480_v18 }
 0x2e0   :  { %v810_v41 = vmul.f32 %v4502_v27, %v788_v38  ;;  %v809_v42 = vmul.f32 %v4505_v28, %v789_v39  ;;  %v743_v34 = vmul.f32 %v4570_v54, %v723_v55  ;;  %v742_v38 = vmul.f32 %v4557_v47, %v724_v61 }
 0x2e1   :  { %5889 = vst [vmem:[#allocation30_spill] sm:$0xff] %v4603_v4  ;;  %v4646_v55 = vrot.slane %v4490_v23, %v4603_v4 }
 0x2e2   :  { %836 = vmatprep.subr.mxu0 %v809_v42  ;;  %908 = vmatpush1.msra.mxu1 %v810_v41  ;;  %v751_v52 = vpop.permute.xlu1 %750  ;;  %v677_v41 = vmul.f32 %v4512_v30, %v4374_v51  ;;  %v676_v42 = vmul.f32 %v4528_v36, %v4372_v50  ;;  %v638_v50 = vsel %vm635_vm8, %v4469_v12, %v4449_v1  ;;  %v632_v61 = vpop.permute.xlu0 %631 }
 0x2e3   :  { %v755_v59 = vsel %vm754_vm3, %v751_v52, %v753_v20  ;;  %v756_v60 = vsel %vm754_vm3, %v4451_v2, %v751_v52  ;;  %837 = vmatpush1.msra.mxu0 %v808_v45  ;;  %909 = vmatprep.subr.mxu1 %v778_v53  ;;  %v775_v2 = vmul.f32 %v4553_v46, %v757_v49 }
 0x2e4   :  { %v777_v9 = vmul.f32 %v4544_v43, %v755_v59  ;;  %v776_v14 = vmul.f32 %v4548_v44, %v756_v60  ;;  %v691_v20 = vsel %vm688_vm6, %v4463_v8, %v4447_v62  ;;  %v4625_v49 = vrot.slane %v4538_v40, %v4499_v26 }
 0x2e5   :  { %v4629_v52 = vrot.slane %v4490_v23, %v4577_v56  ;;  %v709_v51 = vmul.f32 %v4600_v17, %v691_v20  ;;  %v4642_v53 = vrot.slane %v4493_v24, %v4577_v56  ;;  %v639_v59 = vsel %vm635_vm8, %v4520_v33, %v4469_v12 }
 0x2e6   :  { %838 = vmatprep.subr.mxu0 %v776_v14  ;;  %910 = vmatpush1.msra.mxu1 %v777_v9  ;;  %v685_v32 = vpop.permute.xlu1 %684  ;;  %v4654_v60 = vrot.slane %v4493_v24, %v4603_v4  ;;  %v4658_v14 = vrot.slane %v4538_v40, %v4560_v48  ;;  %v605_v12 = vsel %vm602_vm7, %v4475_v15, %v4453_v3 }
 0x2e7   :  { %v690_v39 = vsel %vm688_vm6, %v4447_v62, %v685_v32  ;;  %839 = vmatpush1.msra.mxu0 %v775_v2  ;;  %v4633_v62 = vrot.slane %v4508_v29, %v4499_v26  ;;  %v4662_v2 = vrot.slane %v4490_v23, %v4612_v37  ;;  %v657_v0 = vmul.f32 %v4629_v52, %v638_v50 }
 0x2e8   :  { %840 = vmatprep.subr.mxu0 %v743_v34  ;;  %v710_v45 = vmul.f32 %v4594_v16, %v690_v39  ;;  %v606_v39 = vsel %vm602_vm7, %v4588_v63, %v4475_v15  ;;  %v4695_v15 = vrot.slane %v4508_v29, %v4485_v21  ;;  %v624_v50 = vmul.f32 %v4646_v55, %v605_v12  ;;  %v599_v12 = vpop.permute.xlu0 %598 }
 0x2e9   :  { %841 = vmatpush1.msra.mxu0 %v742_v38  ;;  %v4676_v38 = vrot.slane %v4508_v29, %v4560_v48 }
 0x2ea   :  { %842 = vmatprep.subr.mxu0 %v710_v45  ;;  %v720_v9 = vpop.permute.xlu1 %719 }
 0x2eb   :  { %v722_v20 = vsel %vm721_vm4, %v4467_v11, %v720_v9  ;;  %v725_v34 = vsel %vm721_vm4, %v720_v9, %v4459_v6  ;;  %843 = vmatpush1.msra.mxu0 %v709_v51  ;;  %v572_v6 = vsel %vm569_vm5, %v4482_v19, %v4457_v5  ;;  %v656_v51 = vmul.f32 %v4642_v53, %v639_v59 }
 0x2ec   :  { %v744_v45 = vmul.f32 %v4625_v49, %v722_v20  ;;  %844 = vmatprep.subr.mxu0 %v677_v41  ;;  %v745_v11 = vmul.f32 %v4633_v62, %v725_v34  ;;  %v4691_v9 = vsub.s32 0, %v4480_v18  ;;  %v4700_v20 = vrot.slane %v4538_v40, %v4485_v21 }
 0x2ed   :  { %845 = vmatpush1.msra.mxu0 %v676_v42  ;;  %v4704_v59 = vrot.slane %v4508_v29, %v4577_v56  ;;  %v623_v18 = vmul.f32 %v4654_v60, %v606_v39  ;;  %v4718_v39 = vrot.slane %v4493_v24, %v4612_v37 }
 0x2ee   :  { %5891 = vst [vmem:[#allocation32_spill] sm:$0xff] %v4691_v9  ;;  %846 = vmatprep.subr.mxu0 %v657_v0  ;;  %911 = vmatprep.subr.mxu1 %v745_v11  ;;  %v687_v41 = vpop.permute.xlu1 %686  ;;  %v591_v11 = vmul.f32 %v4662_v2, %v572_v6  ;;  %v4731_v6 = vrot.slane %v4490_v23, %v4691_v9 }
 0x2ef   :  { %v689_v42 = vsel %vm688_vm6, %v685_v32, %v687_v41  ;;  %v692_v0 = vsel %vm688_vm6, %v687_v41, %v4463_v8  ;;  %847 = vmatpush1.msra.mxu0 %v656_v51  ;;  %912 = vmatpush1.msra.mxu1 %v744_v45  ;;  %v4722_v32 = vrot.slane %v4538_v40, %v4577_v56 }
 0x2f0   :  { %v711_v34 = vmul.f32 %v4658_v14, %v689_v42  ;;  %848 = vmatprep.subr.mxu0 %v624_v50  ;;  %v712_v21 = vmul.f32 %v4676_v38, %v692_v0  ;;  %v636_v8 = vsel %vm635_vm8, %v632_v61, %v4520_v33  ;;  %v679_v45 = vmul.f32 %v4695_v15, %v4408_v58 }
 0x2f1   :  { %849 = vmatpush1.msra.mxu0 %v623_v18  ;;  %v539_v51 = vsel %vm536_vm9, %v4461_v7, %v4487_v22  ;;  %v637_v41 = vsel %vm635_vm8, %v4449_v1, %v632_v61  ;;  %v4742_v50 = vrot.slane %v4508_v29, %v4603_v4  ;;  %v4746_v58 = vrot.slane %v4538_v40, %v4603_v4  ;;  %v966_v4 = vld [vmem:[%s4214_s14] sm:$0xff]  ;;  %s5915_s14 = sld [smem:[#allocation17_spill]] }
 0x2f2   :  { %850 = vmatprep.subr.mxu0 %v591_v11  ;;  %913 = vmatprep.subr.mxu1 %v712_v21  ;;  %v568_v33 = vpop.permute.xlu1 %567  ;;  %v603_v23 = vsel %vm602_vm7, %v599_v12, %v4588_v63  ;;  %v678_v1 = vmul.f32 %v4700_v20, %v4402_v57  ;;  %v604_v21 = vsel %vm602_vm7, %v4453_v3, %v599_v12 }
 0x2f3   :  { %5892 = vst [vmem:[#allocation33_spill] sm:$0xff] %v4742_v50  ;;  %v573_v18 = vsel %vm569_vm5, %v568_v33, %v4482_v19  ;;  %914 = vmatpush1.msra.mxu1 %v711_v34  ;;  %v659_v42 = vmul.f32 %v4704_v59, %v636_v8  ;;  %v4763_v63 = vrot.slane %v4493_v24, %v4691_v9  ;;  %v525_v8 = vld [vmem:[%s4194_s25] sm:$0xff]  ;;  %s5899_s25 = sld [smem:[#allocation14_spill]] }
 0x2f4   :  { %v590_v61 = vmul.f32 %v4718_v39, %v573_v18  ;;  %915 = vmatprep.subr.mxu1 %v679_v45  ;;  %v658_v19 = vmul.f32 %v4722_v32, %v637_v41  ;;  %v558_v0 = vmul.f32 %v4731_v6, %v539_v51  ;;  %v626_v3 = vmul.f32 %v4742_v50, %v603_v23  ;;  %v531_v51 = vpop.permute.xlu0 %530 }
 0x2f5   :  { %5893 = vst [vmem:[#allocation34_spill] sm:$0xff] %v4763_v63  ;;  %916 = vmatpush1.msra.mxu1 %v678_v1  ;;  %v625_v12 = vmul.f32 %v4746_v58, %v604_v21  ;;  %v4775_v11 = vrot.slane %v4538_v40, %v4612_v37  ;;  %v4780_v45 = vrot.slane %v4508_v29, %v4612_v37 }
 0x2f6   :  { %851 = vmatpush1.msra.mxu0 %v590_v61  ;;  %917 = vmatprep.subr.mxu1 %v659_v42  ;;  %v533_v57 = vpop.permute.xlu1 %532  ;;  %v4788_v23 = vrot.slane %v4508_v29, %v4691_v9  ;;  %v538_v61 = vsel %vm536_vm9, %v4487_v22, %v531_v51 }
 0x2f7   :  { %v540_v34 = vsel %vm536_vm9, %v533_v57, %v4461_v7  ;;  %852 = vmatprep.subr.mxu0 %v558_v0  ;;  %918 = vmatpush1.msra.mxu1 %v658_v19  ;;  %5894 = vst [vmem:[#allocation35_spill] sm:$0xff] %v4775_v11  ;;  %5895 = vst [vmem:[#allocation36_spill] sm:$0xff] %v4780_v45  ;;  %v4784_v7 = vrot.slane %v4538_v40, %v4691_v9  ;;  %v5898_v40 = vmov 0.0  }
 0x2f8   :  { %v557_v24 = vmul.f32 %v4763_v63, %v540_v34  ;;  %919 = vmatprep.subr.mxu1 %v626_v3  ;;  %5897 = vst [vmem:[#allocation38_spill] sm:$0xff] %v4788_v23  ;;  %v537_v18 = vsel %vm536_vm9, %v531_v51, %v533_v57 }
 0x2f9   :  { %920 = vmatpush1.msra.mxu1 %v625_v12  ;;  %5896 = vst [vmem:[#allocation37_spill] sm:$0xff] %v4784_v7 }
 0x2fa   :  { %853 = vmatpush1.msra.mxu0 %v557_v24  ;;  %v566_v41 = vpop.permute.xlu1 %565 }
 0x2fb   :  { %v570_v1 = vsel %vm569_vm5, %v566_v41, %v568_v33  ;;  %v571_v21 = vsel %vm569_vm5, %v4457_v5, %v566_v41  ;;  %3706 = vmatmul.mubr.msk.f32.vlgmr.msra.gmra.mxu0 %vm818_vm10, %v525_v8  ;;  %3874 = vmatprep.subr.mxu0 %v5898_v40  ;;  %v560_v33 = vmul.f32 %v4788_v23, %v537_v18 }
 0x2fc   :  { %v592_v29 = vmul.f32 %v4775_v11, %v571_v21  ;;  %v593_v42 = vmul.f32 %v4780_v45, %v570_v1  ;;  %3876 = vmatprep.mubr.msk.f32.mxu0 %vm4145_vm0, %v5898_v40  ;;  %v559_v5 = vmul.f32 %v4784_v7, %v538_v61 }
 0x2fe   :  { %921 = vmatprep.subr.mxu1 %v593_v42 }
 0x2ff   :  { %922 = vmatpush1.msra.mxu1 %v592_v29 }
 0x300   :  { %923 = vmatprep.subr.mxu1 %v560_v33  ;;  %v964_v33 = vld [vmem:[%s4204_s3] sm:$0xff]  ;;  %s5903_s3 = sld [smem:[#allocation13_spill]] }
 0x301   :  { %924 = vmatpush1.msra.mxu1 %v559_v5 }
 0x302   :  { %3707 = vmatmul.mubr.msk.f32.vlgmr.msra.gmra.mxu1 %vm818_vm10, %v525_v8  ;;  %3864 = vmatprep.subr.mxu1 %v5898_v40 }
 0x303   :  { %3866 = vmatprep.mubr.msk.f32.mxu1 %vm4145_vm0, %v5898_v40 }
 0x307   :  { %v816_v22 = vpop.permute.xlu1 %815 }
 0x3bb   :  { %v888_v19 = vpop.f32.mrf.mxu0 }
 0x3bc   :  { %v4812_v0 = vadd.f32 %v888_v19, %v816_v22 }
 0x3bd   :  { %v890_v57 = vpop.f32.mrf.mxu0 }
 0x3be   :  { %v4814_v3 = vadd.f32 %v890_v57, %v816_v22  ;;  %v970_v34 = vmul.f32 %v4812_v0, %v4812_v0 }
 0x3c0   :  { %v967_v12 = vadd.f32 %v4814_v3, %v4812_v0  ;;  %v971_v24 = vmul.f32 %v4814_v3, %v4814_v3 }
 0x3c2   :  { %968 = vadd.xlane.f32.xlu0 %v967_v12  ;;  %v959_v8 = vpop.f32.mrf.mxu1  ;;  %v972_v51 = vadd.f32 %v971_v24, %v970_v34 }
 0x3c3   :  { %v4822_v18 = vadd.f32 %v959_v8, %v816_v22 }
 0x3c4   :  { %973 = vadd.xlane.f32.xlu1 %v972_v51  ;;  %v961_v41 = vpop.f32.mrf.mxu1 }
 0x3c5   :  { %v4824_v1 = vadd.f32 %v961_v41, %v816_v22  ;;  %v1144_v29 = vmul.f32 %v4822_v18, %v4822_v18 }
 0x3c7   :  { %v1141_v21 = vadd.f32 %v4824_v1, %v4822_v18  ;;  %v1145_v61 = vmul.f32 %v4824_v1, %v4824_v1 }
 0x3c9   :  { %1142 = vadd.xlane.f32.xlu0 %v1141_v21  ;;  %v1146_v42 = vadd.f32 %v1145_v61, %v1144_v29 }
 0x3cd   :  { %1147 = vadd.xlane.f32.xlu0 %v1146_v42 }
 0x44b   :  { %v969_v5 = vpop.xlane.xlu0 %968 }
 0x44c   :  { %3865 = vmatpush3.msra.mxu1 %v969_v5 }
 0x44d   :  { %v974_v19 = vpop.xlane.xlu1 %973  ;;  %3867 = vmatmul.mubr.msk.f32.vlgmr.msra.gmra.mxu1 %vm187_vm1, %v964_v33  ;;  %3869 = vmatprep.subr.mxu1 %v5898_v40 }
 0x44e   :  { %3870 = vmatpush3.msra.mxu1 %v974_v19  ;;  %3871 = vmatprep.mubr.msk.f32.mxu1 %vm4145_vm0, %v5898_v40 }
 0x44f   :  { %3879 = vmatprep.subr.mxu1 %v5898_v40 }
 0x451   :  { %3872 = vmatmul.mubr.msk.f32.vlgmr.msra.gmra.mxu1 %vm187_vm1, %v964_v33 }
 0x452   :  { %v1143_v22 = vpop.xlane.xlu0 %1142  ;;  %3881 = vmatprep.mubr.msk.f32.mxu1 %vm4145_vm0, %v5898_v40 }
 0x453   :  { %3875 = vmatpush3.msra.mxu0 %v1143_v22 }
 0x454   :  { %3877 = vmatmul.mubr.msk.f32.vlgmr.msra.gmra.mxu0 %vm187_vm1, %v964_v33 }
 0x455   :  { %1518 = vmatprep.mubr.f32.mxu0 %v5898_v40 }
 0x456   :  { %v1148_v57 = vpop.xlane.xlu0 %1147 }
 0x457   :  { %3880 = vmatpush3.msra.mxu1 %v1148_v57 }
 0x458   :  { %3882 = vmatmul.mubr.msk.f32.vlgmr.msra.gmra.mxu1 %vm187_vm1, %v964_v33  ;;  %v965_v33 = vld [vmem:[%s4209_s8] sm:$0xff]  ;;  %s5914_s8 = sld [smem:[#allocation16_spill]] }
 0x459   :  { %1589 = vmatprep.mubr.f32.mxu1 %v5898_v40 }
 0x50d   :  { %v1044_v12 = vpop.f32.mrf.mxu1 }
 0x50e   :  { %v1118_v24 = vmul.f32 %v1044_v12, %v1044_v12 }
 0x50f   :  { %v3868_v34 = vpop.f32.mrf.mxu1 }
 0x511   :  { %v1114_v8 = vpop.f32.mrf.mxu1 }
 0x512   :  { %v1119_v51 = vsub.f32 %v1114_v8, %v1118_v24 }
 0x513   :  { %v3873_v41 = vpop.f32.mrf.mxu1 }
 0x514   :  { %v1120_v21 = vadd.f32 1e-05, %v1119_v51  ;;  %v1215_v61 = vpop.f32.mrf.mxu0 }
 0x515   :  { %v1289_v29 = vmul.f32 %v1215_v61, %v1215_v61 }
 0x516   :  { %4003 = vrsqrt.f32 %v1120_v21  ;;  %v3878_v42 = vpop.f32.mrf.mxu0 }
 0x518   :  { %v1285_v5 = vpop.f32.mrf.mxu1 }
 0x519   :  { %v1290_v19 = vsub.f32 %v1285_v5, %v1289_v29 }
 0x51a   :  { %v3883_v22 = vpop.f32.mrf.mxu1 }
 0x51b   :  { %v1291_v57 = vadd.f32 1e-05, %v1290_v19  ;;  %v1597_v22 = vld [vmem:[%s5899_s25] sm:$0xff] }
 0x51d   :  { %4005 = vrsqrt.f32 %v1291_v57 }
 0x523   :  { %v4004_v9 = vpop.eup %4003 }
 0x524   :  { %v1122_v37 = vmul.f32 %v4004_v9, %v965_v33 }
 0x526   :  { %1127 = vperm.xlu1 %3998, %v1122_v37   ;;  %v1123_v34 = vmul.f32 %v1122_v37, %v1044_v12 }
 0x528   :  { %v1124_v56 = vsub.f32 %v966_v4, %v1123_v34 }
 0x52a   :  { %v4006_v48 = vpop.eup %4005  ;;  %1134 = vperm.xlu1 %3998, %v1124_v56  }
 0x52b   :  { %v1293_v24 = vmul.f32 %v4006_v48, %v965_v33 }
 0x52d   :  { %1298 = vperm.xlu0 %3997, %v1293_v24   ;;  %v1294_v8 = vmul.f32 %v1293_v24, %v1215_v61 }
 0x52f   :  { %v1295_v51 = vsub.f32 %v966_v4, %v1294_v8 }
 0x531   :  { %1305 = vperm.xlu1 %3998, %v1295_v51  }
 0x5a1   :  { %v1128_v41 = vpop.permute.xlu1 %1127 }
 0x5a2   :  { %v1131_v21 = vmul.f32 %v1128_v41, %v4814_v3  ;;  %v1130_v42 = vmul.f32 %v1128_v41, %v4812_v0 }
 0x5a5   :  { %v1135_v29 = vpop.permute.xlu1 %1134 }
 0x5a6   :  { %v1138_v5 = vadd.f32 %v1135_v29, %v1131_v21  ;;  %v1137_v19 = vadd.f32 %v1135_v29, %v1130_v42 }
 0x5a8   :  { %v4849_v9 = vmax.f32 %v1138_v5, 0.0  ;;  %v4855_v48 = vmax.f32 %v1137_v19, 0.0  ;;  %v1299_v56 = vpop.permute.xlu0 %1298 }
 0x5a9   :  { %v1301_v37 = vmul.f32 %v1299_v56, %v4822_v18  ;;  %v1302_v3 = vmul.f32 %v1299_v56, %v4824_v1  ;;  %v1445_v1 = vld [vmem:[%s4224_s24] sm:$0xff]  ;;  %s5916_s24 = sld [smem:[#allocation18_spill]] }
 0x5aa   :  { %1431 = vrot.lane.b32.xlu0 %v4849_v9, %s4148_s17  ;;  %1415 = vrot.lane.b32.xlu1 %v4849_v9, %s4147_s13 }
 0x5ac   :  { %v1306_v4 = vpop.permute.xlu1 %1305 }
 0x5ad   :  { %v1308_v0 = vadd.f32 %v1306_v4, %v1301_v37  ;;  %v1309_v12 = vadd.f32 %v1306_v4, %v1302_v3 }
 0x5ae   :  { %1429 = vrot.lane.b32.xlu0 %v4855_v48, %s4148_s17  ;;  %1413 = vrot.lane.b32.xlu1 %v4855_v48, %s4147_s13 }
 0x5af   :  { %v4887_v61 = vmax.f32 %v1308_v0, 0.0  ;;  %v4893_v18 = vmax.f32 %v1309_v12, 0.0 }
 0x5b2   :  { %1399 = vrot.lane.b32.xlu0 %v4849_v9, %s4152_s7  ;;  %1397 = vrot.lane.b32.xlu1 %v4855_v48, %s4152_s7 }
 0x5b6   :  { %1383 = vrot.lane.b32.xlu0 %v4849_v9, %s4149_s21  ;;  %1381 = vrot.lane.b32.xlu1 %v4855_v48, %s4149_s21 }
 0x5ba   :  { %1363 = vrot.lane.b32.xlu0 %v4849_v9, %s4150_s30  ;;  %1361 = vrot.lane.b32.xlu1 %v4855_v48, %s4150_s30 }
 0x5be   :  { %1347 = vrot.lane.b32.xlu0 %v4849_v9, %s4151_s4  ;;  %1345 = vrot.lane.b32.xlu1 %v4855_v48, %s4151_s4 }
 0x5c2   :  { %1329 = vrot.lane.b32.xlu0 %v4855_v48, %s4153_s10  ;;  %1331 = vrot.lane.b32.xlu1 %v4849_v9, %s4153_s10 }
 0x5c6   :  { %1313 = vrot.lane.b32.xlu0 %v4855_v48, %s4154_s11  ;;  %1315 = vrot.lane.b32.xlu1 %v4849_v9, %s4154_s11 }
 0x5ca   :  { %1417 = vrot.lane.b32.xlu0 %v4887_v61, %s4147_s13  ;;  %1433 = vrot.lane.b32.xlu1 %v4887_v61, %s4148_s17 }
 0x5ce   :  { %1435 = vrot.lane.b32.xlu0 %v4893_v18, %s4148_s17  ;;  %1401 = vrot.lane.b32.xlu1 %v4887_v61, %s4152_s7 }
 0x5d2   :  { %1419 = vrot.lane.b32.xlu0 %v4893_v18, %s4147_s13  ;;  %1385 = vrot.lane.b32.xlu1 %v4887_v61, %s4149_s21 }
 0x5d6   :  { %1403 = vrot.lane.b32.xlu0 %v4893_v18, %s4152_s7  ;;  %1387 = vrot.lane.b32.xlu1 %v4893_v18, %s4149_s21 }
 0x5da   :  { %1367 = vrot.lane.b32.xlu0 %v4893_v18, %s4150_s30  ;;  %1351 = vrot.lane.b32.xlu1 %v4893_v18, %s4151_s4 }
 0x5de   :  { %1365 = vrot.lane.b32.xlu0 %v4887_v61, %s4150_s30  ;;  %1335 = vrot.lane.b32.xlu1 %v4893_v18, %s4153_s10 }
 0x5e2   :  { %1349 = vrot.lane.b32.xlu0 %v4887_v61, %s4151_s4  ;;  %1319 = vrot.lane.b32.xlu1 %v4893_v18, %s4154_s11 }
 0x5e6   :  { %1333 = vrot.lane.b32.xlu0 %v4887_v61, %s4153_s10  ;;  %1317 = vrot.lane.b32.xlu1 %v4887_v61, %s4154_s11 }
 0x5ea   :  { %1448 = vperm.xlu0 %3997, %v1445_v1   ;;  %1600 = vperm.xlu1 %3998, %v1597_v22  }
 0x61c   :  { %v1432_v57 = vpop.permute.xlu0 %1431  ;;  %v1416_v33 = vpop.permute.xlu1 %1415 }
 0x620   :  { %v1430_v34 = vpop.permute.xlu0 %1429  ;;  %v1414_v24 = vpop.permute.xlu1 %1413 }
 0x621   :  { %v1439_v3 = vsel %vm787_vm2, %v1430_v34, %v1432_v57  ;;  %v1423_v25 = vsel %vm754_vm3, %v1414_v24, %v1416_v33 }
 0x622   :  { %v1441_v23 = vmul.f32 %v4515_v31, %v1439_v3  ;;  %v1425_v63 = vmul.f32 %v1423_v25, %v4553_v46 }
 0x624   :  { %v1400_v8 = vpop.permute.xlu0 %1399  ;;  %v1398_v51 = vpop.permute.xlu1 %1397 }
 0x625   :  { %v1407_v40 = vsel %vm721_vm4, %v1398_v51, %v1400_v8 }
 0x626   :  { %v1409_v3 = vmul.f32 %v1407_v40, %v4557_v47 }
 0x628   :  { %v1384_v41 = vpop.permute.xlu0 %1383  ;;  %v1382_v21 = vpop.permute.xlu1 %1381 }
 0x629   :  { %v1391_v25 = vsel %vm688_vm6, %v1382_v21, %v1384_v41 }
 0x62c   :  { %v4925_v29 = vpop.permute.xlu0 %1363  ;;  %v4927_v42 = vpop.permute.xlu1 %1361 }
 0x630   :  { %v4929_v5 = vpop.permute.xlu0 %1347  ;;  %v4931_v19 = vpop.permute.xlu1 %1345 }
 0x634   :  { %v4933_v56 = vpop.permute.xlu0 %1329  ;;  %v4935_v4 = vpop.permute.xlu1 %1331 }
 0x638   :  { %v4937_v37 = vpop.permute.xlu0 %1313  ;;  %v4939_v0 = vpop.permute.xlu1 %1315 }
 0x63c   :  { %v1418_v12 = vpop.permute.xlu0 %1417  ;;  %v1434_v1 = vpop.permute.xlu1 %1433 }
 0x63d   :  { %v1422_v22 = vsel %vm754_vm3, %v1416_v33, %v1418_v12  ;;  %v1438_v26 = vsel %vm787_vm2, %v1432_v57, %v1434_v1 }
 0x63e   :  { %v1442_v7 = vmul.f32 %v4505_v28, %v1438_v26  ;;  %v1426_v50 = vmul.f32 %v1422_v22, %v4548_v44  ;;  %v1377_v22 = vmul.f32 %v4855_v48, %v4528_v36 }
 0x640   :  { %v1436_v45 = vpop.permute.xlu0 %1435  ;;  %1468 = vmatprep.subr.mxu0 %v1442_v7  ;;  %v1402_v11 = vpop.permute.xlu1 %1401 }
 0x641   :  { %v1437_v57 = vsel %vm787_vm2, %v1434_v1, %v1436_v45  ;;  %v1440_v33 = vsel %vm787_vm2, %v1436_v45, %v1430_v34  ;;  %v1406_v26 = vsel %vm721_vm4, %v1400_v8, %v1402_v11  ;;  %1469 = vmatpush1.msra.mxu0 %v1441_v23  ;;  %v1393_v8 = vmul.f32 %v1391_v25, %v4600_v17 }
 0x642   :  { %v1443_v28 = vmul.f32 %v4502_v27, %v1437_v57  ;;  %1470 = vmatprep.subr.mxu0 %v1426_v50  ;;  %v1444_v31 = vmul.f32 %v4472_v13, %v1440_v33  ;;  %v1410_v7 = vmul.f32 %v1406_v26, %v4570_v54  ;;  %v1371_v50 = vsel %vm635_vm8, %v4927_v42, %v4925_v29 }
 0x643   :  { %1471 = vmatpush1.msra.mxu0 %v1425_v63 }
 0x644   :  { %1539 = vmatprep.subr.mxu1 %v1444_v31  ;;  %v1420_v1 = vpop.permute.xlu0 %1419  ;;  %1472 = vmatprep.subr.mxu0 %v1410_v7  ;;  %v1386_v45 = vpop.permute.xlu1 %1385 }
 0x645   :  { %v1421_v23 = vsel %vm754_vm3, %v1418_v12, %v1420_v1  ;;  %v1424_v27 = vsel %vm754_vm3, %v1420_v1, %v1414_v24  ;;  %v1390_v13 = vsel %vm688_vm6, %v1384_v41, %v1386_v45  ;;  %1473 = vmatpush1.msra.mxu0 %v1409_v3  ;;  %1540 = vmatpush1.msra.mxu1 %v1443_v28 }
 0x646   :  { %v1427_v63 = vmul.f32 %v1421_v23, %v4544_v43  ;;  %v1394_v40 = vmul.f32 %v1390_v13, %v4594_v16  ;;  %v1428_v34 = vmul.f32 %v1424_v27, %v4524_v35  ;;  %v1378_v41 = vmul.f32 %v4849_v9, %v4512_v30 }
 0x647   :  { %v1374_v28 = vmul.f32 %v1371_v50, %v4629_v52  ;;  %v1339_v3 = vsel %vm569_vm5, %v4933_v56, %v4935_v4  ;;  %v1380_v27 = vmul.f32 %v4893_v18, %v4695_v15  ;;  %v1379_v50 = vmul.f32 %v4887_v61, %v4700_v20 }
 0x648   :  { %v1404_v12 = vpop.permute.xlu0 %1403  ;;  %1474 = vmatprep.subr.mxu0 %v1394_v40  ;;  %1541 = vmatprep.subr.mxu1 %v1428_v34  ;;  %v1388_v24 = vpop.permute.xlu1 %1387  ;;  %v1342_v34 = vmul.f32 %v1339_v3, %v4662_v2 }
 0x649   :  { %v1405_v57 = vsel %vm721_vm4, %v1402_v11, %v1404_v12  ;;  %v1408_v33 = vsel %vm721_vm4, %v1404_v12, %v1398_v51  ;;  %v1392_v26 = vsel %vm688_vm6, %v1388_v24, %v1382_v21  ;;  %1475 = vmatpush1.msra.mxu0 %v1393_v8  ;;  %v1389_v9 = vsel %vm688_vm6, %v1386_v45, %v1388_v24 }
 0x64a   :  { %v1411_v31 = vmul.f32 %v1405_v57, %v4625_v49  ;;  %1542 = vmatpush1.msra.mxu1 %v1427_v63  ;;  %1476 = vmatprep.subr.mxu0 %v1378_v41  ;;  %v1412_v48 = vmul.f32 %v1408_v33, %v4633_v62  ;;  %v1355_v11 = vsel %vm602_vm7, %v4931_v19, %v4929_v5 }
 0x64b   :  { %1477 = vmatpush1.msra.mxu0 %v1377_v22  ;;  %v1396_v7 = vmul.f32 %v1392_v26, %v4676_v38  ;;  %v1395_v25 = vmul.f32 %v1389_v9, %v4658_v14  ;;  %v1358_v13 = vmul.f32 %v1355_v11, %v4646_v55 }
 0x64c   :  { %v1368_v51 = vpop.permute.xlu0 %1367  ;;  %1478 = vmatprep.subr.mxu0 %v1374_v28  ;;  %1543 = vmatprep.subr.mxu1 %v1412_v48  ;;  %v1352_v21 = vpop.permute.xlu1 %1351  ;;  %v5902_v48 = vld [vmem:[#allocation33_spill] sm:$0xff] }
 0x64d   :  { %v1372_v1 = vsel %vm635_vm8, %v1368_v51, %v4927_v42  ;;  %v1356_v45 = vsel %vm602_vm7, %v1352_v21, %v4931_v19  ;;  %1544 = vmatpush1.msra.mxu1 %v1411_v31  ;;  %v1323_v42 = vsel %vm536_vm9, %v4937_v37, %v4939_v0  ;;  %v5901_v31 = vld [vmem:[#allocation34_spill] sm:$0xff] }
 0x64e   :  { %v1373_v23 = vmul.f32 %v1372_v1, %v4642_v53  ;;  %1545 = vmatprep.subr.mxu1 %v1396_v7  ;;  %v1357_v19 = vmul.f32 %v1356_v45, %v4654_v60  ;;  %v1326_v22 = vmul.f32 %v1323_v42, %v4731_v6  ;;  %v5906_v42 = vmov 0.0  }
 0x64f   :  { %1546 = vmatpush1.msra.mxu1 %v1395_v25  ;;  %v5904_v25 = vld [vmem:[#allocation35_spill] sm:$0xff] }
 0x650   :  { %v1366_v63 = vpop.permute.xlu0 %1365  ;;  %1479 = vmatpush1.msra.mxu0 %v1373_v23  ;;  %1547 = vmatprep.subr.mxu1 %v1380_v27  ;;  %v1336_v40 = vpop.permute.xlu1 %1335  ;;  %v4015_v23 = vld [vmem:[%s4169_s5 + $0x8] sm:$0xff]  ;;  %v5905_v27 = vld [vmem:[#allocation36_spill] sm:$0xff] }
 0x651   :  { %v1369_v18 = vsel %vm635_vm8, %v1366_v63, %v1368_v51  ;;  %v1370_v61 = vsel %vm635_vm8, %v4925_v29, %v1366_v63  ;;  %v1340_v8 = vsel %vm569_vm5, %v1336_v40, %v4933_v56  ;;  %1480 = vmatprep.subr.mxu0 %v1358_v13  ;;  %1548 = vmatpush1.msra.mxu1 %v1379_v50  ;;  %v1312_v51 = vld [vmem:[%s5900_s29] sm:$0xff] }
 0x652   :  { %v1375_v12 = vmul.f32 %v1370_v61, %v4722_v32  ;;  %v1341_v24 = vmul.f32 %v1340_v8, %v4718_v39  ;;  %1481 = vmatpush1.msra.mxu0 %v1357_v19  ;;  %v1376_v41 = vmul.f32 %v1369_v18, %v4704_v59  ;;  %v1596_v50 = vld [vmem:[%s5903_s3] sm:$0xff]  ;;  %v4018_v18 = vld [vmem:[%s4169_s5 + $0x10] sm:$0xff] }
 0x653   :  { %1482 = vmatprep.subr.mxu0 %v1342_v34  ;;  %v5907_v19 = vld [vmem:[#allocation38_spill] sm:$0xff] }
 0x654   :  { %v1350_v57 = vpop.permute.xlu0 %1349  ;;  %1483 = vmatpush1.msra.mxu0 %v1341_v24  ;;  %1549 = vmatprep.subr.mxu1 %v1376_v41  ;;  %v1320_v29 = vpop.permute.xlu1 %1319 }
 0x655   :  { %v1353_v56 = vsel %vm602_vm7, %v1350_v57, %v1352_v21  ;;  %v1354_v33 = vsel %vm602_vm7, %v4929_v5, %v1350_v57  ;;  %v1324_v26 = vsel %vm536_vm9, %v1320_v29, %v4937_v37  ;;  %1484 = vmatprep.subr.mxu0 %v1326_v22  ;;  %1550 = vmatpush1.msra.mxu1 %v1375_v12 }
 0x656   :  { %v1359_v28 = vmul.f32 %v1354_v33, %v4746_v58  ;;  %v1325_v9 = vmul.f32 %v1324_v26, %v5901_v31  ;;  %v1360_v11 = vmul.f32 %v1353_v56, %v5902_v48 }
 0x658   :  { %v1334_v21 = vpop.permute.xlu0 %1333  ;;  %1485 = vmatpush1.msra.mxu0 %v1325_v9  ;;  %1551 = vmatprep.subr.mxu1 %v1360_v11  ;;  %v1318_v5 = vpop.permute.xlu1 %1317 }
 0x659   :  { %v1337_v7 = vsel %vm569_vm5, %v1334_v21, %v1336_v40  ;;  %v1338_v37 = vsel %vm569_vm5, %v4935_v4, %v1334_v21  ;;  %v1321_v3 = vsel %vm536_vm9, %v1318_v5, %v1320_v29  ;;  %3712 = vmatmul.mubr.msk.f32.vlgmr.msra.gmra.mxu0 %vm818_vm10, %v1312_v51  ;;  %v1322_v45 = vsel %vm536_vm9, %v4939_v0, %v1318_v5  ;;  %v4016_v4 = vld [vmem:[%s4169_s5] sm:$0xff]  ;;  %v5908_v40 = vld [vmem:[#allocation37_spill] sm:$0xff] }
 0x65a   :  { %v1343_v1 = vmul.f32 %v1338_v37, %v5904_v25  ;;  %1552 = vmatpush1.msra.mxu1 %v1359_v28  ;;  %1636 = vmatprep.subr.mxu0 %v4015_v23  ;;  %v1344_v13 = vmul.f32 %v1337_v7, %v5905_v27  ;;  %v1328_v63 = vmul.f32 %v1321_v3, %v5907_v19  ;;  %v4017_v0 = vld [vmem:[%s4169_s5 + $0x18] sm:$0xff]  ;;  %s5911_s5 = sld [smem:[#allocation15_spill]] }
 0x65b   :  { %1637 = vmatpush1.msra.mxu0 %v4016_v4  ;;  %1670 = vmatprep.mubr.f32.mxu0 %v5906_v42  ;;  %v1327_v34 = vmul.f32 %v1322_v45, %v5908_v40 }
 0x65c   :  { %1553 = vmatprep.subr.mxu1 %v1344_v13  ;;  %3884 = vmatprep.subr.mxu0 %v5906_v42 }
 0x65d   :  { %1554 = vmatpush1.msra.mxu1 %v1343_v1  ;;  %3714 = vmatmul.mubr.msk.f32.vlgmr.msra.gmra.mxu0 %vm187_vm1, %v1596_v50 }
 0x65e   :  { %1555 = vmatprep.subr.mxu1 %v1328_v63  ;;  %3886 = vmatprep.mubr.msk.f32.mxu0 %vm4145_vm0, %v5906_v42 }
 0x65f   :  { %1556 = vmatpush1.msra.mxu1 %v1327_v34 }
 0x660   :  { %3713 = vmatmul.mubr.msk.f32.vlgmr.msra.gmra.mxu1 %vm818_vm10, %v1312_v51  ;;  %1707 = vmatprep.subr.mxu1 %v4017_v0 }
 0x661   :  { %1708 = vmatpush1.msra.mxu1 %v4018_v18  ;;  %1741 = vmatprep.mubr.f32.mxu1 %v5906_v42 }
 0x662   :  { %3889 = vmatprep.subr.mxu1 %v5906_v42 }
 0x664   :  { %3715 = vmatmul.mubr.msk.f32.vlgmr.msra.gmra.mxu1 %vm187_vm1, %v1596_v50 }
 0x665   :  { %3891 = vmatprep.mubr.msk.f32.mxu1 %vm4145_vm0, %v5906_v42  ;;  %v1449_v12 = vpop.permute.xlu0 %1448  ;;  %v1601_v24 = vpop.permute.xlu1 %1600 }
 0x719   :  { %v1520_v61 = vpop.f32.mrf.mxu0 }
 0x71a   :  { %v1521_v22 = vadd.f32 %v1520_v61, %v1449_v12  ;;  %v1752_v61 = vld [vmem:[%s5911_s5] sm:$0xff] }
 0x71b   :  { %v1522_v8 = vpop.f32.mrf.mxu0 }
 0x71c   :  { %v1523_v56 = vadd.f32 %v1522_v8, %v1449_v12 }
 0x71d   :  { %v1672_v41 = vpop.f32.mrf.mxu0 }
 0x71e   :  { %v1673_v57 = vadd.f32 %v1672_v41, %v1601_v24 }
 0x71f   :  { %v1674_v29 = vpop.f32.mrf.mxu0 }
 0x720   :  { %v5079_v33 = vadd.f32 %v1673_v57, %v1521_v22  ;;  %v1675_v26 = vadd.f32 %v1674_v29, %v1601_v24  ;;  %v1591_v28 = vpop.f32.mrf.mxu1 }
 0x721   :  { %v1592_v45 = vadd.f32 %v1591_v28, %v1449_v12 }
 0x722   :  { %5909 = vst [vmem:[#allocation33_spill] sm:$0xff] %v5079_v33  ;;  %v5081_v9 = vadd.f32 %v1675_v26, %v1523_v56  ;;  %v1593_v11 = vpop.f32.mrf.mxu1  ;;  %v1758_v5 = vmul.f32 %v5079_v33, %v5079_v33 }
 0x723   :  { %v1594_v23 = vadd.f32 %v1593_v11, %v1449_v12 }
 0x724   :  { %5910 = vst [vmem:[#allocation35_spill] sm:$0xff] %v5081_v9  ;;  %v1743_v51 = vpop.f32.mrf.mxu1  ;;  %v1755_v21 = vadd.f32 %v5081_v9, %v5079_v33  ;;  %v1759_v7 = vmul.f32 %v5081_v9, %v5081_v9 }
 0x725   :  { %v1744_v37 = vadd.f32 %v1743_v51, %v1601_v24 }
 0x726   :  { %1756 = vadd.xlane.f32.xlu0 %v1755_v21  ;;  %v1745_v3 = vpop.f32.mrf.mxu1  ;;  %v1760_v1 = vadd.f32 %v1759_v7, %v1758_v5 }
 0x727   :  { %v1746_v13 = vadd.f32 %v1745_v3, %v1601_v24  ;;  %v5089_v50 = vadd.f32 %v1744_v37, %v1592_v45  ;;  %v1753_v45 = vld [vmem:[%s5914_s8] sm:$0xff] }
 0x728   :  { %1761 = vadd.xlane.f32.xlu1 %v1760_v1 }
 0x729   :  { %5912 = vst [vmem:[#allocation39_spill] sm:$0xff] %v5089_v50  ;;  %v5091_v4 = vadd.f32 %v1746_v13, %v1594_v23  ;;  %v1932_v0 = vmul.f32 %v5089_v50, %v5089_v50 }
 0x72b   :  { %5913 = vst [vmem:[#allocation40_spill] sm:$0xff] %v5091_v4  ;;  %v1929_v63 = vadd.f32 %v5091_v4, %v5089_v50  ;;  %v1933_v34 = vmul.f32 %v5091_v4, %v5091_v4 }
 0x72d   :  { %1930 = vadd.xlane.f32.xlu0 %v1929_v63  ;;  %v1934_v18 = vadd.f32 %v1933_v34, %v1932_v0  ;;  %v1754_v63 = vld [vmem:[%s5915_s14] sm:$0xff] }
 0x731   :  { %1935 = vadd.xlane.f32.xlu0 %v1934_v18 }
 0x7af   :  { %v1757_v8 = vpop.xlane.xlu0 %1756 }
 0x7b0   :  { %3885 = vmatpush3.msra.mxu0 %v1757_v8 }
 0x7b1   :  { %v1762_v12 = vpop.xlane.xlu1 %1761  ;;  %3887 = vmatmul.mubr.msk.f32.vlgmr.msra.gmra.mxu0 %vm187_vm1, %v1752_v61  ;;  %3894 = vmatprep.subr.mxu0 %v5906_v42 }
 0x7b2   :  { %3890 = vmatpush3.msra.mxu1 %v1762_v12  ;;  %3896 = vmatprep.mubr.msk.f32.mxu0 %vm4145_vm0, %v5906_v42 }
 0x7b3   :  { %3892 = vmatmul.mubr.msk.f32.vlgmr.msra.gmra.mxu1 %vm187_vm1, %v1752_v61  ;;  %3899 = vmatprep.subr.mxu1 %v5906_v42 }
 0x7b4   :  { %3901 = vmatprep.mubr.msk.f32.mxu1 %vm4145_vm0, %v5906_v42 }
 0x7b6   :  { %v1931_v24 = vpop.xlane.xlu0 %1930 }
 0x7b7   :  { %3895 = vmatpush3.msra.mxu0 %v1931_v24 }
 0x7b8   :  { %3897 = vmatmul.mubr.msk.f32.vlgmr.msra.gmra.mxu0 %vm187_vm1, %v1752_v61 }
 0x7b9   :  { %2306 = vmatprep.mubr.f32.mxu0 %v5906_v42 }
 0x7ba   :  { %v1936_v41 = vpop.xlane.xlu0 %1935 }
 0x7bb   :  { %3900 = vmatpush3.msra.mxu1 %v1936_v41 }
 0x7bc   :  { %3902 = vmatmul.mubr.msk.f32.vlgmr.msra.gmra.mxu1 %vm187_vm1, %v1752_v61 }
 0x7bd   :  { %2377 = vmatprep.mubr.f32.mxu1 %v5906_v42 }
 0x871   :  { %v1832_v22 = vpop.f32.mrf.mxu0 }
 0x872   :  { %v1906_v57 = vmul.f32 %v1832_v22, %v1832_v22 }
 0x873   :  { %v3888_v29 = vpop.f32.mrf.mxu0  ;;  %v1902_v56 = vpop.f32.mrf.mxu1 }
 0x874   :  { %v1907_v26 = vsub.f32 %v1902_v56, %v1906_v57 }
 0x875   :  { %v3893_v28 = vpop.f32.mrf.mxu1 }
 0x876   :  { %v1908_v11 = vadd.f32 1e-05, %v1907_v26 }
 0x878   :  { %4007 = vrsqrt.f32 %v1908_v11  ;;  %v2003_v51 = vpop.f32.mrf.mxu0 }
 0x879   :  { %v2077_v21 = vmul.f32 %v2003_v51, %v2003_v51 }
 0x87a   :  { %v3898_v5 = vpop.f32.mrf.mxu0 }
 0x87c   :  { %v2073_v7 = vpop.f32.mrf.mxu1 }
 0x87d   :  { %v2078_v37 = vsub.f32 %v2073_v7, %v2077_v21 }
 0x87e   :  { %v3903_v3 = vpop.f32.mrf.mxu1 }
 0x87f   :  { %v2079_v1 = vadd.f32 1e-05, %v2078_v37 }
 0x881   :  { %4009 = vrsqrt.f32 %v2079_v1 }
 0x885   :  { %v4008_v23 = vpop.eup %4007 }
 0x886   :  { %v1910_v13 = vmul.f32 %v4008_v23, %v1753_v45 }
 0x888   :  { %1915 = vperm.xlu1 %3998, %v1910_v13   ;;  %v1911_v34 = vmul.f32 %v1910_v13, %v1832_v22 }
 0x88a   :  { %v1912_v0 = vsub.f32 %v1754_v63, %v1911_v34 }
 0x88c   :  { %1922 = vperm.xlu1 %3998, %v1912_v0  }
 0x88e   :  { %v4010_v18 = vpop.eup %4009 }
 0x88f   :  { %v2081_v61 = vmul.f32 %v4010_v18, %v1753_v45  ;;  %v2233_v45 = vld [vmem:[%s5916_s24] sm:$0xff] }
 0x891   :  { %2086 = vperm.xlu0 %3997, %v2081_v61   ;;  %v2082_v8 = vmul.f32 %v2081_v61, %v2003_v51 }
 0x893   :  { %v2083_v12 = vsub.f32 %v1754_v63, %v2082_v8 }
 0x895   :  { %2093 = vperm.xlu1 %3998, %v2083_v12  }
 0x903   :  { %v1916_v24 = vpop.permute.xlu1 %1915 }
 0x904   :  { %v1919_v41 = vmul.f32 %v1916_v24, %v5081_v9  ;;  %v1918_v29 = vmul.f32 %v1916_v24, %v5079_v33 }
 0x907   :  { %v1923_v57 = vpop.permute.xlu1 %1922 }
 0x908   :  { %v1926_v56 = vadd.f32 %v1923_v57, %v1919_v41  ;;  %v1925_v26 = vadd.f32 %v1923_v57, %v1918_v29 }
 0x90a   :  { %v5116_v28 = vmax.f32 %v1926_v56, 0.0  ;;  %v5122_v22 = vmax.f32 %v1925_v26, 0.0 }
 0x90c   :  { %2219 = vrot.lane.b32.xlu0 %v5116_v28, %s4148_s17  ;;  %2203 = vrot.lane.b32.xlu1 %v5116_v28, %s4147_s13  ;;  %v2087_v11 = vpop.permute.xlu0 %2086 }
 0x90d   :  { %v2089_v21 = vmul.f32 %v2087_v11, %v5089_v50  ;;  %v2090_v7 = vmul.f32 %v2087_v11, %v5091_v4  ;;  %v5216_v4 = vld [vmem:[%s4174_s9 + $0x28] ss:$0 sm:$0xff]  ;;  %v5220_v50 = vld [vmem:[%s4174_s9 + $0x20] ss:$0 sm:$0xff] }
 0x90e   :  { %5917 = vst [vmem:[#allocation41_spill] sm:$0xff] %v5216_v4  ;;  %5918 = vst [vmem:[#allocation42_spill] sm:$0xff] %v5220_v50 }
 0x910   :  { %2217 = vrot.lane.b32.xlu0 %v5122_v22, %s4148_s17  ;;  %2201 = vrot.lane.b32.xlu1 %v5122_v22, %s4147_s13  ;;  %v2094_v51 = vpop.permute.xlu1 %2093 }
 0x911   :  { %v2096_v5 = vadd.f32 %v2094_v51, %v2089_v21  ;;  %v2097_v37 = vadd.f32 %v2094_v51, %v2090_v7 }
 0x913   :  { %v5154_v3 = vmax.f32 %v2096_v5, 0.0  ;;  %v5160_v1 = vmax.f32 %v2097_v37, 0.0 }
 0x914   :  { %2187 = vrot.lane.b32.xlu0 %v5116_v28, %s4152_s7  ;;  %2185 = vrot.lane.b32.xlu1 %v5122_v22, %s4152_s7 }
 0x918   :  { %2171 = vrot.lane.b32.xlu0 %v5116_v28, %s4149_s21  ;;  %2169 = vrot.lane.b32.xlu1 %v5122_v22, %s4149_s21 }
 0x91c   :  { %2151 = vrot.lane.b32.xlu0 %v5116_v28, %s4150_s30  ;;  %2149 = vrot.lane.b32.xlu1 %v5122_v22, %s4150_s30 }
 0x920   :  { %2135 = vrot.lane.b32.xlu0 %v5116_v28, %s4151_s4  ;;  %2133 = vrot.lane.b32.xlu1 %v5122_v22, %s4151_s4 }
 0x924   :  { %2117 = vrot.lane.b32.xlu0 %v5122_v22, %s4153_s10  ;;  %2119 = vrot.lane.b32.xlu1 %v5116_v28, %s4153_s10 }
 0x928   :  { %2101 = vrot.lane.b32.xlu0 %v5122_v22, %s4154_s11  ;;  %2103 = vrot.lane.b32.xlu1 %v5116_v28, %s4154_s11 }
 0x92c   :  { %2205 = vrot.lane.b32.xlu0 %v5154_v3, %s4147_s13  ;;  %2221 = vrot.lane.b32.xlu1 %v5154_v3, %s4148_s17 }
 0x930   :  { %2223 = vrot.lane.b32.xlu0 %v5160_v1, %s4148_s17  ;;  %2189 = vrot.lane.b32.xlu1 %v5154_v3, %s4152_s7 }
 0x934   :  { %2207 = vrot.lane.b32.xlu0 %v5160_v1, %s4147_s13  ;;  %2173 = vrot.lane.b32.xlu1 %v5154_v3, %s4149_s21 }
 0x938   :  { %2191 = vrot.lane.b32.xlu0 %v5160_v1, %s4152_s7  ;;  %2175 = vrot.lane.b32.xlu1 %v5160_v1, %s4149_s21 }
 0x93c   :  { %2155 = vrot.lane.b32.xlu0 %v5160_v1, %s4150_s30  ;;  %2139 = vrot.lane.b32.xlu1 %v5160_v1, %s4151_s4 }
 0x940   :  { %2153 = vrot.lane.b32.xlu0 %v5154_v3, %s4150_s30  ;;  %2123 = vrot.lane.b32.xlu1 %v5160_v1, %s4153_s10 }
 0x944   :  { %2137 = vrot.lane.b32.xlu0 %v5154_v3, %s4151_s4  ;;  %2107 = vrot.lane.b32.xlu1 %v5160_v1, %s4154_s11 }
 0x948   :  { %2121 = vrot.lane.b32.xlu0 %v5154_v3, %s4153_s10  ;;  %2105 = vrot.lane.b32.xlu1 %v5154_v3, %s4154_s11 }
 0x94c   :  { %2236 = vperm.xlu0 %3997, %v2233_v45  }
 0x97e   :  { %v2220_v23 = vpop.permute.xlu0 %2219  ;;  %v2204_v13 = vpop.permute.xlu1 %2203 }
 0x982   :  { %v2218_v63 = vpop.permute.xlu0 %2217  ;;  %v2202_v34 = vpop.permute.xlu1 %2201 }
 0x983   :  { %v2227_v51 = vsel %vm787_vm2, %v2218_v63, %v2220_v23  ;;  %v2211_v45 = vsel %vm754_vm3, %v2202_v34, %v2204_v13 }
 0x984   :  { %v2229_v33 = vmul.f32 %v5220_v50, %v2227_v51  ;;  %v2213_v27 = vmul.f32 %v2211_v45, %v4553_v46  ;;  %v5234_v51 = vld [vmem:[%s4174_s9 + $0x30] ss:$0 sm:$0xff] }
 0x986   :  { %v2188_v0 = vpop.permute.xlu0 %2187  ;;  %v2186_v18 = vpop.permute.xlu1 %2185 }
 0x987   :  { %v2195_v40 = vsel %vm721_vm4, %v2186_v18, %v2188_v0 }
 0x98a   :  { %v2172_v61 = vpop.permute.xlu0 %2171  ;;  %v2170_v8 = vpop.permute.xlu1 %2169 }
 0x98e   :  { %v5191_v12 = vpop.permute.xlu0 %2151  ;;  %v5193_v24 = vpop.permute.xlu1 %2149 }
 0x992   :  { %v5195_v41 = vpop.permute.xlu0 %2135  ;;  %v5197_v57 = vpop.permute.xlu1 %2133 }
 0x996   :  { %v5199_v29 = vpop.permute.xlu0 %2117  ;;  %v5201_v56 = vpop.permute.xlu1 %2119 }
 0x99a   :  { %v5203_v26 = vpop.permute.xlu0 %2101  ;;  %v5205_v11 = vpop.permute.xlu1 %2103 }
 0x99e   :  { %v2206_v21 = vpop.permute.xlu0 %2205  ;;  %v2222_v5 = vpop.permute.xlu1 %2221 }
 0x99f   :  { %v2210_v7 = vsel %vm754_vm3, %v2204_v13, %v2206_v21  ;;  %v2226_v37 = vsel %vm787_vm2, %v2220_v23, %v2222_v5 }
 0x9a0   :  { %v2230_v9 = vmul.f32 %v5216_v4, %v2226_v37  ;;  %v2214_v23 = vmul.f32 %v2210_v7, %v4548_v44 }
 0x9a2   :  { %v2224_v19 = vpop.permute.xlu0 %2223  ;;  %2256 = vmatprep.subr.mxu0 %v2230_v9  ;;  %v2190_v42 = vpop.permute.xlu1 %2189  ;;  %v5238_v9 = vld [vmem:[%s4174_s9 + $0x38] ss:$0 sm:$0xff]  ;;  %s5923_s9 = sld [smem:[#allocation19_spill]] }
 0x9a3   :  { %v2225_v13 = vsel %vm787_vm2, %v2222_v5, %v2224_v19  ;;  %v2228_v37 = vsel %vm787_vm2, %v2224_v19, %v2218_v63  ;;  %v2194_v4 = vsel %vm721_vm4, %v2188_v0, %v2190_v42  ;;  %2257 = vmatpush1.msra.mxu0 %v2229_v33  ;;  %v2197_v5 = vmul.f32 %v2195_v40, %v4557_v47 }
 0x9a4   :  { %v2231_v50 = vmul.f32 %v5234_v51, %v2225_v13  ;;  %v2232_v7 = vmul.f32 %v5238_v9, %v2228_v37  ;;  %v2198_v45 = vmul.f32 %v2194_v4, %v4570_v54  ;;  %2258 = vmatprep.subr.mxu0 %v2214_v23  ;;  %v2179_v19 = vsel %vm688_vm6, %v2170_v8, %v2172_v61 }
 0x9a5   :  { %2259 = vmatpush1.msra.mxu0 %v2213_v27  ;;  %v2181_v37 = vmul.f32 %v2179_v19, %v4600_v17 }
 0x9a6   :  { %2327 = vmatprep.subr.mxu1 %v2232_v7  ;;  %v2208_v63 = vpop.permute.xlu0 %2207  ;;  %2260 = vmatprep.subr.mxu0 %v2198_v45  ;;  %v2174_v33 = vpop.permute.xlu1 %2173 }
 0x9a7   :  { %v2209_v0 = vsel %vm754_vm3, %v2206_v21, %v2208_v63  ;;  %v2212_v13 = vsel %vm754_vm3, %v2208_v63, %v2202_v34  ;;  %v2178_v4 = vsel %vm688_vm6, %v2172_v61, %v2174_v33  ;;  %2261 = vmatpush1.msra.mxu0 %v2197_v5  ;;  %2328 = vmatpush1.msra.mxu1 %v2231_v50 }
 0x9a8   :  { %v2215_v27 = vmul.f32 %v2209_v0, %v4544_v43  ;;  %v2216_v40 = vmul.f32 %v2212_v13, %v4524_v35  ;;  %v2182_v23 = vmul.f32 %v2178_v4, %v4594_v16  ;;  %v2159_v21 = vsel %vm635_vm8, %v5193_v24, %v5191_v12 }
 0x9a9   :  { %v2166_v5 = vmul.f32 %v5116_v28, %v4512_v30  ;;  %v2127_v28 = vsel %vm569_vm5, %v5199_v29, %v5201_v56 }
 0x9aa   :  { %v2192_v7 = vpop.permute.xlu0 %2191  ;;  %2262 = vmatprep.subr.mxu0 %v2182_v23  ;;  %2329 = vmatprep.subr.mxu1 %v2216_v40  ;;  %v2176_v34 = vpop.permute.xlu1 %2175 }
 0x9ab   :  { %v2193_v50 = vsel %vm721_vm4, %v2190_v42, %v2192_v7  ;;  %v2196_v61 = vsel %vm721_vm4, %v2192_v7, %v2186_v18  ;;  %v2180_v45 = vsel %vm688_vm6, %v2176_v34, %v2170_v8  ;;  %2263 = vmatpush1.msra.mxu0 %v2181_v37  ;;  %v2177_v0 = vsel %vm688_vm6, %v2174_v33, %v2176_v34 }
 0x9ac   :  { %v2199_v19 = vmul.f32 %v2193_v50, %v4625_v49  ;;  %v2200_v63 = vmul.f32 %v2196_v61, %v4633_v62  ;;  %2330 = vmatpush1.msra.mxu1 %v2215_v27  ;;  %v2165_v42 = vmul.f32 %v5122_v22, %v4528_v36  ;;  %2264 = vmatprep.subr.mxu0 %v2166_v5 }
 0x9ad   :  { %v2162_v18 = vmul.f32 %v2159_v21, %v4629_v52  ;;  %v2143_v8 = vsel %vm602_vm7, %v5197_v57, %v5195_v41  ;;  %v2184_v13 = vmul.f32 %v2180_v45, %v4676_v38  ;;  %v2183_v22 = vmul.f32 %v2177_v0, %v4658_v14 }
 0x9ae   :  { %2265 = vmatpush1.msra.mxu0 %v2165_v42  ;;  %v2156_v33 = vpop.permute.xlu0 %2155  ;;  %2331 = vmatprep.subr.mxu1 %v2200_v63  ;;  %v2140_v4 = vpop.permute.xlu1 %2139  ;;  %v2168_v37 = vmul.f32 %v5160_v1, %v4695_v15  ;;  %v2146_v21 = vmul.f32 %v2143_v8, %v4646_v55  ;;  %v2167_v7 = vmul.f32 %v5154_v3, %v4700_v20 }
 0x9af   :  { %v2160_v27 = vsel %vm635_vm8, %v2156_v33, %v5193_v24  ;;  %2266 = vmatprep.subr.mxu0 %v2162_v18  ;;  %v2144_v40 = vsel %vm602_vm7, %v2140_v4, %v5197_v57  ;;  %2332 = vmatpush1.msra.mxu1 %v2199_v19  ;;  %v2111_v24 = vsel %vm536_vm9, %v5203_v26, %v5205_v11 }
 0x9b0   :  { %v2161_v23 = vmul.f32 %v2160_v27, %v4642_v53  ;;  %2333 = vmatprep.subr.mxu1 %v2184_v13  ;;  %v2145_v57 = vmul.f32 %v2144_v40, %v4654_v60  ;;  %v2130_v61 = vmul.f32 %v2127_v28, %v4662_v2  ;;  %v2114_v0 = vmul.f32 %v2111_v24, %v4731_v6 }
 0x9b1   :  { %2334 = vmatpush1.msra.mxu1 %v2183_v22  ;;  %v2100_v22 = vld [vmem:[#allocation2] sm:$0xff]  ;;  %v5920_v24 = vmov 0.0  }
 0x9b2   :  { %v2154_v34 = vpop.permute.xlu0 %2153  ;;  %2267 = vmatpush1.msra.mxu0 %v2161_v23  ;;  %2335 = vmatprep.subr.mxu1 %v2168_v37  ;;  %v2124_v50 = vpop.permute.xlu1 %2123  ;;  %v5919_v37 = vld [vmem:[#allocation36_spill] sm:$0xff] }
 0x9b3   :  { %v2157_v1 = vsel %vm635_vm8, %v2154_v34, %v2156_v33  ;;  %v2158_v3 = vsel %vm635_vm8, %v5191_v12, %v2154_v34  ;;  %v2128_v45 = vsel %vm569_vm5, %v2124_v50, %v5199_v29  ;;  %2268 = vmatprep.subr.mxu0 %v2146_v21  ;;  %2336 = vmatpush1.msra.mxu1 %v2167_v7  ;;  %v5922_v34 = vld [vmem:[#allocation37_spill] sm:$0xff] }
 0x9b4   :  { %v2163_v5 = vmul.f32 %v2158_v3, %v4722_v32  ;;  %v2164_v19 = vmul.f32 %v2157_v1, %v4704_v59  ;;  %v2129_v63 = vmul.f32 %v2128_v45, %v4718_v39  ;;  %2269 = vmatpush1.msra.mxu0 %v2145_v57 }
 0x9b5   :  { %2270 = vmatprep.subr.mxu0 %v2130_v61 }
 0x9b6   :  { %v2138_v42 = vpop.permute.xlu0 %2137  ;;  %2271 = vmatpush1.msra.mxu0 %v2129_v63  ;;  %2337 = vmatprep.subr.mxu1 %v2164_v19  ;;  %v2108_v12 = vpop.permute.xlu1 %2107 }
 0x9b7   :  { %v2141_v18 = vsel %vm602_vm7, %v2138_v42, %v2140_v4  ;;  %v2142_v29 = vsel %vm602_vm7, %v5195_v41, %v2138_v42  ;;  %v2112_v8 = vsel %vm536_vm9, %v2108_v12, %v5203_v26  ;;  %2272 = vmatprep.subr.mxu0 %v2114_v0  ;;  %2338 = vmatpush1.msra.mxu1 %v2163_v5 }
 0x9b8   :  { %v2147_v28 = vmul.f32 %v2142_v29, %v4746_v58  ;;  %v2148_v13 = vmul.f32 %v2141_v18, %v5902_v48  ;;  %v2113_v33 = vmul.f32 %v2112_v8, %v5901_v31 }
 0x9ba   :  { %v2122_v27 = vpop.permute.xlu0 %2121  ;;  %2273 = vmatpush1.msra.mxu0 %v2113_v33  ;;  %2339 = vmatprep.subr.mxu1 %v2148_v13  ;;  %v2106_v4 = vpop.permute.xlu1 %2105 }
 0x9bb   :  { %v2125_v41 = vsel %vm569_vm5, %v2122_v27, %v2124_v50  ;;  %v2126_v26 = vsel %vm569_vm5, %v5201_v56, %v2122_v27  ;;  %v2109_v40 = vsel %vm536_vm9, %v2106_v4, %v2108_v12  ;;  %3720 = vmatmul.mubr.msk.f32.vlgmr.msra.gmra.mxu0 %vm818_vm10, %v2100_v22  ;;  %v2110_v7 = vsel %vm536_vm9, %v5205_v11, %v2106_v4  ;;  %v5921_v56 = vld [vmem:[#allocation38_spill] sm:$0xff] }
 0x9bc   :  { %v2131_v23 = vmul.f32 %v2126_v26, %v5904_v25  ;;  %v2132_v21 = vmul.f32 %v2125_v41, %v5919_v37  ;;  %2340 = vmatpush1.msra.mxu1 %v2147_v28  ;;  %3904 = vmatprep.subr.mxu0 %v5920_v24  ;;  %v2116_v57 = vmul.f32 %v2109_v40, %v5921_v56 }
 0x9bd   :  { %3906 = vmatprep.mubr.msk.f32.mxu0 %vm4145_vm0, %v5920_v24  ;;  %v2115_v50 = vmul.f32 %v2110_v7, %v5922_v34 }
 0x9be   :  { %2341 = vmatprep.subr.mxu1 %v2132_v21 }
 0x9bf   :  { %2342 = vmatpush1.msra.mxu1 %v2131_v23 }
 0x9c0   :  { %2343 = vmatprep.subr.mxu1 %v2116_v57 }
 0x9c1   :  { %2344 = vmatpush1.msra.mxu1 %v2115_v50 }
 0x9c2   :  { %3721 = vmatmul.mubr.msk.f32.vlgmr.msra.gmra.mxu1 %vm818_vm10, %v2100_v22  ;;  %3909 = vmatprep.subr.mxu1 %v5920_v24  ;;  %v2384_v22 = vld [vmem:[%s5923_s9] sm:$0xff] }
 0x9c3   :  { %3911 = vmatprep.mubr.msk.f32.mxu1 %vm4145_vm0, %v5920_v24 }
 0x9c7   :  { %v2237_v11 = vpop.permute.xlu0 %2236 }
 0xa7b   :  { %v2308_v61 = vpop.f32.mrf.mxu0 }
 0xa7c   :  { %v5347_v1 = vadd.f32 %v2308_v61, %v2237_v11 }
 0xa7d   :  { %v2310_v3 = vpop.f32.mrf.mxu0 }
 0xa7e   :  { %v5349_v45 = vadd.f32 %v2310_v3, %v2237_v11  ;;  %v2390_v5 = vmul.f32 %v5347_v1, %v5347_v1 }
 0xa80   :  { %v2391_v19 = vmul.f32 %v5349_v45, %v5349_v45  ;;  %v2387_v63 = vadd.f32 %v5349_v45, %v5347_v1 }
 0xa82   :  { %2388 = vadd.xlane.f32.xlu1 %v2387_v63  ;;  %v2379_v0 = vpop.f32.mrf.mxu1  ;;  %v2392_v42 = vadd.f32 %v2391_v19, %v2390_v5 }
 0xa83   :  { %v5357_v12 = vadd.f32 %v2379_v0, %v2237_v11 }
 0xa84   :  { %2393 = vadd.xlane.f32.xlu0 %v2392_v42  ;;  %v2381_v18 = vpop.f32.mrf.mxu1 }
 0xa85   :  { %v5359_v29 = vadd.f32 %v2381_v18, %v2237_v11  ;;  %v2564_v8 = vmul.f32 %v5357_v12, %v5357_v12  ;;  %v2385_v18 = vld [vmem:[%s5924_s15] sm:$0xff] }
 0xa87   :  { %v2565_v28 = vmul.f32 %v5359_v29, %v5359_v29  ;;  %v2561_v13 = vadd.f32 %v5359_v29, %v5357_v12 }
 0xa89   :  { %2562 = vadd.xlane.f32.xlu0 %v2561_v13  ;;  %v2566_v33 = vadd.f32 %v2565_v28, %v2564_v8 }
 0xa8b   :  { %2567 = vadd.xlane.f32.xlu1 %v2566_v33 }
 0xb0b   :  { %v2389_v27 = vpop.xlane.xlu1 %2388 }
 0xb0c   :  { %3905 = vmatpush3.msra.mxu0 %v2389_v27  ;;  %v2386_v27 = vld [vmem:[%s5925_s16] sm:$0xff] }
 0xb0d   :  { %v2394_v4 = vpop.xlane.xlu0 %2393  ;;  %3907 = vmatmul.mubr.msk.f32.vlgmr.msra.gmra.mxu0 %vm187_vm1, %v2384_v22  ;;  %3914 = vmatprep.subr.mxu0 %v5920_v24 }
 0xb0e   :  { %3910 = vmatpush3.msra.mxu1 %v2394_v4  ;;  %3916 = vmatprep.mubr.msk.f32.mxu0 %vm4145_vm0, %v5920_v24 }
 0xb0f   :  { %3912 = vmatmul.mubr.msk.f32.vlgmr.msra.gmra.mxu1 %vm187_vm1, %v2384_v22  ;;  %3919 = vmatprep.subr.mxu1 %v5920_v24 }
 0xb10   :  { %3921 = vmatprep.mubr.msk.f32.mxu1 %vm4145_vm0, %v5920_v24 }
 0xb12   :  { %v2563_v41 = vpop.xlane.xlu0 %2562 }
 0xb13   :  { %3915 = vmatpush3.msra.mxu0 %v2563_v41 }
 0xb14   :  { %v2568_v26 = vpop.xlane.xlu1 %2567  ;;  %3917 = vmatmul.mubr.msk.f32.vlgmr.msra.gmra.mxu0 %vm187_vm1, %v2384_v22 }
 0xb15   :  { %3920 = vmatpush3.msra.mxu1 %v2568_v26  ;;  %2938 = vmatprep.mubr.f32.mxu0 %v5920_v24 }
 0xb16   :  { %3922 = vmatmul.mubr.msk.f32.vlgmr.msra.gmra.mxu1 %vm187_vm1, %v2384_v22 }
 0xb17   :  { %3009 = vmatprep.mubr.f32.mxu1 %v5920_v24 }
 0xbcd   :  { %v2464_v40 = vpop.f32.mrf.mxu0 }
 0xbce   :  { %v2538_v23 = vmul.f32 %v2464_v40, %v2464_v40 }
 0xbcf   :  { %v2534_v21 = vpop.f32.mrf.mxu1  ;;  %v3908_v7 = vpop.f32.mrf.mxu0 }
 0xbd0   :  { %v2539_v57 = vsub.f32 %v2534_v21, %v2538_v23 }
 0xbd1   :  { %v3913_v50 = vpop.f32.mrf.mxu1 }
 0xbd2   :  { %v2540_v11 = vadd.f32 1e-05, %v2539_v57 }
 0xbd4   :  { %4011 = vrsqrt.f32 %v2540_v11  ;;  %v2635_v61 = vpop.f32.mrf.mxu0 }
 0xbd5   :  { %v2709_v3 = vmul.f32 %v2635_v61, %v2635_v61 }
 0xbd6   :  { %v2705_v5 = vpop.f32.mrf.mxu1  ;;  %v3918_v19 = vpop.f32.mrf.mxu0 }
 0xbd7   :  { %v2710_v63 = vsub.f32 %v2705_v5, %v2709_v3 }
 0xbd8   :  { %v3923_v0 = vpop.f32.mrf.mxu1 }
 0xbd9   :  { %v2711_v42 = vadd.f32 1e-05, %v2710_v63 }
 0xbdb   :  { %4013 = vrsqrt.f32 %v2711_v42 }
 0xbe1   :  { %v4012_v8 = vpop.eup %4011 }
 0xbe2   :  { %v2542_v28 = vmul.f32 %v4012_v8, %v2385_v18 }
 0xbe4   :  { %2547 = vperm.xlu0 %3997, %v2542_v28   ;;  %v2543_v22 = vmul.f32 %v2542_v28, %v2464_v40 }
 0xbe6   :  { %v2544_v41 = vsub.f32 %v2386_v27, %v2543_v22 }
 0xbe8   :  { %v4014_v13 = vpop.eup %4013 }
 0xbe9   :  { %v2713_v33 = vmul.f32 %v4014_v13, %v2385_v18 }
 0xbeb   :  { %2718 = vperm.xlu1 %3998, %v2713_v33   ;;  %v2714_v4 = vmul.f32 %v2713_v33, %v2635_v61 }
 0xbed   :  { %v2715_v26 = vsub.f32 %v2386_v27, %v2714_v4 }
 0xbef   :  { %2554 = vperm.xlu1 %3998, %v2544_v41   ;;  %2725 = vperm.xlu0 %3997, %v2715_v26  }
 0xc5f   :  { %v2548_v23 = vpop.permute.xlu0 %2547 }
 0xc60   :  { %v2551_v7 = vmul.f32 %v2548_v23, %v5349_v45  ;;  %v2550_v50 = vmul.f32 %v2548_v23, %v5347_v1 }
 0xc66   :  { %v2719_v21 = vpop.permute.xlu1 %2718 }
 0xc67   :  { %v2721_v45 = vmul.f32 %v2719_v21, %v5357_v12  ;;  %v2722_v19 = vmul.f32 %v2719_v21, %v5359_v29  ;;  %v2865_v29 = vld [vmem:[%s5926_s18] sm:$0xff] }
 0xc6a   :  { %v2555_v57 = vpop.permute.xlu1 %2554  ;;  %v2726_v1 = vpop.permute.xlu0 %2725 }
 0xc6b   :  { %v2558_v11 = vadd.f32 %v2555_v57, %v2551_v7  ;;  %v2557_v3 = vadd.f32 %v2555_v57, %v2550_v50  ;;  %v2728_v61 = vadd.f32 %v2726_v1, %v2721_v45  ;;  %v2729_v63 = vadd.f32 %v2726_v1, %v2722_v19  ;;  %v5927_v1 = vld [vmem:[#allocation41_spill] sm:$0xff] }
 0xc6d   :  { %v5384_v5 = vmax.f32 %v2558_v11, 0.0  ;;  %v5390_v40 = vmax.f32 %v2557_v3, 0.0  ;;  %v5418_v0 = vmax.f32 %v2728_v61, 0.0  ;;  %v5424_v12 = vmax.f32 %v2729_v63, 0.0  ;;  %v5928_v61 = vld [vmem:[#allocation42_spill] sm:$0xff] }
 0xc6f   :  { %2835 = vrot.lane.b32.xlu0 %v5384_v5, %s4147_s13  ;;  %2851 = vrot.lane.b32.xlu1 %v5384_v5, %s4148_s17 }
 0xc73   :  { %2819 = vrot.lane.b32.xlu0 %v5384_v5, %s4152_s7  ;;  %2849 = vrot.lane.b32.xlu1 %v5390_v40, %s4148_s17 }
 0xc77   :  { %2803 = vrot.lane.b32.xlu0 %v5384_v5, %s4149_s21  ;;  %2833 = vrot.lane.b32.xlu1 %v5390_v40, %s4147_s13 }
 0xc7b   :  { %2783 = vrot.lane.b32.xlu0 %v5384_v5, %s4150_s30  ;;  %2817 = vrot.lane.b32.xlu1 %v5390_v40, %s4152_s7 }
 0xc7f   :  { %2765 = vrot.lane.b32.xlu0 %v5390_v40, %s4151_s4  ;;  %2801 = vrot.lane.b32.xlu1 %v5390_v40, %s4149_s21 }
 0xc83   :  { %2749 = vrot.lane.b32.xlu0 %v5390_v40, %s4153_s10  ;;  %2781 = vrot.lane.b32.xlu1 %v5390_v40, %s4150_s30 }
 0xc87   :  { %2733 = vrot.lane.b32.xlu0 %v5390_v40, %s4154_s11  ;;  %2767 = vrot.lane.b32.xlu1 %v5384_v5, %s4151_s4 }
 0xc8b   :  { %2751 = vrot.lane.b32.xlu1 %v5384_v5, %s4153_s10  ;;  %2853 = vrot.lane.b32.xlu0 %v5418_v0, %s4148_s17 }
 0xc8f   :  { %2735 = vrot.lane.b32.xlu1 %v5384_v5, %s4154_s11  ;;  %2855 = vrot.lane.b32.xlu0 %v5424_v12, %s4148_s17 }
 0xc93   :  { %2837 = vrot.lane.b32.xlu1 %v5418_v0, %s4147_s13  ;;  %2839 = vrot.lane.b32.xlu0 %v5424_v12, %s4147_s13 }
 0xc97   :  { %2821 = vrot.lane.b32.xlu1 %v5418_v0, %s4152_s7  ;;  %2823 = vrot.lane.b32.xlu0 %v5424_v12, %s4152_s7 }
 0xc9b   :  { %2805 = vrot.lane.b32.xlu1 %v5418_v0, %s4149_s21  ;;  %2807 = vrot.lane.b32.xlu0 %v5424_v12, %s4149_s21 }
 0xc9f   :  { %2787 = vrot.lane.b32.xlu1 %v5424_v12, %s4150_s30  ;;  %2785 = vrot.lane.b32.xlu0 %v5418_v0, %s4150_s30 }
 0xca3   :  { %2771 = vrot.lane.b32.xlu1 %v5424_v12, %s4151_s4  ;;  %2769 = vrot.lane.b32.xlu0 %v5418_v0, %s4151_s4 }
 0xca7   :  { %2755 = vrot.lane.b32.xlu1 %v5424_v12, %s4153_s10  ;;  %2753 = vrot.lane.b32.xlu0 %v5418_v0, %s4153_s10 }
 0xcab   :  { %2739 = vrot.lane.b32.xlu1 %v5424_v12, %s4154_s11  ;;  %2737 = vrot.lane.b32.xlu0 %v5418_v0, %s4154_s11 }
 0xcaf   :  { %2868 = vperm.xlu1 %3998, %v2865_v29  }
 0xce1   :  { %v2852_v42 = vpop.permute.xlu1 %2851  ;;  %v2836_v18 = vpop.permute.xlu0 %2835 }
 0xce5   :  { %v2850_v8 = vpop.permute.xlu1 %2849  ;;  %v2820_v28 = vpop.permute.xlu0 %2819 }
 0xce6   :  { %v2859_v57 = vsel %vm787_vm2, %v2850_v8, %v2852_v42 }
 0xce7   :  { %v2861_v19 = vmul.f32 %v5928_v61, %v2859_v57 }
 0xce9   :  { %v2834_v13 = vpop.permute.xlu1 %2833  ;;  %v2804_v33 = vpop.permute.xlu0 %2803 }
 0xced   :  { %v2818_v22 = vpop.permute.xlu1 %2817  ;;  %v5459_v27 = vpop.permute.xlu0 %2783 }
 0xcf1   :  { %v2802_v4 = vpop.permute.xlu1 %2801  ;;  %v5461_v41 = vpop.permute.xlu0 %2765 }
 0xcf5   :  { %v5463_v26 = vpop.permute.xlu1 %2781  ;;  %v5465_v23 = vpop.permute.xlu0 %2749 }
 0xcf9   :  { %v5467_v21 = vpop.permute.xlu1 %2767  ;;  %v5469_v7 = vpop.permute.xlu0 %2733 }
 0xcfd   :  { %v5473_v50 = vpop.permute.xlu1 %2751  ;;  %v2854_v11 = vpop.permute.xlu0 %2853 }
 0xcfe   :  { %v2858_v3 = vsel %vm787_vm2, %v2852_v42, %v2854_v11  ;;  %v2843_v42 = vsel %vm754_vm3, %v2834_v13, %v2836_v18 }
 0xcff   :  { %v2862_v45 = vmul.f32 %v5927_v1, %v2858_v3 }
 0xd01   :  { %v5479_v63 = vpop.permute.xlu1 %2735  ;;  %2888 = vmatprep.subr.mxu0 %v2862_v45  ;;  %v2856_v29 = vpop.permute.xlu0 %2855 }
 0xd02   :  { %v2857_v24 = vsel %vm787_vm2, %v2854_v11, %v2856_v29  ;;  %v2860_v56 = vsel %vm787_vm2, %v2856_v29, %v2850_v8  ;;  %2889 = vmatpush1.msra.mxu0 %v2861_v19  ;;  %v2845_v29 = vmul.f32 %v2843_v42, %v4553_v46 }
 0xd03   :  { %v2863_v34 = vmul.f32 %v5234_v51, %v2857_v24  ;;  %v2864_v31 = vmul.f32 %v5238_v9, %v2860_v56 }
 0xd05   :  { %v2838_v3 = vpop.permute.xlu1 %2837  ;;  %2959 = vmatprep.subr.mxu1 %v2864_v31  ;;  %v2840_v57 = vpop.permute.xlu0 %2839  ;;  %v2827_v31 = vsel %vm721_vm4, %v2818_v22, %v2820_v28 }
 0xd06   :  { %v2842_v45 = vsel %vm754_vm3, %v2836_v18, %v2838_v3  ;;  %v2841_v11 = vsel %vm754_vm3, %v2838_v3, %v2840_v57  ;;  %v2844_v8 = vsel %vm754_vm3, %v2840_v57, %v2834_v13  ;;  %2960 = vmatpush1.msra.mxu1 %v2863_v34 }
 0xd07   :  { %v2846_v24 = vmul.f32 %v2842_v45, %v4548_v44  ;;  %v2847_v56 = vmul.f32 %v2841_v11, %v4544_v43  ;;  %v2848_v19 = vmul.f32 %v2844_v8, %v4524_v35  ;;  %v2829_v11 = vmul.f32 %v2827_v31, %v4557_v47 }
 0xd08   :  { %v2811_v8 = vsel %vm688_vm6, %v2802_v4, %v2804_v33 }
 0xd09   :  { %v2822_v1 = vpop.permute.xlu1 %2821  ;;  %2890 = vmatprep.subr.mxu0 %v2846_v24  ;;  %2961 = vmatprep.subr.mxu1 %v2848_v19  ;;  %v2824_v18 = vpop.permute.xlu0 %2823 }
 0xd0a   :  { %v2826_v3 = vsel %vm721_vm4, %v2820_v28, %v2822_v1  ;;  %v2825_v34 = vsel %vm721_vm4, %v2822_v1, %v2824_v18  ;;  %v2828_v13 = vsel %vm721_vm4, %v2824_v18, %v2818_v22  ;;  %2891 = vmatpush1.msra.mxu0 %v2845_v29  ;;  %2962 = vmatpush1.msra.mxu1 %v2847_v56 }
 0xd0b   :  { %v2830_v42 = vmul.f32 %v2826_v3, %v4570_v54  ;;  %v2831_v57 = vmul.f32 %v2825_v34, %v4625_v49  ;;  %v2832_v45 = vmul.f32 %v2828_v13, %v4633_v62  ;;  %v2791_v28 = vsel %vm635_vm8, %v5463_v26, %v5459_v27 }
 0xd0c   :  { %v2813_v3 = vmul.f32 %v2811_v8, %v4600_v17  ;;  %v2798_v34 = vmul.f32 %v5384_v5, %v4512_v30  ;;  %v2797_v13 = vmul.f32 %v5390_v40, %v4528_v36  ;;  %v2799_v5 = vmul.f32 %v5418_v0, %v4700_v20 }
 0xd0d   :  { %v2806_v1 = vpop.permute.xlu1 %2805  ;;  %2892 = vmatprep.subr.mxu0 %v2830_v42  ;;  %2963 = vmatprep.subr.mxu1 %v2832_v45  ;;  %v2808_v22 = vpop.permute.xlu0 %2807  ;;  %v2775_v42 = vsel %vm602_vm7, %v5461_v41, %v5467_v21 }
 0xd0e   :  { %v2810_v24 = vsel %vm688_vm6, %v2804_v33, %v2806_v1  ;;  %v2809_v56 = vsel %vm688_vm6, %v2806_v1, %v2808_v22  ;;  %v2812_v19 = vsel %vm688_vm6, %v2808_v22, %v2802_v4  ;;  %2893 = vmatpush1.msra.mxu0 %v2829_v11  ;;  %2964 = vmatpush1.msra.mxu1 %v2831_v57 }
 0xd0f   :  { %v2814_v29 = vmul.f32 %v2810_v24, %v4594_v16  ;;  %v2815_v31 = vmul.f32 %v2809_v56, %v4658_v14  ;;  %v2816_v18 = vmul.f32 %v2812_v19, %v4676_v38  ;;  %v2800_v33 = vmul.f32 %v5424_v12, %v4695_v15 }
 0xd10   :  { %v2794_v4 = vmul.f32 %v2791_v28, %v4629_v52  ;;  %v2778_v0 = vmul.f32 %v2775_v42, %v4646_v55 }
 0xd11   :  { %v2788_v57 = vpop.permute.xlu1 %2787  ;;  %2894 = vmatprep.subr.mxu0 %v2814_v29  ;;  %2965 = vmatprep.subr.mxu1 %v2816_v18  ;;  %v2786_v45 = vpop.permute.xlu0 %2785 }
 0xd12   :  { %v2792_v12 = vsel %vm635_vm8, %v2788_v57, %v5463_v26  ;;  %v2789_v40 = vsel %vm635_vm8, %v2786_v45, %v2788_v57  ;;  %v2790_v11 = vsel %vm635_vm8, %v5459_v27, %v2786_v45  ;;  %2895 = vmatpush1.msra.mxu0 %v2813_v3  ;;  %2966 = vmatpush1.msra.mxu1 %v2815_v31 }
 0xd13   :  { %v2793_v8 = vmul.f32 %v2792_v12, %v4642_v53  ;;  %v2795_v28 = vmul.f32 %v2790_v11, %v4722_v32  ;;  %v2796_v1 = vmul.f32 %v2789_v40, %v4704_v59  ;;  %2896 = vmatprep.subr.mxu0 %v2798_v34  ;;  %2967 = vmatprep.subr.mxu1 %v2800_v33 }
 0xd14   :  { %2897 = vmatpush1.msra.mxu0 %v2797_v13  ;;  %2968 = vmatpush1.msra.mxu1 %v2799_v5  ;;  %v2759_v26 = vsel %vm569_vm5, %v5465_v23, %v5473_v50 }
 0xd15   :  { %v2772_v27 = vpop.permute.xlu1 %2771  ;;  %2898 = vmatprep.subr.mxu0 %v2794_v4  ;;  %2969 = vmatprep.subr.mxu1 %v2796_v1  ;;  %v2770_v22 = vpop.permute.xlu0 %2769  ;;  %v2762_v3 = vmul.f32 %v2759_v26, %v4662_v2  ;;  %v5930_v1 = vld [vmem:[#allocation37_spill] sm:$0xff]  ;;  %v5931_v26 = vld [vmem:[#allocation38_spill] sm:$0xff] }
 0xd16   :  { %v2776_v24 = vsel %vm602_vm7, %v2772_v27, %v5461_v41  ;;  %v2773_v56 = vsel %vm602_vm7, %v2770_v22, %v2772_v27  ;;  %v2774_v19 = vsel %vm602_vm7, %v5467_v21, %v2770_v22  ;;  %2899 = vmatpush1.msra.mxu0 %v2793_v8  ;;  %2970 = vmatpush1.msra.mxu1 %v2795_v28  ;;  %v5929_v8 = vld [vmem:[#allocation34_spill] sm:$0xff]  ;;  %v2732_v22 = vld [vmem:[#allocation5] sm:$0xff] }
 0xd17   :  { %v2777_v29 = vmul.f32 %v2776_v24, %v4654_v60  ;;  %v2779_v31 = vmul.f32 %v2774_v19, %v4746_v58  ;;  %v2780_v18 = vmul.f32 %v2773_v56, %v5902_v48  ;;  %2900 = vmatprep.subr.mxu0 %v2778_v0  ;;  %v2743_v41 = vsel %vm536_vm9, %v5469_v7, %v5479_v63 }
 0xd18   :  { %v2746_v5 = vmul.f32 %v2743_v41, %v4731_v6 }
 0xd19   :  { %v2756_v34 = vpop.permute.xlu1 %2755  ;;  %2901 = vmatpush1.msra.mxu0 %v2777_v29  ;;  %2971 = vmatprep.subr.mxu1 %v2780_v18  ;;  %v2754_v21 = vpop.permute.xlu0 %2753 }
 0xd1a   :  { %v2760_v33 = vsel %vm569_vm5, %v2756_v34, %v5465_v23  ;;  %v2757_v13 = vsel %vm569_vm5, %v2754_v21, %v2756_v34  ;;  %v2758_v4 = vsel %vm569_vm5, %v5473_v50, %v2754_v21  ;;  %2902 = vmatprep.subr.mxu0 %v2762_v3  ;;  %2972 = vmatpush1.msra.mxu1 %v2779_v31  ;;  %v5933_v31 = vld [vmem:[#allocation33_spill] sm:$0xff]  ;;  %v5934_v3 = vld [vmem:[#allocation39_spill] sm:$0xff] }
 0xd1b   :  { %v2761_v42 = vmul.f32 %v2760_v33, %v4718_v39  ;;  %v2763_v57 = vmul.f32 %v2758_v4, %v5904_v25  ;;  %v2764_v45 = vmul.f32 %v2757_v13, %v5919_v37  ;;  %v5935_v13 = vld [vmem:[#allocation35_spill] sm:$0xff] }
 0xd1d   :  { %v2740_v12 = vpop.permute.xlu1 %2739  ;;  %2903 = vmatpush1.msra.mxu0 %v2761_v42  ;;  %2973 = vmatprep.subr.mxu1 %v2764_v45  ;;  %v2738_v23 = vpop.permute.xlu0 %2737 }
 0xd1e   :  { %v2744_v40 = vsel %vm536_vm9, %v2740_v12, %v5469_v7  ;;  %v2741_v50 = vsel %vm536_vm9, %v2738_v23, %v2740_v12  ;;  %v2742_v11 = vsel %vm536_vm9, %v5479_v63, %v2738_v23  ;;  %2904 = vmatprep.subr.mxu0 %v2746_v5  ;;  %2974 = vmatpush1.msra.mxu1 %v2763_v57  ;;  %v5932_v7 = vmov 0.0   ;;  %v5936_v57 = vld [vmem:[#allocation40_spill] sm:$0xff]  ;;  %v3362_v5 = vld [vmem:[%s5937_s22] sm:$0xff] }
 0xd1f   :  { %v2745_v28 = vmul.f32 %v2744_v40, %v5929_v8  ;;  %v2747_v0 = vmul.f32 %v2742_v11, %v5930_v1  ;;  %v2748_v27 = vmul.f32 %v2741_v50, %v5931_v26 }
 0xd21   :  { %2905 = vmatpush1.msra.mxu0 %v2745_v28  ;;  %2975 = vmatprep.subr.mxu1 %v2748_v27 }
 0xd22   :  { %3726 = vmatmul.mubr.msk.f32.vlgmr.msra.gmra.mxu0 %vm818_vm10, %v2732_v22  ;;  %2976 = vmatpush1.msra.mxu1 %v2747_v0 }
 0xd23   :  { %3727 = vmatmul.mubr.msk.f32.vlgmr.msra.gmra.mxu1 %vm818_vm10, %v2732_v22  ;;  %3220 = vmatprep.mubr.f32.mxu0 %v5932_v7 }
 0xd24   :  { %3291 = vmatprep.mubr.f32.mxu1 %v5932_v7 }
 0xd2a   :  { %v2869_v63 = vpop.permute.xlu1 %2868 }
 0xde2   :  { %v2940_v24 = vpop.f32.mrf.mxu0 }
 0xde3   :  { %v2941_v56 = vadd.f32 %v2940_v24, %v2869_v63  ;;  %v3011_v19 = vpop.f32.mrf.mxu1 }
 0xde4   :  { %v3012_v29 = vadd.f32 %v3011_v19, %v2869_v63  ;;  %v2942_v34 = vpop.f32.mrf.mxu0 }
 0xde5   :  { %v5600_v18 = vadd.f32 %v2941_v56, %v5933_v31  ;;  %v2943_v21 = vadd.f32 %v2942_v34, %v2869_v63  ;;  %v3013_v33 = vpop.f32.mrf.mxu1 }
 0xde6   :  { %v5603_v41 = vadd.f32 %v3012_v29, %v5934_v3  ;;  %v3014_v42 = vadd.f32 %v3013_v33, %v2869_v63 }
 0xde7   :  { %3137 = vrot.lane.b32.xlu0 %v5600_v18, %s4148_s17  ;;  %v5630_v4 = vadd.f32 %v2943_v21, %v5935_v13 }
 0xde8   :  { %3141 = vrot.lane.b32.xlu1 %v5603_v41, %s4148_s17  ;;  %v5637_v45 = vadd.f32 %v3014_v42, %v5936_v57 }
 0xdeb   :  { %3125 = vrot.lane.b32.xlu0 %v5603_v41, %s4147_s13 }
 0xdec   :  { %3053 = vrot.lane.b32.xlu1 %v5600_v18, %s4151_s4 }
 0xdef   :  { %3121 = vrot.lane.b32.xlu0 %v5600_v18, %s4147_s13 }
 0xdf0   :  { %3073 = vrot.lane.b32.xlu1 %v5603_v41, %s4150_s30 }
 0xdf3   :  { %3109 = vrot.lane.b32.xlu0 %v5603_v41, %s4152_s7 }
 0xdf4   :  { %3037 = vrot.lane.b32.xlu1 %v5600_v18, %s4153_s10 }
 0xdf7   :  { %3105 = vrot.lane.b32.xlu0 %v5600_v18, %s4152_s7 }
 0xdf8   :  { %3057 = vrot.lane.b32.xlu1 %v5603_v41, %s4151_s4 }
 0xdfb   :  { %3093 = vrot.lane.b32.xlu0 %v5603_v41, %s4149_s21 }
 0xdfc   :  { %3021 = vrot.lane.b32.xlu1 %v5600_v18, %s4154_s11 }
 0xdff   :  { %3089 = vrot.lane.b32.xlu0 %v5600_v18, %s4149_s21 }
 0xe00   :  { %3123 = vrot.lane.b32.xlu1 %v5630_v4, %s4147_s13 }
 0xe03   :  { %3069 = vrot.lane.b32.xlu0 %v5600_v18, %s4150_s30 }
 0xe04   :  { %3143 = vrot.lane.b32.xlu1 %v5637_v45, %s4148_s17 }
 0xe07   :  { %3139 = vrot.lane.b32.xlu0 %v5630_v4, %s4148_s17 }
 0xe08   :  { %3107 = vrot.lane.b32.xlu1 %v5630_v4, %s4152_s7 }
 0xe0b   :  { %3075 = vrot.lane.b32.xlu0 %v5637_v45, %s4150_s30 }
 0xe0c   :  { %3127 = vrot.lane.b32.xlu1 %v5637_v45, %s4147_s13 }
 0xe0f   :  { %3055 = vrot.lane.b32.xlu0 %v5630_v4, %s4151_s4 }
 0xe10   :  { %3091 = vrot.lane.b32.xlu1 %v5630_v4, %s4149_s21 }
 0xe13   :  { %3059 = vrot.lane.b32.xlu0 %v5637_v45, %s4151_s4 }
 0xe14   :  { %3111 = vrot.lane.b32.xlu1 %v5637_v45, %s4152_s7 }
 0xe17   :  { %3039 = vrot.lane.b32.xlu0 %v5630_v4, %s4153_s10 }
 0xe18   :  { %3095 = vrot.lane.b32.xlu1 %v5637_v45, %s4149_s21 }
 0xe1b   :  { %3043 = vrot.lane.b32.xlu0 %v5637_v45, %s4153_s10 }
 0xe1c   :  { %3071 = vrot.lane.b32.xlu1 %v5630_v4, %s4150_s30 }
 0xe1f   :  { %3023 = vrot.lane.b32.xlu0 %v5630_v4, %s4154_s11 }
 0xe20   :  { %3041 = vrot.lane.b32.xlu1 %v5603_v41, %s4153_s10 }
 0xe23   :  { %3027 = vrot.lane.b32.xlu0 %v5637_v45, %s4154_s11 }
 0xe24   :  { %3025 = vrot.lane.b32.xlu1 %v5603_v41, %s4154_s11 }
 0xe27   :  { %3365 = vperm.xlu0 %3997, %v3362_v5  }
 0xe59   :  { %v3138_v12 = vpop.permute.xlu0 %3137 }
 0xe5a   :  { %v3142_v23 = vpop.permute.xlu1 %3141 }
 0xe5d   :  { %v3126_v40 = vpop.permute.xlu0 %3125 }
 0xe5e   :  { %v5676_v50 = vpop.permute.xlu1 %3053 }
 0xe61   :  { %v3122_v11 = vpop.permute.xlu0 %3121 }
 0xe62   :  { %v5678_v28 = vpop.permute.xlu1 %3073 }
 0xe65   :  { %v3110_v0 = vpop.permute.xlu0 %3109 }
 0xe66   :  { %v5680_v27 = vpop.permute.xlu1 %3037 }
 0xe69   :  { %v3106_v22 = vpop.permute.xlu0 %3105 }
 0xe6a   :  { %v5682_v63 = vpop.permute.xlu1 %3057 }
 0xe6d   :  { %v3094_v24 = vpop.permute.xlu0 %3093 }
 0xe6e   :  { %v5684_v56 = vpop.permute.xlu1 %3021 }
 0xe71   :  { %v3090_v19 = vpop.permute.xlu0 %3089 }
 0xe72   :  { %v3124_v29 = vpop.permute.xlu1 %3123 }
 0xe73   :  { %v3130_v57 = vsel %vm754_vm3, %v3124_v29, %v3126_v40  ;;  %v3131_v1 = vsel %vm754_vm3, %v3122_v11, %v3124_v29 }
 0xe75   :  { %v5686_v31 = vpop.permute.xlu0 %3069 }
 0xe76   :  { %v3144_v3 = vpop.permute.xlu1 %3143 }
 0xe77   :  { %v3145_v34 = vsel %vm787_vm2, %v3142_v23, %v3144_v3  ;;  %v3148_v21 = vsel %vm787_vm2, %v3144_v3, %v3138_v12 }
 0xe78   :  { %v3151_v33 = vmul.f32 %v5234_v51, %v3145_v34  ;;  %v3152_v13 = vmul.f32 %v5238_v9, %v3148_v21  ;;  %v5938_v51 = vld [vmem:[#allocation41_spill] sm:$0xff]  ;;  %v3134_v21 = vmul.f32 %v3130_v57, %v4548_v44 }
 0xe79   :  { %v3140_v42 = vpop.permute.xlu0 %3139 }
 0xe7a   :  { %v3146_v5 = vsel %vm787_vm2, %v3140_v42, %v3142_v23  ;;  %v3147_v7 = vsel %vm787_vm2, %v3138_v12, %v3140_v42  ;;  %v3108_v26 = vpop.permute.xlu1 %3107  ;;  %3241 = vmatprep.subr.mxu1 %v3152_v13  ;;  %v3133_v13 = vmul.f32 %v3131_v1, %v4553_v46 }
 0xe7b   :  { %v3149_v3 = vmul.f32 %v5928_v61, %v3147_v7  ;;  %v3150_v34 = vmul.f32 %v5938_v51, %v3146_v5  ;;  %3242 = vmatpush1.msra.mxu1 %v3151_v33  ;;  %v3114_v9 = vsel %vm721_vm4, %v3108_v26, %v3110_v0  ;;  %v3115_v23 = vsel %vm721_vm4, %v3106_v22, %v3108_v26 }
 0xe7c   :  { %v3118_v29 = vmul.f32 %v3114_v9, %v4570_v54  ;;  %v3117_v44 = vmul.f32 %v3115_v23, %v4557_v47  ;;  %v3085_v51 = vmul.f32 %v5600_v18, %v4528_v36  ;;  %v3087_v18 = vmul.f32 %v5603_v41, %v4700_v20 }
 0xe7d   :  { %3170 = vmatprep.subr.mxu0 %v3150_v34  ;;  %v3076_v12 = vpop.permute.xlu0 %3075 }
 0xe7e   :  { %v3128_v42 = vpop.permute.xlu1 %3127  ;;  %3171 = vmatpush1.msra.mxu0 %v3149_v3 }
 0xe7f   :  { %v3129_v61 = vsel %vm754_vm3, %v3126_v40, %v3128_v42  ;;  %v3132_v7 = vsel %vm754_vm3, %v3128_v42, %v3122_v11  ;;  %3172 = vmatprep.subr.mxu0 %v3134_v21 }
 0xe80   :  { %v3135_v33 = vmul.f32 %v3129_v61, %v4544_v43  ;;  %v3136_v26 = vmul.f32 %v3132_v7, %v4524_v35  ;;  %3173 = vmatpush1.msra.mxu0 %v3133_v13  ;;  %v3086_v35 = vmul.f32 %v5630_v4, %v4512_v30 }
 0xe81   :  { %3174 = vmatprep.subr.mxu0 %v3118_v29  ;;  %v3056_v46 = vpop.permute.xlu0 %3055 }
 0xe82   :  { %v3092_v1 = vpop.permute.xlu1 %3091  ;;  %3175 = vmatpush1.msra.mxu0 %v3117_v44  ;;  %3243 = vmatprep.subr.mxu1 %v3136_v26  ;;  %v5940_v26 = vld [vmem:[#allocation37_spill] sm:$0xff] }
 0xe83   :  { %v3098_v54 = vsel %vm688_vm6, %v3092_v1, %v3094_v24  ;;  %v3099_v40 = vsel %vm688_vm6, %v3090_v19, %v3092_v1  ;;  %3244 = vmatpush1.msra.mxu1 %v3135_v33 }
 0xe84   :  { %v3101_v11 = vmul.f32 %v3099_v40, %v4600_v17  ;;  %v3102_v47 = vmul.f32 %v3098_v54, %v4594_v16  ;;  %v3313_v54 = vld [vmem:[#allocation7 + $0x78] sm:$0xff] }
 0xe85   :  { %v3060_v43 = vpop.permute.xlu0 %3059  ;;  %v3361_v40 = vld [vmem:[#allocation7 + $0x1f8] sm:$0xff] }
 0xe86   :  { %v3112_v57 = vpop.permute.xlu1 %3111  ;;  %3176 = vmatprep.subr.mxu0 %v3102_v47  ;;  %v3061_v20 = vsel %vm602_vm7, %v5682_v63, %v3060_v43  ;;  %v3064_v41 = vsel %vm602_vm7, %v3060_v43, %v5676_v50  ;;  %v3327_v47 = vld [vmem:[#allocation7 + $0xe8] sm:$0xff]  ;;  %v3360_v43 = vld [vmem:[#allocation7 + $0x1f0] sm:$0xff] }
 0xe87   :  { %v3113_v5 = vsel %vm721_vm4, %v3110_v0, %v3112_v57  ;;  %v3116_v3 = vsel %vm721_vm4, %v3112_v57, %v3106_v22  ;;  %3177 = vmatpush1.msra.mxu0 %v3101_v11  ;;  %v3080_v22 = vsel %vm635_vm8, %v3076_v12, %v5686_v31  ;;  %v3065_v42 = vmul.f32 %v3064_v41, %v4654_v60  ;;  %v3345_v11 = vld [vmem:[#allocation7 + $0x178] sm:$0xff]  ;;  %v3311_v57 = vld [vmem:[#allocation7 + $0x68] sm:$0xff] }
 0xe88   :  { %v3119_v17 = vmul.f32 %v3113_v5, %v4625_v49  ;;  %v3120_v16 = vmul.f32 %v3116_v3, %v4633_v62  ;;  %3178 = vmatprep.subr.mxu0 %v3086_v35  ;;  %v3077_v49 = vsel %vm635_vm8, %v5678_v28, %v3076_v12  ;;  %v3344_v35 = vld [vmem:[#allocation7 + $0x170] sm:$0xff]  ;;  %v3326_v5 = vld [vmem:[#allocation7 + $0xe0] sm:$0xff]  ;;  %v3359_v3 = vld [vmem:[#allocation7 + $0x1e8] sm:$0xff] }
 0xe89   :  { %3179 = vmatpush1.msra.mxu0 %v3085_v51  ;;  %v3040_v34 = vpop.permute.xlu0 %3039  ;;  %v3084_v12 = vmul.f32 %v3077_v49, %v4704_v59  ;;  %v3068_v59 = vmul.f32 %v3061_v20, %v5902_v48  ;;  %v3310_v51 = vld [vmem:[#allocation7 + $0x60] sm:$0xff]  ;;  %v3341_v49 = vld [vmem:[#allocation7 + $0x158] sm:$0xff]  ;;  %v3339_v20 = vld [vmem:[#allocation7 + $0x148] sm:$0xff] }
 0xe8a   :  { %v3096_v9 = vpop.permute.xlu1 %3095  ;;  %3245 = vmatprep.subr.mxu1 %v3120_v16  ;;  %v3325_v16 = vld [vmem:[#allocation7 + $0xd8] sm:$0xff] }
 0xe8b   :  { %v3097_v30 = vsel %vm688_vm6, %v3094_v24, %v3096_v9  ;;  %v3100_v4 = vsel %vm688_vm6, %v3096_v9, %v3090_v19  ;;  %3246 = vmatpush1.msra.mxu1 %v3119_v17  ;;  %v3062_v24 = vsel %vm602_vm7, %v3056_v46, %v5682_v63  ;;  %v3088_v19 = vmul.f32 %v5637_v45, %v4695_v15  ;;  %v3343_v17 = vld [vmem:[#allocation7 + $0x168] sm:$0xff]  ;;  %v3309_v9 = vld [vmem:[#allocation7 + $0x58] sm:$0xff] }
 0xe8c   :  { %v3103_v0 = vmul.f32 %v3097_v30, %v4658_v14  ;;  %v3104_v36 = vmul.f32 %v3100_v4, %v4676_v38  ;;  %v3063_v14 = vsel %vm602_vm7, %v5676_v50, %v3056_v46  ;;  %v3081_v63 = vmul.f32 %v3080_v22, %v4642_v53  ;;  %v5941_v46 = vld [vmem:[#allocation38_spill] sm:$0xff]  ;;  %v3342_v30 = vld [vmem:[#allocation7 + $0x160] sm:$0xff]  ;;  %v3307_v22 = vld [vmem:[#allocation7 + $0x48] sm:$0xff] }
 0xe8d   :  { %v3044_v62 = vpop.permute.xlu0 %3043  ;;  %v3066_v50 = vmul.f32 %v3063_v14, %v4646_v55  ;;  %v3067_v13 = vmul.f32 %v3062_v24, %v4746_v58  ;;  %v3324_v4 = vld [vmem:[#allocation7 + $0xd0] sm:$0xff]  ;;  %v3322_v14 = vld [vmem:[#allocation7 + $0xc0] sm:$0xff]  ;;  %v3321_v41 = vld [vmem:[#allocation7 + $0xb8] sm:$0xff] }
 0xe8e   :  { %v3072_v38 = vpop.permute.xlu1 %3071  ;;  %3247 = vmatprep.subr.mxu1 %v3104_v36  ;;  %v3308_v36 = vld [vmem:[#allocation7 + $0x50] sm:$0xff] }
 0xe8f   :  { %v3078_v21 = vsel %vm635_vm8, %v3072_v38, %v5678_v28  ;;  %v3079_v23 = vsel %vm635_vm8, %v5686_v31, %v3072_v38  ;;  %3248 = vmatpush1.msra.mxu1 %v3103_v0  ;;  %v3047_v28 = vsel %vm569_vm5, %v5680_v27, %v3040_v34  ;;  %v3357_v0 = vld [vmem:[#allocation7 + $0x1d8] sm:$0xff]  ;;  %v3340_v24 = vld [vmem:[#allocation7 + $0x150] sm:$0xff]  ;;  %v3355_v38 = vld [vmem:[#allocation7 + $0x1c8] sm:$0xff] }
 0xe90   :  { %v3082_v15 = vmul.f32 %v3079_v23, %v4629_v52  ;;  %v3083_v45 = vmul.f32 %v3078_v21, %v4722_v32  ;;  %3249 = vmatprep.subr.mxu1 %v3088_v19  ;;  %v3048_v52 = vsel %vm569_vm5, %v3044_v62, %v5680_v27  ;;  %v3050_v60 = vmul.f32 %v3047_v28, %v4662_v2  ;;  %v3306_v19 = vld [vmem:[#allocation7 + $0x40] sm:$0xff]  ;;  %v3305_v23 = vld [vmem:[#allocation7 + $0x38] sm:$0xff]  ;;  %v3352_v28 = vld [vmem:[#allocation7 + $0x1b0] sm:$0xff] }
 0xe91   :  { %3250 = vmatpush1.msra.mxu1 %v3087_v18  ;;  %v3024_v31 = vpop.permute.xlu0 %3023  ;;  %v3049_v29 = vmul.f32 %v3048_v52, %v4718_v39  ;;  %v3356_v18 = vld [vmem:[#allocation7 + $0x1d0] sm:$0xff]  ;;  %v3354_v21 = vld [vmem:[#allocation7 + $0x1c0] sm:$0xff]  ;;  %v3351_v52 = vld [vmem:[#allocation7 + $0x1a8] sm:$0xff] }
 0xe92   :  { %v3042_v32 = vpop.permute.xlu1 %3041  ;;  %3180 = vmatprep.subr.mxu0 %v3082_v15  ;;  %3251 = vmatprep.subr.mxu1 %v3084_v12  ;;  %v3031_v53 = vsel %vm536_vm9, %v5684_v56, %v3024_v31  ;;  %v3338_v12 = vld [vmem:[#allocation7 + $0x140] sm:$0xff]  ;;  %v3320_v15 = vld [vmem:[#allocation7 + $0xb0] sm:$0xff] }
 0xe93   :  { %v3045_v55 = vsel %vm569_vm5, %v3042_v32, %v3044_v62  ;;  %v3046_v58 = vsel %vm569_vm5, %v3040_v34, %v3042_v32  ;;  %3181 = vmatpush1.msra.mxu0 %v3081_v63  ;;  %3252 = vmatpush1.msra.mxu1 %v3083_v45  ;;  %v3034_v7 = vmul.f32 %v3031_v53, %v4731_v6  ;;  %v3358_v34 = vld [vmem:[#allocation7 + $0x1e0] sm:$0xff]  ;;  %v3323_v62 = vld [vmem:[#allocation7 + $0xc8] sm:$0xff]  ;;  %v3353_v45 = vld [vmem:[#allocation7 + $0x1b8] sm:$0xff] }
 0xe94   :  { %v3051_v48 = vmul.f32 %v3046_v58, %v5904_v25  ;;  %v3052_v27 = vmul.f32 %v3045_v55, %v5919_v37  ;;  %3182 = vmatprep.subr.mxu0 %v3066_v50  ;;  %3253 = vmatprep.subr.mxu1 %v3068_v59  ;;  %v3020_v37 = vld [vmem:[%s5939_s23] sm:$0xff]  ;;  %v3337_v50 = vld [vmem:[#allocation7 + $0x138] sm:$0xff]  ;;  %v3318_v59 = vld [vmem:[#allocation7 + $0xa0] sm:$0xff] }
 0xe95   :  { %3183 = vmatpush1.msra.mxu0 %v3065_v42  ;;  %3254 = vmatpush1.msra.mxu1 %v3067_v13  ;;  %v3028_v61 = vpop.permute.xlu0 %3027  ;;  %v3304_v63 = vld [vmem:[#allocation7 + $0x30] sm:$0xff]  ;;  %v3319_v13 = vld [vmem:[#allocation7 + $0xa8] sm:$0xff]  ;;  %v3302_v32 = vld [vmem:[#allocation7 + $0x20] sm:$0xff] }
 0xe96   :  { %v3032_v44 = vsel %vm536_vm9, %v3028_v61, %v5684_v56  ;;  %v3026_v33 = vpop.permute.xlu1 %3025  ;;  %3184 = vmatprep.subr.mxu0 %v3050_v60  ;;  %3255 = vmatprep.subr.mxu1 %v3052_v27  ;;  %v3329_v56 = vld [vmem:[#allocation7 + $0xf8] sm:$0xff]  ;;  %v3336_v42 = vld [vmem:[#allocation7 + $0x130] sm:$0xff]  ;;  %v3335_v53 = vld [vmem:[#allocation7 + $0x128] sm:$0xff] }
 0xe97   :  { %v3033_v2 = vmul.f32 %v3032_v44, %v5929_v8  ;;  %v3029_v25 = vsel %vm536_vm9, %v3026_v33, %v3028_v61  ;;  %v3030_v39 = vsel %vm536_vm9, %v3024_v31, %v3026_v33  ;;  %3185 = vmatpush1.msra.mxu0 %v3049_v29  ;;  %3256 = vmatpush1.msra.mxu1 %v3051_v48  ;;  %v3328_v8 = vld [vmem:[#allocation7 + $0xf0] sm:$0xff]  ;;  %v3303_v31 = vld [vmem:[#allocation7 + $0x28] sm:$0xff]  ;;  %v3317_v55 = vld [vmem:[#allocation7 + $0x98] sm:$0xff] }
 0xe98   :  { %v3035_v6 = vmul.f32 %v3030_v39, %v5940_v26  ;;  %v3036_v1 = vmul.f32 %v3029_v25, %v5941_v46  ;;  %3186 = vmatprep.subr.mxu0 %v3034_v7  ;;  %v3350_v58 = vld [vmem:[#allocation7 + $0x1a0] sm:$0xff]  ;;  %v3301_v60 = vld [vmem:[#allocation7 + $0x18] sm:$0xff]  ;;  %v3316_v27 = vld [vmem:[#allocation7 + $0x90] sm:$0xff] }
 0xe99   :  { %3187 = vmatpush1.msra.mxu0 %v3033_v2  ;;  %v3334_v48 = vld [vmem:[#allocation7 + $0x120] sm:$0xff]  ;;  %v3349_v29 = vld [vmem:[#allocation7 + $0x198] sm:$0xff]  ;;  %v3300_v61 = vld [vmem:[#allocation7 + $0x10] sm:$0xff] }
 0xe9a   :  { %3728 = vmatmul.mubr.msk.f32.vlgmr.msra.gmra.mxu0 %vm818_vm10, %v3020_v37  ;;  %3257 = vmatprep.subr.mxu1 %v3036_v1  ;;  %v3333_v7 = vld [vmem:[#allocation7 + $0x118] sm:$0xff]  ;;  %v3315_v44 = vld [vmem:[#allocation7 + $0x88] sm:$0xff]  ;;  %v3348_v33 = vld [vmem:[#allocation7 + $0x190] sm:$0xff] }
 0xe9b   :  { %3258 = vmatpush1.msra.mxu1 %v3035_v6  ;;  %3764 = vmatprep.subr.mxu0 %v3329_v56  ;;  %v3299_v2 = vld [vmem:[#allocation7 + $0x8] sm:$0xff]  ;;  %v3332_v25 = vld [vmem:[#allocation7 + $0x110] sm:$0xff]  ;;  %v3314_v39 = vld [vmem:[#allocation7 + $0x80] sm:$0xff]  ;;  %v5942_v56 = vmov 0.0  }
 0xe9c   :  { %3729 = vmatmul.mubr.msk.f32.vlgmr.msra.gmra.mxu1 %vm818_vm10, %v3020_v37  ;;  %3765 = vmatpush3.msra.mxu0 %v3313_v54  ;;  %v3347_v37 = vld [vmem:[#allocation7 + $0x188] sm:$0xff]  ;;  %v3298_v26 = vld [vmem:[#allocation7] sm:$0xff] }
 0xe9d   :  { %3766 = vmatprep.subr.mxu0 %v3328_v8  ;;  %3799 = vmatprep.subr.mxu1 %v3361_v40  ;;  %v3331_v6 = vld [vmem:[#allocation7 + $0x108] sm:$0xff]  ;;  %v3346_v46 = vld [vmem:[#allocation7 + $0x180] sm:$0xff] }
 0xe9e   :  { %3767 = vmatpush3.msra.mxu0 %v3312_v10  ;;  %3800 = vmatpush3.msra.mxu1 %v3345_v11  ;;  %v3330_v1 = vld [vmem:[#allocation7 + $0x100] sm:$0xff] }
 0xe9f   :  { %3768 = vmatprep.subr.mxu0 %v3327_v47  ;;  %3801 = vmatprep.subr.mxu1 %v3360_v43 }
 0xea0   :  { %3769 = vmatpush3.msra.mxu0 %v3311_v57  ;;  %3802 = vmatpush3.msra.mxu1 %v3344_v35 }
 0xea1   :  { %3770 = vmatprep.subr.mxu0 %v3326_v5  ;;  %3803 = vmatprep.subr.mxu1 %v3359_v3 }
 0xea2   :  { %3771 = vmatpush3.msra.mxu0 %v3310_v51  ;;  %3804 = vmatpush3.msra.mxu1 %v3343_v17  ;;  %v3366_v35 = vpop.permute.xlu0 %3365 }
 0xea3   :  { %3772 = vmatprep.subr.mxu0 %v3325_v16  ;;  %3805 = vmatprep.subr.mxu1 %v3358_v34  ;;  %v3572_v16 = vld [vmem:[%s4314_s6] sm:$0xff]  ;;  %s4160_s6 = smov [#allocation8]  }
 0xea4   :  { %3773 = vmatpush3.msra.mxu0 %v3309_v9  ;;  %3806 = vmatpush3.msra.mxu1 %v3342_v30  ;;  %v3508_v34 = vld [vmem:[%s4304_s20] sm:$0xff]  ;;  %v3730_v9 = vld [vmem:[%s4304_s20 + $0x8] ss:$0 sm:$0xff]  ;;  %s3658_s20 = sshll.u32 %s4160_s6, 4  ;;  %s3659_s20 = int_to_ptr.vmem [resolvable:$true] %s3658_s20 }
 0xea5   :  { %3774 = vmatprep.subr.mxu0 %v3324_v4  ;;  %3807 = vmatprep.subr.mxu1 %v3357_v0  ;;  %v5943_v30 = vld [vmem:[#allocation26_spill] sm:$0xff]  ;;  %p4088_p2 = scmp.lt.s32.totalorder %s3659_s20, %s3659_s20 }
 0xea6   :  { %3775 = vmatpush3.msra.mxu0 %v3308_v36  ;;  %3808 = vmatpush3.msra.mxu1 %v3341_v49  ;;  %v3563_v4 = vrot.slane %v3508_v34, %v5943_v30 }
 0xea7   :  { %3776 = vmatprep.subr.mxu0 %v3323_v62  ;;  %3809 = vmatprep.subr.mxu1 %v3356_v18  ;;  %v5944_v62 = vld [vmem:[#allocation27_spill] sm:$0xff] }
 0xea8   :  { %3777 = vmatpush3.msra.mxu0 %v3307_v22  ;;  %3810 = vmatpush3.msra.mxu1 %v3340_v24  ;;  %v3556_v18 = vrot.slane %v3508_v34, %v5944_v62  ;;  %v5945_v24 = vld [vmem:[#allocation28_spill] sm:$0xff] }
 0xea9   :  { %3778 = vmatprep.subr.mxu0 %v3322_v14  ;;  %3811 = vmatprep.subr.mxu1 %v3355_v38  ;;  %v3549_v14 = vrot.slane %v3508_v34, %v5945_v24 }
 0xeaa   :  { %3779 = vmatpush3.msra.mxu0 %v3306_v19  ;;  %3812 = vmatpush3.msra.mxu1 %v3339_v20 }
 0xeab   :  { %3780 = vmatprep.subr.mxu0 %v3321_v41  ;;  %3813 = vmatprep.subr.mxu1 %v3354_v21  ;;  %v5946_v41 = vld [vmem:[#allocation25_spill] sm:$0xff] }
 0xeac   :  { %3781 = vmatpush3.msra.mxu0 %v3305_v23  ;;  %3814 = vmatpush3.msra.mxu1 %v3338_v12  ;;  %v3542_v21 = vrot.slane %v3508_v34, %v5946_v41  ;;  %v5947_v12 = vld [vmem:[#allocation29_spill] sm:$0xff] }
 0xead   :  { %3782 = vmatprep.subr.mxu0 %v3320_v15  ;;  %3815 = vmatprep.subr.mxu1 %v3353_v45  ;;  %v3537_v15 = vrot.slane %v3508_v34, %v5947_v12 }
 0xeae   :  { %3783 = vmatpush3.msra.mxu0 %v3304_v63  ;;  %3816 = vmatpush3.msra.mxu1 %v3337_v50  ;;  %v5948_v50 = vld [vmem:[#allocation30_spill] sm:$0xff] }
 0xeaf   :  { %3784 = vmatprep.subr.mxu0 %v3319_v13  ;;  %3817 = vmatprep.subr.mxu1 %v3352_v28  ;;  %v3530_v13 = vrot.slane %v3508_v34, %v5948_v50 }
 0xeb0   :  { %3785 = vmatpush3.msra.mxu0 %v3303_v31  ;;  %3818 = vmatpush3.msra.mxu1 %v3336_v42  ;;  %v5949_v42 = vld [vmem:[#allocation31_spill] sm:$0xff] }
 0xeb1   :  { %3786 = vmatprep.subr.mxu0 %v3318_v59  ;;  %3819 = vmatprep.subr.mxu1 %v3351_v52  ;;  %v3523_v59 = vrot.slane %v3508_v34, %v5949_v42 }
 0xeb2   :  { %3787 = vmatpush3.msra.mxu0 %v3302_v32  ;;  %3820 = vmatpush3.msra.mxu1 %v3335_v53  ;;  %v5950_v53 = vld [vmem:[#allocation32_spill] sm:$0xff] }
 0xeb3   :  { %3788 = vmatprep.subr.mxu0 %v3317_v55  ;;  %3821 = vmatprep.subr.mxu1 %v3350_v58  ;;  %v3516_v55 = vrot.slane %v3508_v34, %v5950_v53 }
 0xeb4   :  { %3789 = vmatpush3.msra.mxu0 %v3301_v60  ;;  %3822 = vmatpush3.msra.mxu1 %v3334_v48 }
 0xeb5   :  { %3790 = vmatprep.subr.mxu0 %v3316_v27  ;;  %3823 = vmatprep.subr.mxu1 %v3349_v29  ;;  %v3510_v27 = vld [vmem:[%s4309_s27] sm:$0xff] }
 0xeb6   :  { %3791 = vmatpush3.msra.mxu0 %v3300_v61  ;;  %3824 = vmatpush3.msra.mxu1 %v3333_v7 }
 0xeb7   :  { %3792 = vmatprep.subr.mxu0 %v3315_v44  ;;  %3825 = vmatprep.subr.mxu1 %v3348_v33 }
 0xeb8   :  { %3793 = vmatpush3.msra.mxu0 %v3299_v2  ;;  %3826 = vmatpush3.msra.mxu1 %v3332_v25 }
 0xeb9   :  { %3794 = vmatprep.subr.mxu0 %v3314_v39  ;;  %3827 = vmatprep.subr.mxu1 %v3347_v37 }
 0xeba   :  { %3795 = vmatpush3.msra.mxu0 %v3298_v26  ;;  %3828 = vmatpush3.msra.mxu1 %v3331_v6 }
 0xebb   :  { %3829 = vmatprep.subr.mxu1 %v3346_v46  ;;  %3924 = vmatprep.subr.mxu0 %v5942_v56 }
 0xebc   :  { %3830 = vmatpush3.msra.mxu1 %v3330_v1 }
 0xf5a   :  { %v3222_v54 = vpop.f32.mrf.mxu0 }
 0xf5c   :  { %v3224_v8 = vpop.f32.mrf.mxu0  ;;  %v3293_v40 = vpop.f32.mrf.mxu1 }
 0xf5d   :  { %3432 = vmatprep.mubr.f32.mxu0 %v3224_v8 }
 0xf5e   :  { %v3295_v10 = vpop.f32.mrf.mxu1  ;;  %3433 = vmatmul.mubr.f32.vlgmr.msra.gmra.mxu0 %v3222_v54 }
 0xf5f   :  { %3502 = vmatprep.mubr.f32.mxu1 %v3295_v10  ;;  %3942 = vmatprep.mubr.msk.f32.mxu0 %vm4145_vm0, %v5942_v56 }
 0xf60   :  { %3503 = vmatmul.mubr.f32.vlgmr.msra.gmra.mxu1 %v3293_v40 }
0x101e   :  { %v3796_v11 = vpop.f32.mrf.mxu0 }
0x1020   :  { %v3797_v47 = vpop.f32.mrf.mxu0  ;;  %v3831_v43 = vpop.f32.mrf.mxu1 }
0x1021   :  { %v3798_v57 = vadd.f32 %v3797_v47, %v3796_v11 }
0x1022   :  { %v3832_v5 = vpop.f32.mrf.mxu1 }
0x1023   :  { %v3435_v3 = vadd.f32 %v3798_v57, %v3366_v35  ;;  %v3833_v51 = vadd.f32 %v3832_v5, %v3831_v43 }
0x1025   :  { %v3505_v17 = vadd.f32 %v3833_v51, %v3435_v3 }
0x1027   :  { %3558 = vrot.lane.b32.xlu0 %v3505_v17, %s4155_s0  ;;  %3565 = vrot.lane.b32.xlu1 %v3505_v17, %s4156_s26  ;;  %v3543_v28 = vmul.f32 %v3542_v21, %v3505_v17 }
0x102b   :  { %3544 = vrot.lane.b32.xlu0 %v3505_v17, %s4149_s21  ;;  %3551 = vrot.lane.b32.xlu1 %v3505_v17, %s4157_s28 }
0x102f   :  { %3525 = vrot.lane.b32.xlu0 %v3505_v17, %s4158_s1  ;;  %3532 = vrot.lane.b32.xlu1 %v3505_v17, %s4150_s30 }
0x1033   :  { %3511 = vrot.lane.b32.xlu0 %v3505_v17, %s4159_s12  ;;  %3518 = vrot.lane.b32.xlu1 %v3505_v17, %s4143_s2  ;;  %s4083_s2 = scalar_lea.vmem %s3659_s20, 128 }
0x1034   :  { %p4084_p1 = scmp.ne.s32.totalorder %s3659_s20, %s4083_s2  ;;  %p4089_p3 = scmp.lt.s32.totalorder %s4083_s2, %s4083_s2 }
0x1036   :  { %p4090_p4 = por %p4089_p3, %p4088_p2 }
0x1037   :  { %3575 = vperm.xlu1 %3998, %v3572_v16  }
0x1038   :  { %p4091_p5 = pnand %p4090_p4, %p4084_p1 }
0x1099   :  { %v3559_v0 = vpop.permute.xlu0 %3558  ;;  %v3566_v36 = vpop.permute.xlu1 %3565 }
0x109a   :  { %v3571_v49 = vmul.f32 %v3730_v9, %v3566_v36  ;;  %v3564_v22 = vmul.f32 %v3563_v4, %v3559_v0 }
0x109c   :  { %3925 = vmatpush3.msra.mxu0 %v3571_v49 }
0x109d   :  { %v3545_v38 = vpop.permute.xlu0 %3544  ;;  %3926 = vmatprep.subr.mxu0 %v5942_v56  ;;  %v3552_v19 = vpop.permute.xlu1 %3551 }
0x109e   :  { %v3557_v20 = vmul.f32 %v3556_v18, %v3552_v19  ;;  %3927 = vmatpush3.msra.mxu0 %v3564_v22  ;;  %v3550_v23 = vmul.f32 %v3549_v14, %v3545_v38 }
0x109f   :  { %3928 = vmatprep.subr.mxu0 %v5942_v56 }
0x10a0   :  { %3929 = vmatpush3.msra.mxu0 %v3557_v20 }
0x10a1   :  { %v3526_v45 = vpop.permute.xlu0 %3525  ;;  %3930 = vmatprep.subr.mxu0 %v5942_v56  ;;  %v3533_v63 = vpop.permute.xlu1 %3532 }
0x10a2   :  { %3931 = vmatpush3.msra.mxu0 %v3550_v23  ;;  %v3538_v31 = vmul.f32 %v3537_v15, %v3533_v63  ;;  %v3531_v32 = vmul.f32 %v3530_v13, %v3526_v45 }
0x10a3   :  { %3932 = vmatprep.subr.mxu0 %v5942_v56 }
0x10a4   :  { %3933 = vmatpush3.msra.mxu0 %v3543_v28 }
0x10a5   :  { %v3519_v52 = vpop.permute.xlu1 %3518  ;;  %3934 = vmatprep.subr.mxu0 %v5942_v56  ;;  %v3512_v58 = vpop.permute.xlu0 %3511 }
0x10a6   :  { %3935 = vmatpush3.msra.mxu0 %v3538_v31  ;;  %v3524_v60 = vmul.f32 %v3523_v59, %v3519_v52  ;;  %v3517_v48 = vmul.f32 %v3516_v55, %v3512_v58 }
0x10a7   :  { %3936 = vmatprep.subr.mxu0 %v5942_v56 }
0x10a8   :  { %3937 = vmatpush3.msra.mxu0 %v3531_v32 }
0x10a9   :  { %3938 = vmatprep.subr.mxu0 %v5942_v56 }
0x10aa   :  { %3939 = vmatpush3.msra.mxu0 %v3524_v60 }
0x10ab   :  { %3940 = vmatprep.subr.mxu0 %v5942_v56 }
0x10ac   :  { %3941 = vmatpush3.msra.mxu0 %v3517_v48 }
0x10ad   :  { %3943 = vmatmul.mubr.msk.f32.vlgmr.msra.gmra.mxu0 %vm818_vm10, %v3510_v27 }
0x10b2   :  { %v3576_v29 = vpop.permute.xlu1 %3575 }
0x116d   :  { %v3647_v61 = vpop.f32.mrf.mxu0 }
0x116e   :  { %v3648_v7 = vadd.f32 %v3647_v61, %v3576_v29 }
0x116f   :  { %v3944_v44 = vpop.f32.mrf.mxu0 }
0x1170   :  { %3651 = vst [vmem:[#allocation8] sm:$0xff] %v3648_v7 }
0x1171   :  { %4094 = shalt.err (!%p4091_p5)
}
0x1172   :  { %3661 = dma.vmem_to_hbm [thread:$0]  %s3659_s20, 128, %s4319_s19, [#allocation4]  }
0x1173   :  { %4107 = dma.done.wait [#allocation4], 128  }
0x1174   :  { %4108 = vsyncadd [#allocation4], 4294967168 }
0x1175   :  { %3665 = vsyncpa [#allocation3], 1 }
0x1176   :  { %3666 = vsyncpa [#allocation6], 1 }
0x1177   :  { %3667 = vsyncpa [#allocation4], 1 }

</bundles_post_ra>
